<compile_context>
chip_gen: v7x
topology: tpu7x:2x2x1
jax: 0.10.0
libtpu: 0.0.40
codegen_flags: <defaults>
</compile_context>

<pallas_src>
import functools
import numpy as np

import jax
import jax.numpy as jnp
from jax.experimental import pallas as pl
from jax.experimental.pallas import tpu as pltpu

_WINDOW_SIZE = 11
_PAD = _WINDOW_SIZE // 2
_SIGMA = 1.5
_C1 = 0.01 ** 2
_C2 = 0.03 ** 2
_LEVELS = 5
_MSSSIM_WEIGHTS = np.array([0.0448, 0.2856, 0.3001, 0.2363, 0.1333], np.float32)
_VMEM_LIMIT_BYTES = 32 * 1024 * 1024   # portable across v5e / v6e / v7x


def _gaussian_window(ws=_WINDOW_SIZE, sigma=_SIGMA):
    x = np.arange(ws, dtype=np.float64)
    g = np.exp(-((x - ws // 2) ** 2) / (2.0 * sigma ** 2))
    g /= g.sum()
    return tuple(float(v) for v in g)


_GAUSS_WIN = _gaussian_window()


def _out_rows(levels):
    # rows used: [bce, iou, ssim_0..L-1, cs_0..L-1]; pad to a multiple of 8
    return max(8, ((2 + 2 * levels + 7) // 8) * 8)


# ---------------------------------------------------------------------------
# In-kernel helpers (traced inside the Pallas kernels)
# ---------------------------------------------------------------------------
def _iota2(shape, dim):
    return jax.lax.broadcasted_iota(jnp.int32, shape, dim)


def _gauss_band(n):
    """(n, n) banded matrix implementing the 'same' zero-padded Gaussian conv."""
    d = _iota2((n, n), 0) - _iota2((n, n), 1)
    m = jnp.zeros((n, n), jnp.float32)
    for t, w in enumerate(_GAUSS_WIN):
        m = jnp.where(d == (t - _PAD), jnp.float32(w), m)
    return m


def _pool_left(h):
    """(h//2, h): left-multiply = 2x averaging along rows."""
    i = _iota2((h // 2, h), 0)
    j = _iota2((h // 2, h), 1)
    return jnp.where((j == 2 * i) | (j == 2 * i + 1), jnp.float32(0.5),
                     jnp.float32(0.0))


def _pool_right(w):
    """(w, w//2): right-multiply = 2x averaging along columns."""
    i = _iota2((w, w // 2), 0)
    j = _iota2((w, w // 2), 1)
    return jnp.where((i == 2 * j) | (i == 2 * j + 1), jnp.float32(0.5),
                     jnp.float32(0.0))


def _gconv(z):
    """Separable 11x11 Gaussian 'same' conv of a (H, W) tile via two MXU matmuls."""
    h, w = z.shape
    c = jnp.float32(_GAUSS_WIN[_PAD])
    if w == 1:
        zh = z * c
    else:
        zh = jnp.dot(z, _gauss_band(w), preferred_element_type=jnp.float32)
    if h == 1:
        return zh * c
    return jnp.dot(_gauss_band(h), zh, preferred_element_type=jnp.float32)


def _pool2(z):
    """2x2 average pooling of a (H, W) tile via two matmuls (H, W even)."""
    h, w = z.shape
    zh = jnp.dot(_pool_left(h), z, preferred_element_type=jnp.float32)
    return jnp.dot(zh, _pool_right(w), preferred_element_type=jnp.float32)


def _sum2(m):
    """Full reduction of a 2-D tile to a (1, 1) value."""
    return jnp.sum(jnp.sum(m, axis=1, keepdims=True), axis=0, keepdims=True)


# ---------------------------------------------------------------------------
# Kernel 1: label pyramid + Gaussian statistics (hoisted across branches)
# ---------------------------------------------------------------------------
@functools.lru_cache(maxsize=None)
def _make_label_stats_kernel(H, W, levels):
    def kernel(y_ref, *out_refs):
        y_outs = out_refs[0:levels]
        mu2_outs = out_refs[levels:2 * levels]
        s2_outs = out_refs[2 * levels:3 * levels]

        ys = y_ref[...]                              # (H, W)
        for s in range(levels):
            mu2 = _gconv(ys)
            sig2 = _gconv(ys * ys) - mu2 * mu2
            y_outs[s][...] = ys
            mu2_outs[s][...] = mu2
            s2_outs[s][...] = sig2
            if s < levels - 1:
                ys = _pool2(ys)

    return kernel


def _label_stats(label3, levels):
    """label3: (NB, H, W) -> tuple of 3*levels arrays (y_s, mu2_s, sigma2_s)."""
    NB, H, W = label3.shape
    shapes = [(H >> s, W >> s) for s in range(levels)]

    per_shape = [jax.ShapeDtypeStruct((NB, hs, ws), jnp.float32)
                 for hs, ws in shapes]
    per_spec = [pl.BlockSpec((None, hs, ws), lambda n: (n, 0, 0))
                for hs, ws in shapes]

    fn = pl.pallas_call(
        _make_label_stats_kernel(H, W, levels),
        grid=(NB,),
        in_specs=[pl.BlockSpec((None, H, W), lambda n: (n, 0, 0))],
        out_specs=tuple(per_spec) * 3,
        out_shape=tuple(per_shape) * 3,
        compiler_params=pltpu.CompilerParams(
            dimension_semantics=("parallel",),
            vmem_limit_bytes=_VMEM_LIMIT_BYTES),
    )
    return fn(label3)


# ---------------------------------------------------------------------------
# Kernel 2: fused BCE + IoU + 5-scale SSIM/CS sums per (branch, image)
# ---------------------------------------------------------------------------
@functools.lru_cache(maxsize=None)
def _make_mixloss_kernel(H, W, levels, hard_label):
    rows_n = _out_rows(levels)
    eps = 1e-7

    def kernel(pred_ref, *refs):
        y_refs = refs[0:levels]
        mu2_refs = refs[levels:2 * levels]
        s2_refs = refs[2 * levels:3 * levels]
        out_ref = refs[3 * levels]

        n = pl.program_id(1)                         # inner (image) axis

        p = pred_ref[...]                            # (H, W) probabilities
        y = y_refs[0][...]                           # (H, W) labels

        # ---- BCE: per-element sum for this image (mean taken on host) ----
        pc = jnp.clip(p, eps, 1.0 - eps)
        if hard_label:
            # single log per element (valid for hard 0/1 labels)
            bce_el = -jnp.log(jnp.where(y > 0.5, pc, 1.0 - pc))
        else:
            bce_el = -(y * jnp.log(pc) + (1.0 - y) * jnp.log(1.0 - pc))
        bce_sum = _sum2(bce_el)                      # (1, 1)

        # ---- soft IoU term for this image ----
        inter = _sum2(p * y)
        psum = _sum2(p)
        ysum = _sum2(y)
        iou_term = 1.0 - inter / (psum + ysum - inter + eps)   # (1, 1)

        # ---- MS-SSIM pyramid: per-scale SSIM/CS pixel sums ----
        ssim_sums = []
        cs_sums = []
        ps = p
        for s in range(levels):
            ys_ = y_refs[s][...]
            mu2 = mu2_refs[s][...]
            sig2 = s2_refs[s][...]

            mu1 = _gconv(ps)
            sig1 = _gconv(ps * ps) - mu1 * mu1
            sig12 = _gconv(ps * ys_) - mu1 * mu2

            v1 = 2.0 * sig12 + _C2
            v2 = sig1 + sig2 + _C2
            cs_map = v1 * pl.reciprocal(v2, approx=True)
            ssim_map = (cs_map * (2.0 * mu1 * mu2 + _C1)
                        * pl.reciprocal(mu1 * mu1 + mu2 * mu2 + _C1, approx=True))

            ssim_sums.append(_sum2(ssim_map))
            cs_sums.append(_sum2(cs_map))
            if s < levels - 1:
                ps = _pool2(ps)                      # in-kernel 2x2 avg pool

        # ---- pack the 2 + 2*levels partial sums into a lane-dense tile ----
        vals = [bce_sum, iou_term] + ssim_sums + cs_sums
        rows = _iota2((rows_n, 128), 0)
        tile = jnp.zeros((rows_n, 128), jnp.float32)
        for i, v in enumerate(vals):
            tile = jnp.where(rows == i, v, tile)

        @pl.when(n == 0)
        def _():
            out_ref[...] = jnp.zeros_like(out_ref)

        out_ref[...] = out_ref[...] + tile           # accumulate over images

    return kernel


def _branch_sums(preds4, stats, levels, hard_label):
    """preds4: (B, NB, H, W); stats: tuple of 3*levels label arrays."""
    B, NB, H, W = preds4.shape
    shapes = [(H >> s, W >> s) for s in range(levels)]
    rows_n = _out_rows(levels)

    in_specs = [pl.BlockSpec((None, None, H, W), lambda b, n: (b, n, 0, 0))]
    in_specs += [pl.BlockSpec((None, hs, ws), lambda b, n: (n, 0, 0))
                 for hs, ws in shapes] * 3

    fn = pl.pallas_call(
        _make_mixloss_kernel(H, W, levels, bool(hard_label)),
        grid=(B, NB),
        in_specs=in_specs,
        out_specs=pl.BlockSpec((None, rows_n, 128), lambda b, n: (b, 0, 0)),
        out_shape=jax.ShapeDtypeStruct((B, rows_n, 128), jnp.float32),
        compiler_params=pltpu.CompilerParams(
            dimension_semantics=("parallel", "arbitrary"),
            vmem_limit_bytes=_VMEM_LIMIT_BYTES),
    )
    return fn(preds4, *stats)


# ---------------------------------------------------------------------------
# MixLoss forward (matches the PyTorch module semantics)
# ---------------------------------------------------------------------------
class MixLoss:
    def __init__(self, gama_list, size_average=True, hard_label=True,
                 levels=_LEVELS):
        self.BCE_weight = gama_list[0]
        self.MSSSIM_weight = gama_list[1]
        self.IOU_weight = gama_list[2]
        self.size_average = size_average
        # hard_label=True uses the single-log BCE rewrite (valid for 0/1 masks).
        self.hard_label = hard_label
        self.levels = levels

    def __call__(self, pred_all, label, beta):
        is_tuple = isinstance(pred_all, tuple)
        preds = pred_all if is_tuple else (pred_all,)
        B = len(preds)
        N, C, H, W = preds[0].shape
        NB = N * C
        L = self.levels
        assert H % (1 << (L - 1)) == 0 and W % (1 << (L - 1)) == 0, (
            "H and W must be divisible by 2**(levels-1) for MS-SSIM pooling")
        # TODO(synk): reference MS-SSIM uses 'valid' conv and larger minimum
        # spatial sizes; this keeps the previous 'same'-padding semantics.

        label3 = label.reshape(NB, H, W).astype(jnp.float32)
        preds4 = jnp.stack(
            [p.reshape(NB, H, W).astype(jnp.float32) for p in preds], axis=0)

        # label-side work computed once and reused by every branch
        stats = _label_stats(label3, L)
        sums = _branch_sums(preds4, stats, L, self.hard_label)   # (B, rows, 128)

        # -------- host-side finalize (tiny scalar math) --------
        shapes = [(H >> s, W >> s) for s in range(L)]
        bce = sums[:, 0, 0] / float(NB * H * W)
        iou = sums[:, 1, 0] / float(NB)
        denom = jnp.asarray([float(NB * hs * ws) for hs, ws in shapes],
                            jnp.float32)
        mssim = sums[:, 2:2 + L, 0] / denom
        mcs = sums[:, 2 + L:2 + 2 * L, 0] / denom

        eps = 1e-6
        mssim = jnp.clip(mssim, eps, 1.0)
        mcs = jnp.clip(mcs, eps, 1.0)
        wts = jnp.asarray(_MSSSIM_WEIGHTS[:L])
        msssim_val = (jnp.prod(mcs[:, :-1] ** wts[:-1], axis=1)
                      * (mssim[:, -1] ** wts[-1]))
        msssim_loss = 1.0 - msssim_val

        branch_loss = (self.BCE_weight * bce
                       + self.MSSSIM_weight * msssim_loss
                       + self.IOU_weight * iou)                  # (B,)

        if is_tuple:
            loss = 0.0
            branch_weight = 1.0
            sum_weight = 0.0
            for b in range(B):
                loss = loss + branch_loss[b] * branch_weight
                sum_weight += branch_weight
                branch_weight *= beta
            loss = loss / sum_weight
        else:
            loss = branch_loss[0]
        return loss


if __name__ == "__main__":
    key = jax.random.PRNGKey(0)
    k1, k2, k3, k4 = jax.random.split(key, 4)

    N, C, H, W = 2, 1, 16, 16
    # three deep-supervision branch predictions (probabilities in (0, 1))
    pred_all = tuple(
        jax.nn.sigmoid(jax.random.normal(k, (N, C, H, W), dtype=jnp.float32))
        for k in (k1, k2, k3)
    )
    label = (jax.random.uniform(k4, (N, C, H, W)) > 0.5).astype(jnp.float32)

    loss_fn = MixLoss(gama_list=[1.0, 1.0, 1.0], size_average=True)
    loss = loss_fn(pred_all, label, beta=0.8)
    loss = jax.block_until_ready(loss)
    assert bool(jnp.isfinite(loss)), f"loss not finite: {loss}"
    print("KERNEL_OK")
</pallas_src>

<mosaic_0001>
module attributes {stable_mosaic.version = 11 : i64} {
  func.func @kernel(%arg0: i32, %arg1: memref<1x16x16xf32, #tpu.memory_space<vmem>>, %arg2: memref<1x16x16xf32, #tpu.memory_space<vmem>>, %arg3: memref<1x8x8xf32, #tpu.memory_space<vmem>>, %arg4: memref<1x4x4xf32, #tpu.memory_space<vmem>>, %arg5: memref<1x2x2xf32, #tpu.memory_space<vmem>>, %arg6: memref<1x1x1xf32, #tpu.memory_space<vmem>>, %arg7: memref<1x16x16xf32, #tpu.memory_space<vmem>>, %arg8: memref<1x8x8xf32, #tpu.memory_space<vmem>>, %arg9: memref<1x4x4xf32, #tpu.memory_space<vmem>>, %arg10: memref<1x2x2xf32, #tpu.memory_space<vmem>>, %arg11: memref<1x1x1xf32, #tpu.memory_space<vmem>>, %arg12: memref<1x16x16xf32, #tpu.memory_space<vmem>>, %arg13: memref<1x8x8xf32, #tpu.memory_space<vmem>>, %arg14: memref<1x4x4xf32, #tpu.memory_space<vmem>>, %arg15: memref<1x2x2xf32, #tpu.memory_space<vmem>>, %arg16: memref<1x1x1xf32, #tpu.memory_space<vmem>>) attributes {dimension_semantics = [#tpu.dimension_semantics<parallel>], iteration_bounds = array<i64: 2>, scalar_prefetch = 0 : i64, scratch_operands = 0 : i64, tpu.core_type = #tpu.core_type<tc>, window_params = [{transform_indices = @transform_0, window_bounds = array<i64: 1, 16, 16>}, {transform_indices = @transform_1, window_bounds = array<i64: 1, 16, 16>}, {transform_indices = @transform_2, window_bounds = array<i64: 1, 8, 8>}, {transform_indices = @transform_3, window_bounds = array<i64: 1, 4, 4>}, {transform_indices = @transform_4, window_bounds = array<i64: 1, 2, 2>}, {transform_indices = @transform_5, window_bounds = array<i64: 1, 1, 1>}, {transform_indices = @transform_6, window_bounds = array<i64: 1, 16, 16>}, {transform_indices = @transform_7, window_bounds = array<i64: 1, 8, 8>}, {transform_indices = @transform_8, window_bounds = array<i64: 1, 4, 4>}, {transform_indices = @transform_9, window_bounds = array<i64: 1, 2, 2>}, {transform_indices = @transform_10, window_bounds = array<i64: 1, 1, 1>}, {transform_indices = @transform_11, window_bounds = array<i64: 1, 16, 16>}, {transform_indices = @transform_12, window_bounds = array<i64: 1, 8, 8>}, {transform_indices = @transform_13, window_bounds = array<i64: 1, 4, 4>}, {transform_indices = @transform_14, window_bounds = array<i64: 1, 2, 2>}, {transform_indices = @transform_15, window_bounds = array<i64: 1, 1, 1>}]} {
    %c0 = arith.constant 0 : index
    %c0_0 = arith.constant 0 : index
    %c0_1 = arith.constant 0 : index
    %0 = vector.load %arg1[%c0, %c0_0, %c0_1] : memref<1x16x16xf32, #tpu.memory_space<vmem>>, vector<1x16x16xf32>
    %1 = vector.shape_cast %0 : vector<1x16x16xf32> to vector<16x16xf32>
    %2 = tpu.iota {dimensions = array<i32: 0>} : vector<16x16xi32>
    %3 = tpu.iota {dimensions = array<i32: 1>} : vector<16x16xi32>
    %4 = arith.subi %2, %3 : vector<16x16xi32>
    %cst = arith.constant 0.000000e+00 : f32
    %5 = vector.broadcast %cst : f32 to vector<16x16xf32>
    %c-5_i32 = arith.constant -5 : i32
    %6 = vector.broadcast %c-5_i32 : i32 to vector<16x16xi32>
    %7 = arith.cmpi eq, %4, %6 : vector<16x16xi32>
    %cst_2 = arith.constant 0.00102838012 : f32
    %8 = vector.broadcast %cst_2 : f32 to vector<16x16xf32>
    %9 = arith.select %7, %8, %5 : vector<16x16xi1>, vector<16x16xf32>
    %c-4_i32 = arith.constant -4 : i32
    %10 = vector.broadcast %c-4_i32 : i32 to vector<16x16xi32>
    %11 = arith.cmpi eq, %4, %10 : vector<16x16xi32>
    %cst_3 = arith.constant 0.00759875821 : f32
    %12 = vector.broadcast %cst_3 : f32 to vector<16x16xf32>
    %13 = arith.select %11, %12, %9 : vector<16x16xi1>, vector<16x16xf32>
    %c-3_i32 = arith.constant -3 : i32
    %14 = vector.broadcast %c-3_i32 : i32 to vector<16x16xi32>
    %15 = arith.cmpi eq, %4, %14 : vector<16x16xi32>
    %cst_4 = arith.constant 0.0360007733 : f32
    %16 = vector.broadcast %cst_4 : f32 to vector<16x16xf32>
    %17 = arith.select %15, %16, %13 : vector<16x16xi1>, vector<16x16xf32>
    %c-2_i32 = arith.constant -2 : i32
    %18 = vector.broadcast %c-2_i32 : i32 to vector<16x16xi32>
    %19 = arith.cmpi eq, %4, %18 : vector<16x16xi32>
    %cst_5 = arith.constant 0.109360687 : f32
    %20 = vector.broadcast %cst_5 : f32 to vector<16x16xf32>
    %21 = arith.select %19, %20, %17 : vector<16x16xi1>, vector<16x16xf32>
    %c-1_i32 = arith.constant -1 : i32
    %22 = vector.broadcast %c-1_i32 : i32 to vector<16x16xi32>
    %23 = arith.cmpi eq, %4, %22 : vector<16x16xi32>
    %cst_6 = arith.constant 0.213005543 : f32
    %24 = vector.broadcast %cst_6 : f32 to vector<16x16xf32>
    %25 = arith.select %23, %24, %21 : vector<16x16xi1>, vector<16x16xf32>
    %c0_i32 = arith.constant 0 : i32
    %26 = vector.broadcast %c0_i32 : i32 to vector<16x16xi32>
    %27 = arith.cmpi eq, %4, %26 : vector<16x16xi32>
    %cst_7 = arith.constant 0.266011715 : f32
    %28 = vector.broadcast %cst_7 : f32 to vector<16x16xf32>
    %29 = arith.select %27, %28, %25 : vector<16x16xi1>, vector<16x16xf32>
    %c1_i32 = arith.constant 1 : i32
    %30 = vector.broadcast %c1_i32 : i32 to vector<16x16xi32>
    %31 = arith.cmpi eq, %4, %30 : vector<16x16xi32>
    %cst_8 = arith.constant 0.213005543 : f32
    %32 = vector.broadcast %cst_8 : f32 to vector<16x16xf32>
    %33 = arith.select %31, %32, %29 : vector<16x16xi1>, vector<16x16xf32>
    %c2_i32 = arith.constant 2 : i32
    %34 = vector.broadcast %c2_i32 : i32 to vector<16x16xi32>
    %35 = arith.cmpi eq, %4, %34 : vector<16x16xi32>
    %cst_9 = arith.constant 0.109360687 : f32
    %36 = vector.broadcast %cst_9 : f32 to vector<16x16xf32>
    %37 = arith.select %35, %36, %33 : vector<16x16xi1>, vector<16x16xf32>
    %c3_i32 = arith.constant 3 : i32
    %38 = vector.broadcast %c3_i32 : i32 to vector<16x16xi32>
    %39 = arith.cmpi eq, %4, %38 : vector<16x16xi32>
    %cst_10 = arith.constant 0.0360007733 : f32
    %40 = vector.broadcast %cst_10 : f32 to vector<16x16xf32>
    %41 = arith.select %39, %40, %37 : vector<16x16xi1>, vector<16x16xf32>
    %c4_i32 = arith.constant 4 : i32
    %42 = vector.broadcast %c4_i32 : i32 to vector<16x16xi32>
    %43 = arith.cmpi eq, %4, %42 : vector<16x16xi32>
    %cst_11 = arith.constant 0.00759875821 : f32
    %44 = vector.broadcast %cst_11 : f32 to vector<16x16xf32>
    %45 = arith.select %43, %44, %41 : vector<16x16xi1>, vector<16x16xf32>
    %c5_i32 = arith.constant 5 : i32
    %46 = vector.broadcast %c5_i32 : i32 to vector<16x16xi32>
    %47 = arith.cmpi eq, %4, %46 : vector<16x16xi32>
    %cst_12 = arith.constant 0.00102838012 : f32
    %48 = vector.broadcast %cst_12 : f32 to vector<16x16xf32>
    %49 = arith.select %47, %48, %45 : vector<16x16xi1>, vector<16x16xf32>
    %cst_13 = arith.constant dense<0.000000e+00> : vector<16x16xf32>
    %50 = tpu.matmul %1, %49, %cst_13 {dimension_numbers = #tpu.dot_dimension_numbers<[1], [0], [0], [1], [0, 0, 1, 1], [], []>} : vector<16x16xf32>, vector<16x16xf32>, vector<16x16xf32> -> vector<16x16xf32>
    %51 = tpu.iota {dimensions = array<i32: 0>} : vector<16x16xi32>
    %52 = tpu.iota {dimensions = array<i32: 1>} : vector<16x16xi32>
    %53 = arith.subi %51, %52 : vector<16x16xi32>
    %cst_14 = arith.constant 0.000000e+00 : f32
    %54 = vector.broadcast %cst_14 : f32 to vector<16x16xf32>
    %c-5_i32_15 = arith.constant -5 : i32
    %55 = vector.broadcast %c-5_i32_15 : i32 to vector<16x16xi32>
    %56 = arith.cmpi eq, %53, %55 : vector<16x16xi32>
    %cst_16 = arith.constant 0.00102838012 : f32
    %57 = vector.broadcast %cst_16 : f32 to vector<16x16xf32>
    %58 = arith.select %56, %57, %54 : vector<16x16xi1>, vector<16x16xf32>
    %c-4_i32_17 = arith.constant -4 : i32
    %59 = vector.broadcast %c-4_i32_17 : i32 to vector<16x16xi32>
    %60 = arith.cmpi eq, %53, %59 : vector<16x16xi32>
    %cst_18 = arith.constant 0.00759875821 : f32
    %61 = vector.broadcast %cst_18 : f32 to vector<16x16xf32>
    %62 = arith.select %60, %61, %58 : vector<16x16xi1>, vector<16x16xf32>
    %c-3_i32_19 = arith.constant -3 : i32
    %63 = vector.broadcast %c-3_i32_19 : i32 to vector<16x16xi32>
    %64 = arith.cmpi eq, %53, %63 : vector<16x16xi32>
    %cst_20 = arith.constant 0.0360007733 : f32
    %65 = vector.broadcast %cst_20 : f32 to vector<16x16xf32>
    %66 = arith.select %64, %65, %62 : vector<16x16xi1>, vector<16x16xf32>
    %c-2_i32_21 = arith.constant -2 : i32
    %67 = vector.broadcast %c-2_i32_21 : i32 to vector<16x16xi32>
    %68 = arith.cmpi eq, %53, %67 : vector<16x16xi32>
    %cst_22 = arith.constant 0.109360687 : f32
    %69 = vector.broadcast %cst_22 : f32 to vector<16x16xf32>
    %70 = arith.select %68, %69, %66 : vector<16x16xi1>, vector<16x16xf32>
    %c-1_i32_23 = arith.constant -1 : i32
    %71 = vector.broadcast %c-1_i32_23 : i32 to vector<16x16xi32>
    %72 = arith.cmpi eq, %53, %71 : vector<16x16xi32>
    %cst_24 = arith.constant 0.213005543 : f32
    %73 = vector.broadcast %cst_24 : f32 to vector<16x16xf32>
    %74 = arith.select %72, %73, %70 : vector<16x16xi1>, vector<16x16xf32>
    %c0_i32_25 = arith.constant 0 : i32
    %75 = vector.broadcast %c0_i32_25 : i32 to vector<16x16xi32>
    %76 = arith.cmpi eq, %53, %75 : vector<16x16xi32>
    %cst_26 = arith.constant 0.266011715 : f32
    %77 = vector.broadcast %cst_26 : f32 to vector<16x16xf32>
    %78 = arith.select %76, %77, %74 : vector<16x16xi1>, vector<16x16xf32>
    %c1_i32_27 = arith.constant 1 : i32
    %79 = vector.broadcast %c1_i32_27 : i32 to vector<16x16xi32>
    %80 = arith.cmpi eq, %53, %79 : vector<16x16xi32>
    %cst_28 = arith.constant 0.213005543 : f32
    %81 = vector.broadcast %cst_28 : f32 to vector<16x16xf32>
    %82 = arith.select %80, %81, %78 : vector<16x16xi1>, vector<16x16xf32>
    %c2_i32_29 = arith.constant 2 : i32
    %83 = vector.broadcast %c2_i32_29 : i32 to vector<16x16xi32>
    %84 = arith.cmpi eq, %53, %83 : vector<16x16xi32>
    %cst_30 = arith.constant 0.109360687 : f32
    %85 = vector.broadcast %cst_30 : f32 to vector<16x16xf32>
    %86 = arith.select %84, %85, %82 : vector<16x16xi1>, vector<16x16xf32>
    %c3_i32_31 = arith.constant 3 : i32
    %87 = vector.broadcast %c3_i32_31 : i32 to vector<16x16xi32>
    %88 = arith.cmpi eq, %53, %87 : vector<16x16xi32>
    %cst_32 = arith.constant 0.0360007733 : f32
    %89 = vector.broadcast %cst_32 : f32 to vector<16x16xf32>
    %90 = arith.select %88, %89, %86 : vector<16x16xi1>, vector<16x16xf32>
    %c4_i32_33 = arith.constant 4 : i32
    %91 = vector.broadcast %c4_i32_33 : i32 to vector<16x16xi32>
    %92 = arith.cmpi eq, %53, %91 : vector<16x16xi32>
    %cst_34 = arith.constant 0.00759875821 : f32
    %93 = vector.broadcast %cst_34 : f32 to vector<16x16xf32>
    %94 = arith.select %92, %93, %90 : vector<16x16xi1>, vector<16x16xf32>
    %c5_i32_35 = arith.constant 5 : i32
    %95 = vector.broadcast %c5_i32_35 : i32 to vector<16x16xi32>
    %96 = arith.cmpi eq, %53, %95 : vector<16x16xi32>
    %cst_36 = arith.constant 0.00102838012 : f32
    %97 = vector.broadcast %cst_36 : f32 to vector<16x16xf32>
    %98 = arith.select %96, %97, %94 : vector<16x16xi1>, vector<16x16xf32>
    %cst_37 = arith.constant dense<0.000000e+00> : vector<16x16xf32>
    %99 = tpu.matmul %98, %50, %cst_37 {dimension_numbers = #tpu.dot_dimension_numbers<[1], [0], [0], [1], [0, 0, 1, 1], [], []>} : vector<16x16xf32>, vector<16x16xf32>, vector<16x16xf32> -> vector<16x16xf32>
    %100 = arith.mulf %1, %1 : vector<16x16xf32>
    %101 = tpu.iota {dimensions = array<i32: 0>} : vector<16x16xi32>
    %102 = tpu.iota {dimensions = array<i32: 1>} : vector<16x16xi32>
    %103 = arith.subi %101, %102 : vector<16x16xi32>
    %cst_38 = arith.constant 0.000000e+00 : f32
    %104 = vector.broadcast %cst_38 : f32 to vector<16x16xf32>
    %c-5_i32_39 = arith.constant -5 : i32
    %105 = vector.broadcast %c-5_i32_39 : i32 to vector<16x16xi32>
    %106 = arith.cmpi eq, %103, %105 : vector<16x16xi32>
    %cst_40 = arith.constant 0.00102838012 : f32
    %107 = vector.broadcast %cst_40 : f32 to vector<16x16xf32>
    %108 = arith.select %106, %107, %104 : vector<16x16xi1>, vector<16x16xf32>
    %c-4_i32_41 = arith.constant -4 : i32
    %109 = vector.broadcast %c-4_i32_41 : i32 to vector<16x16xi32>
    %110 = arith.cmpi eq, %103, %109 : vector<16x16xi32>
    %cst_42 = arith.constant 0.00759875821 : f32
    %111 = vector.broadcast %cst_42 : f32 to vector<16x16xf32>
    %112 = arith.select %110, %111, %108 : vector<16x16xi1>, vector<16x16xf32>
    %c-3_i32_43 = arith.constant -3 : i32
    %113 = vector.broadcast %c-3_i32_43 : i32 to vector<16x16xi32>
    %114 = arith.cmpi eq, %103, %113 : vector<16x16xi32>
    %cst_44 = arith.constant 0.0360007733 : f32
    %115 = vector.broadcast %cst_44 : f32 to vector<16x16xf32>
    %116 = arith.select %114, %115, %112 : vector<16x16xi1>, vector<16x16xf32>
    %c-2_i32_45 = arith.constant -2 : i32
    %117 = vector.broadcast %c-2_i32_45 : i32 to vector<16x16xi32>
    %118 = arith.cmpi eq, %103, %117 : vector<16x16xi32>
    %cst_46 = arith.constant 0.109360687 : f32
    %119 = vector.broadcast %cst_46 : f32 to vector<16x16xf32>
    %120 = arith.select %118, %119, %116 : vector<16x16xi1>, vector<16x16xf32>
    %c-1_i32_47 = arith.constant -1 : i32
    %121 = vector.broadcast %c-1_i32_47 : i32 to vector<16x16xi32>
    %122 = arith.cmpi eq, %103, %121 : vector<16x16xi32>
    %cst_48 = arith.constant 0.213005543 : f32
    %123 = vector.broadcast %cst_48 : f32 to vector<16x16xf32>
    %124 = arith.select %122, %123, %120 : vector<16x16xi1>, vector<16x16xf32>
    %c0_i32_49 = arith.constant 0 : i32
    %125 = vector.broadcast %c0_i32_49 : i32 to vector<16x16xi32>
    %126 = arith.cmpi eq, %103, %125 : vector<16x16xi32>
    %cst_50 = arith.constant 0.266011715 : f32
    %127 = vector.broadcast %cst_50 : f32 to vector<16x16xf32>
    %128 = arith.select %126, %127, %124 : vector<16x16xi1>, vector<16x16xf32>
    %c1_i32_51 = arith.constant 1 : i32
    %129 = vector.broadcast %c1_i32_51 : i32 to vector<16x16xi32>
    %130 = arith.cmpi eq, %103, %129 : vector<16x16xi32>
    %cst_52 = arith.constant 0.213005543 : f32
    %131 = vector.broadcast %cst_52 : f32 to vector<16x16xf32>
    %132 = arith.select %130, %131, %128 : vector<16x16xi1>, vector<16x16xf32>
    %c2_i32_53 = arith.constant 2 : i32
    %133 = vector.broadcast %c2_i32_53 : i32 to vector<16x16xi32>
    %134 = arith.cmpi eq, %103, %133 : vector<16x16xi32>
    %cst_54 = arith.constant 0.109360687 : f32
    %135 = vector.broadcast %cst_54 : f32 to vector<16x16xf32>
    %136 = arith.select %134, %135, %132 : vector<16x16xi1>, vector<16x16xf32>
    %c3_i32_55 = arith.constant 3 : i32
    %137 = vector.broadcast %c3_i32_55 : i32 to vector<16x16xi32>
    %138 = arith.cmpi eq, %103, %137 : vector<16x16xi32>
    %cst_56 = arith.constant 0.0360007733 : f32
    %139 = vector.broadcast %cst_56 : f32 to vector<16x16xf32>
    %140 = arith.select %138, %139, %136 : vector<16x16xi1>, vector<16x16xf32>
    %c4_i32_57 = arith.constant 4 : i32
    %141 = vector.broadcast %c4_i32_57 : i32 to vector<16x16xi32>
    %142 = arith.cmpi eq, %103, %141 : vector<16x16xi32>
    %cst_58 = arith.constant 0.00759875821 : f32
    %143 = vector.broadcast %cst_58 : f32 to vector<16x16xf32>
    %144 = arith.select %142, %143, %140 : vector<16x16xi1>, vector<16x16xf32>
    %c5_i32_59 = arith.constant 5 : i32
    %145 = vector.broadcast %c5_i32_59 : i32 to vector<16x16xi32>
    %146 = arith.cmpi eq, %103, %145 : vector<16x16xi32>
    %cst_60 = arith.constant 0.00102838012 : f32
    %147 = vector.broadcast %cst_60 : f32 to vector<16x16xf32>
    %148 = arith.select %146, %147, %144 : vector<16x16xi1>, vector<16x16xf32>
    %cst_61 = arith.constant dense<0.000000e+00> : vector<16x16xf32>
    %149 = tpu.matmul %100, %148, %cst_61 {dimension_numbers = #tpu.dot_dimension_numbers<[1], [0], [0], [1], [0, 0, 1, 1], [], []>} : vector<16x16xf32>, vector<16x16xf32>, vector<16x16xf32> -> vector<16x16xf32>
    %150 = tpu.iota {dimensions = array<i32: 0>} : vector<16x16xi32>
    %151 = tpu.iota {dimensions = array<i32: 1>} : vector<16x16xi32>
    %152 = arith.subi %150, %151 : vector<16x16xi32>
    %cst_62 = arith.constant 0.000000e+00 : f32
    %153 = vector.broadcast %cst_62 : f32 to vector<16x16xf32>
    %c-5_i32_63 = arith.constant -5 : i32
    %154 = vector.broadcast %c-5_i32_63 : i32 to vector<16x16xi32>
    %155 = arith.cmpi eq, %152, %154 : vector<16x16xi32>
    %cst_64 = arith.constant 0.00102838012 : f32
    %156 = vector.broadcast %cst_64 : f32 to vector<16x16xf32>
    %157 = arith.select %155, %156, %153 : vector<16x16xi1>, vector<16x16xf32>
    %c-4_i32_65 = arith.constant -4 : i32
    %158 = vector.broadcast %c-4_i32_65 : i32 to vector<16x16xi32>
    %159 = arith.cmpi eq, %152, %158 : vector<16x16xi32>
    %cst_66 = arith.constant 0.00759875821 : f32
    %160 = vector.broadcast %cst_66 : f32 to vector<16x16xf32>
    %161 = arith.select %159, %160, %157 : vector<16x16xi1>, vector<16x16xf32>
    %c-3_i32_67 = arith.constant -3 : i32
    %162 = vector.broadcast %c-3_i32_67 : i32 to vector<16x16xi32>
    %163 = arith.cmpi eq, %152, %162 : vector<16x16xi32>
    %cst_68 = arith.constant 0.0360007733 : f32
    %164 = vector.broadcast %cst_68 : f32 to vector<16x16xf32>
    %165 = arith.select %163, %164, %161 : vector<16x16xi1>, vector<16x16xf32>
    %c-2_i32_69 = arith.constant -2 : i32
    %166 = vector.broadcast %c-2_i32_69 : i32 to vector<16x16xi32>
    %167 = arith.cmpi eq, %152, %166 : vector<16x16xi32>
    %cst_70 = arith.constant 0.109360687 : f32
    %168 = vector.broadcast %cst_70 : f32 to vector<16x16xf32>
    %169 = arith.select %167, %168, %165 : vector<16x16xi1>, vector<16x16xf32>
    %c-1_i32_71 = arith.constant -1 : i32
    %170 = vector.broadcast %c-1_i32_71 : i32 to vector<16x16xi32>
    %171 = arith.cmpi eq, %152, %170 : vector<16x16xi32>
    %cst_72 = arith.constant 0.213005543 : f32
    %172 = vector.broadcast %cst_72 : f32 to vector<16x16xf32>
    %173 = arith.select %171, %172, %169 : vector<16x16xi1>, vector<16x16xf32>
    %c0_i32_73 = arith.constant 0 : i32
    %174 = vector.broadcast %c0_i32_73 : i32 to vector<16x16xi32>
    %175 = arith.cmpi eq, %152, %174 : vector<16x16xi32>
    %cst_74 = arith.constant 0.266011715 : f32
    %176 = vector.broadcast %cst_74 : f32 to vector<16x16xf32>
    %177 = arith.select %175, %176, %173 : vector<16x16xi1>, vector<16x16xf32>
    %c1_i32_75 = arith.constant 1 : i32
    %178 = vector.broadcast %c1_i32_75 : i32 to vector<16x16xi32>
    %179 = arith.cmpi eq, %152, %178 : vector<16x16xi32>
    %cst_76 = arith.constant 0.213005543 : f32
    %180 = vector.broadcast %cst_76 : f32 to vector<16x16xf32>
    %181 = arith.select %179, %180, %177 : vector<16x16xi1>, vector<16x16xf32>
    %c2_i32_77 = arith.constant 2 : i32
    %182 = vector.broadcast %c2_i32_77 : i32 to vector<16x16xi32>
    %183 = arith.cmpi eq, %152, %182 : vector<16x16xi32>
    %cst_78 = arith.constant 0.109360687 : f32
    %184 = vector.broadcast %cst_78 : f32 to vector<16x16xf32>
    %185 = arith.select %183, %184, %181 : vector<16x16xi1>, vector<16x16xf32>
    %c3_i32_79 = arith.constant 3 : i32
    %186 = vector.broadcast %c3_i32_79 : i32 to vector<16x16xi32>
    %187 = arith.cmpi eq, %152, %186 : vector<16x16xi32>
    %cst_80 = arith.constant 0.0360007733 : f32
    %188 = vector.broadcast %cst_80 : f32 to vector<16x16xf32>
    %189 = arith.select %187, %188, %185 : vector<16x16xi1>, vector<16x16xf32>
    %c4_i32_81 = arith.constant 4 : i32
    %190 = vector.broadcast %c4_i32_81 : i32 to vector<16x16xi32>
    %191 = arith.cmpi eq, %152, %190 : vector<16x16xi32>
    %cst_82 = arith.constant 0.00759875821 : f32
    %192 = vector.broadcast %cst_82 : f32 to vector<16x16xf32>
    %193 = arith.select %191, %192, %189 : vector<16x16xi1>, vector<16x16xf32>
    %c5_i32_83 = arith.constant 5 : i32
    %194 = vector.broadcast %c5_i32_83 : i32 to vector<16x16xi32>
    %195 = arith.cmpi eq, %152, %194 : vector<16x16xi32>
    %cst_84 = arith.constant 0.00102838012 : f32
    %196 = vector.broadcast %cst_84 : f32 to vector<16x16xf32>
    %197 = arith.select %195, %196, %193 : vector<16x16xi1>, vector<16x16xf32>
    %cst_85 = arith.constant dense<0.000000e+00> : vector<16x16xf32>
    %198 = tpu.matmul %197, %149, %cst_85 {dimension_numbers = #tpu.dot_dimension_numbers<[1], [0], [0], [1], [0, 0, 1, 1], [], []>} : vector<16x16xf32>, vector<16x16xf32>, vector<16x16xf32> -> vector<16x16xf32>
    %199 = arith.mulf %99, %99 : vector<16x16xf32>
    %200 = arith.subf %198, %199 : vector<16x16xf32>
    %c0_86 = arith.constant 0 : index
    %c0_87 = arith.constant 0 : index
    %c0_88 = arith.constant 0 : index
    %201 = vector.load %arg2[%c0_86, %c0_87, %c0_88] : memref<1x16x16xf32, #tpu.memory_space<vmem>>, vector<1x16x16xf32>
    %202 = vector.shape_cast %201 : vector<1x16x16xf32> to vector<16x16xf32>
    %203 = vector.shape_cast %1 : vector<16x16xf32> to vector<1x16x16xf32>
    tpu.vector_store %arg2[%c0_86, %c0_87, %c0_88], %203 {strides = array<i32>} : memref<1x16x16xf32, #tpu.memory_space<vmem>>, vector<1x16x16xf32>,
    %c0_89 = arith.constant 0 : index
    %c0_90 = arith.constant 0 : index
    %c0_91 = arith.constant 0 : index
    %204 = vector.load %arg7[%c0_89, %c0_90, %c0_91] : memref<1x16x16xf32, #tpu.memory_space<vmem>>, vector<1x16x16xf32>
    %205 = vector.shape_cast %204 : vector<1x16x16xf32> to vector<16x16xf32>
    %206 = vector.shape_cast %99 : vector<16x16xf32> to vector<1x16x16xf32>
    tpu.vector_store %arg7[%c0_89, %c0_90, %c0_91], %206 {strides = array<i32>} : memref<1x16x16xf32, #tpu.memory_space<vmem>>, vector<1x16x16xf32>,
    %c0_92 = arith.constant 0 : index
    %c0_93 = arith.constant 0 : index
    %c0_94 = arith.constant 0 : index
    %207 = vector.load %arg12[%c0_92, %c0_93, %c0_94] : memref<1x16x16xf32, #tpu.memory_space<vmem>>, vector<1x16x16xf32>
    %208 = vector.shape_cast %207 : vector<1x16x16xf32> to vector<16x16xf32>
    %209 = vector.shape_cast %200 : vector<16x16xf32> to vector<1x16x16xf32>
    tpu.vector_store %arg12[%c0_92, %c0_93, %c0_94], %209 {strides = array<i32>} : memref<1x16x16xf32, #tpu.memory_space<vmem>>, vector<1x16x16xf32>,
    %210 = tpu.iota {dimensions = array<i32: 0>} : vector<8x16xi32>
    %211 = tpu.iota {dimensions = array<i32: 1>} : vector<8x16xi32>
    %c2_i32_95 = arith.constant 2 : i32
    %212 = vector.broadcast %c2_i32_95 : i32 to vector<8x16xi32>
    %213 = arith.muli %212, %210 : vector<8x16xi32>
    %214 = arith.cmpi eq, %211, %213 : vector<8x16xi32>
    %c2_i32_96 = arith.constant 2 : i32
    %215 = vector.broadcast %c2_i32_96 : i32 to vector<8x16xi32>
    %216 = arith.muli %215, %210 : vector<8x16xi32>
    %c1_i32_97 = arith.constant 1 : i32
    %217 = vector.broadcast %c1_i32_97 : i32 to vector<8x16xi32>
    %218 = arith.addi %216, %217 : vector<8x16xi32>
    %219 = arith.cmpi eq, %211, %218 : vector<8x16xi32>
    %220 = arith.ori %214, %219 : vector<8x16xi1>
    %cst_98 = arith.constant 5.000000e-01 : f32
    %cst_99 = arith.constant 0.000000e+00 : f32
    %221 = vector.broadcast %cst_98 : f32 to vector<8x16xf32>
    %222 = vector.broadcast %cst_99 : f32 to vector<8x16xf32>
    %223 = arith.select %220, %221, %222 : vector<8x16xi1>, vector<8x16xf32>
    %cst_100 = arith.constant dense<0.000000e+00> : vector<8x16xf32>
    %224 = tpu.matmul %223, %1, %cst_100 {dimension_numbers = #tpu.dot_dimension_numbers<[1], [0], [0], [1], [0, 0, 1, 1], [], []>} : vector<8x16xf32>, vector<16x16xf32>, vector<8x16xf32> -> vector<8x16xf32>
    %225 = tpu.iota {dimensions = array<i32: 0>} : vector<16x8xi32>
    %226 = tpu.iota {dimensions = array<i32: 1>} : vector<16x8xi32>
    %c2_i32_101 = arith.constant 2 : i32
    %227 = vector.broadcast %c2_i32_101 : i32 to vector<16x8xi32>
    %228 = arith.muli %227, %226 : vector<16x8xi32>
    %229 = arith.cmpi eq, %225, %228 : vector<16x8xi32>
    %c2_i32_102 = arith.constant 2 : i32
    %230 = vector.broadcast %c2_i32_102 : i32 to vector<16x8xi32>
    %231 = arith.muli %230, %226 : vector<16x8xi32>
    %c1_i32_103 = arith.constant 1 : i32
    %232 = vector.broadcast %c1_i32_103 : i32 to vector<16x8xi32>
    %233 = arith.addi %231, %232 : vector<16x8xi32>
    %234 = arith.cmpi eq, %225, %233 : vector<16x8xi32>
    %235 = arith.ori %229, %234 : vector<16x8xi1>
    %cst_104 = arith.constant 5.000000e-01 : f32
    %cst_105 = arith.constant 0.000000e+00 : f32
    %236 = vector.broadcast %cst_104 : f32 to vector<16x8xf32>
    %237 = vector.broadcast %cst_105 : f32 to vector<16x8xf32>
    %238 = arith.select %235, %236, %237 : vector<16x8xi1>, vector<16x8xf32>
    %cst_106 = arith.constant dense<0.000000e+00> : vector<8x8xf32>
    %239 = tpu.matmul %224, %238, %cst_106 {dimension_numbers = #tpu.dot_dimension_numbers<[1], [0], [0], [1], [0, 0, 1, 1], [], []>} : vector<8x16xf32>, vector<16x8xf32>, vector<8x8xf32> -> vector<8x8xf32>
    %240 = tpu.iota {dimensions = array<i32: 0>} : vector<8x8xi32>
    %241 = tpu.iota {dimensions = array<i32: 1>} : vector<8x8xi32>
    %242 = arith.subi %240, %241 : vector<8x8xi32>
    %cst_107 = arith.constant 0.000000e+00 : f32
    %243 = vector.broadcast %cst_107 : f32 to vector<8x8xf32>
    %c-5_i32_108 = arith.constant -5 : i32
    %244 = vector.broadcast %c-5_i32_108 : i32 to vector<8x8xi32>
    %245 = arith.cmpi eq, %242, %244 : vector<8x8xi32>
    %cst_109 = arith.constant 0.00102838012 : f32
    %246 = vector.broadcast %cst_109 : f32 to vector<8x8xf32>
    %247 = arith.select %245, %246, %243 : vector<8x8xi1>, vector<8x8xf32>
    %c-4_i32_110 = arith.constant -4 : i32
    %248 = vector.broadcast %c-4_i32_110 : i32 to vector<8x8xi32>
    %249 = arith.cmpi eq, %242, %248 : vector<8x8xi32>
    %cst_111 = arith.constant 0.00759875821 : f32
    %250 = vector.broadcast %cst_111 : f32 to vector<8x8xf32>
    %251 = arith.select %249, %250, %247 : vector<8x8xi1>, vector<8x8xf32>
    %c-3_i32_112 = arith.constant -3 : i32
    %252 = vector.broadcast %c-3_i32_112 : i32 to vector<8x8xi32>
    %253 = arith.cmpi eq, %242, %252 : vector<8x8xi32>
    %cst_113 = arith.constant 0.0360007733 : f32
    %254 = vector.broadcast %cst_113 : f32 to vector<8x8xf32>
    %255 = arith.select %253, %254, %251 : vector<8x8xi1>, vector<8x8xf32>
    %c-2_i32_114 = arith.constant -2 : i32
    %256 = vector.broadcast %c-2_i32_114 : i32 to vector<8x8xi32>
    %257 = arith.cmpi eq, %242, %256 : vector<8x8xi32>
    %cst_115 = arith.constant 0.109360687 : f32
    %258 = vector.broadcast %cst_115 : f32 to vector<8x8xf32>
    %259 = arith.select %257, %258, %255 : vector<8x8xi1>, vector<8x8xf32>
    %c-1_i32_116 = arith.constant -1 : i32
    %260 = vector.broadcast %c-1_i32_116 : i32 to vector<8x8xi32>
    %261 = arith.cmpi eq, %242, %260 : vector<8x8xi32>
    %cst_117 = arith.constant 0.213005543 : f32
    %262 = vector.broadcast %cst_117 : f32 to vector<8x8xf32>
    %263 = arith.select %261, %262, %259 : vector<8x8xi1>, vector<8x8xf32>
    %c0_i32_118 = arith.constant 0 : i32
    %264 = vector.broadcast %c0_i32_118 : i32 to vector<8x8xi32>
    %265 = arith.cmpi eq, %242, %264 : vector<8x8xi32>
    %cst_119 = arith.constant 0.266011715 : f32
    %266 = vector.broadcast %cst_119 : f32 to vector<8x8xf32>
    %267 = arith.select %265, %266, %263 : vector<8x8xi1>, vector<8x8xf32>
    %c1_i32_120 = arith.constant 1 : i32
    %268 = vector.broadcast %c1_i32_120 : i32 to vector<8x8xi32>
    %269 = arith.cmpi eq, %242, %268 : vector<8x8xi32>
    %cst_121 = arith.constant 0.213005543 : f32
    %270 = vector.broadcast %cst_121 : f32 to vector<8x8xf32>
    %271 = arith.select %269, %270, %267 : vector<8x8xi1>, vector<8x8xf32>
    %c2_i32_122 = arith.constant 2 : i32
    %272 = vector.broadcast %c2_i32_122 : i32 to vector<8x8xi32>
    %273 = arith.cmpi eq, %242, %272 : vector<8x8xi32>
    %cst_123 = arith.constant 0.109360687 : f32
    %274 = vector.broadcast %cst_123 : f32 to vector<8x8xf32>
    %275 = arith.select %273, %274, %271 : vector<8x8xi1>, vector<8x8xf32>
    %c3_i32_124 = arith.constant 3 : i32
    %276 = vector.broadcast %c3_i32_124 : i32 to vector<8x8xi32>
    %277 = arith.cmpi eq, %242, %276 : vector<8x8xi32>
    %cst_125 = arith.constant 0.0360007733 : f32
    %278 = vector.broadcast %cst_125 : f32 to vector<8x8xf32>
    %279 = arith.select %277, %278, %275 : vector<8x8xi1>, vector<8x8xf32>
    %c4_i32_126 = arith.constant 4 : i32
    %280 = vector.broadcast %c4_i32_126 : i32 to vector<8x8xi32>
    %281 = arith.cmpi eq, %242, %280 : vector<8x8xi32>
    %cst_127 = arith.constant 0.00759875821 : f32
    %282 = vector.broadcast %cst_127 : f32 to vector<8x8xf32>
    %283 = arith.select %281, %282, %279 : vector<8x8xi1>, vector<8x8xf32>
    %c5_i32_128 = arith.constant 5 : i32
    %284 = vector.broadcast %c5_i32_128 : i32 to vector<8x8xi32>
    %285 = arith.cmpi eq, %242, %284 : vector<8x8xi32>
    %cst_129 = arith.constant 0.00102838012 : f32
    %286 = vector.broadcast %cst_129 : f32 to vector<8x8xf32>
    %287 = arith.select %285, %286, %283 : vector<8x8xi1>, vector<8x8xf32>
    %cst_130 = arith.constant dense<0.000000e+00> : vector<8x8xf32>
    %288 = tpu.matmul %239, %287, %cst_130 {dimension_numbers = #tpu.dot_dimension_numbers<[1], [0], [0], [1], [0, 0, 1, 1], [], []>} : vector<8x8xf32>, vector<8x8xf32>, vector<8x8xf32> -> vector<8x8xf32>
    %289 = tpu.iota {dimensions = array<i32: 0>} : vector<8x8xi32>
    %290 = tpu.iota {dimensions = array<i32: 1>} : vector<8x8xi32>
    %291 = arith.subi %289, %290 : vector<8x8xi32>
    %cst_131 = arith.constant 0.000000e+00 : f32
    %292 = vector.broadcast %cst_131 : f32 to vector<8x8xf32>
    %c-5_i32_132 = arith.constant -5 : i32
    %293 = vector.broadcast %c-5_i32_132 : i32 to vector<8x8xi32>
    %294 = arith.cmpi eq, %291, %293 : vector<8x8xi32>
    %cst_133 = arith.constant 0.00102838012 : f32
    %295 = vector.broadcast %cst_133 : f32 to vector<8x8xf32>
    %296 = arith.select %294, %295, %292 : vector<8x8xi1>, vector<8x8xf32>
    %c-4_i32_134 = arith.constant -4 : i32
    %297 = vector.broadcast %c-4_i32_134 : i32 to vector<8x8xi32>
    %298 = arith.cmpi eq, %291, %297 : vector<8x8xi32>
    %cst_135 = arith.constant 0.00759875821 : f32
    %299 = vector.broadcast %cst_135 : f32 to vector<8x8xf32>
    %300 = arith.select %298, %299, %296 : vector<8x8xi1>, vector<8x8xf32>
    %c-3_i32_136 = arith.constant -3 : i32
    %301 = vector.broadcast %c-3_i32_136 : i32 to vector<8x8xi32>
    %302 = arith.cmpi eq, %291, %301 : vector<8x8xi32>
    %cst_137 = arith.constant 0.0360007733 : f32
    %303 = vector.broadcast %cst_137 : f32 to vector<8x8xf32>
    %304 = arith.select %302, %303, %300 : vector<8x8xi1>, vector<8x8xf32>
    %c-2_i32_138 = arith.constant -2 : i32
    %305 = vector.broadcast %c-2_i32_138 : i32 to vector<8x8xi32>
    %306 = arith.cmpi eq, %291, %305 : vector<8x8xi32>
    %cst_139 = arith.constant 0.109360687 : f32
    %307 = vector.broadcast %cst_139 : f32 to vector<8x8xf32>
    %308 = arith.select %306, %307, %304 : vector<8x8xi1>, vector<8x8xf32>
    %c-1_i32_140 = arith.constant -1 : i32
    %309 = vector.broadcast %c-1_i32_140 : i32 to vector<8x8xi32>
    %310 = arith.cmpi eq, %291, %309 : vector<8x8xi32>
    %cst_141 = arith.constant 0.213005543 : f32
    %311 = vector.broadcast %cst_141 : f32 to vector<8x8xf32>
    %312 = arith.select %310, %311, %308 : vector<8x8xi1>, vector<8x8xf32>
    %c0_i32_142 = arith.constant 0 : i32
    %313 = vector.broadcast %c0_i32_142 : i32 to vector<8x8xi32>
    %314 = arith.cmpi eq, %291, %313 : vector<8x8xi32>
    %cst_143 = arith.constant 0.266011715 : f32
    %315 = vector.broadcast %cst_143 : f32 to vector<8x8xf32>
    %316 = arith.select %314, %315, %312 : vector<8x8xi1>, vector<8x8xf32>
    %c1_i32_144 = arith.constant 1 : i32
    %317 = vector.broadcast %c1_i32_144 : i32 to vector<8x8xi32>
    %318 = arith.cmpi eq, %291, %317 : vector<8x8xi32>
    %cst_145 = arith.constant 0.213005543 : f32
    %319 = vector.broadcast %cst_145 : f32 to vector<8x8xf32>
    %320 = arith.select %318, %319, %316 : vector<8x8xi1>, vector<8x8xf32>
    %c2_i32_146 = arith.constant 2 : i32
    %321 = vector.broadcast %c2_i32_146 : i32 to vector<8x8xi32>
    %322 = arith.cmpi eq, %291, %321 : vector<8x8xi32>
    %cst_147 = arith.constant 0.109360687 : f32
    %323 = vector.broadcast %cst_147 : f32 to vector<8x8xf32>
    %324 = arith.select %322, %323, %320 : vector<8x8xi1>, vector<8x8xf32>
    %c3_i32_148 = arith.constant 3 : i32
    %325 = vector.broadcast %c3_i32_148 : i32 to vector<8x8xi32>
    %326 = arith.cmpi eq, %291, %325 : vector<8x8xi32>
    %cst_149 = arith.constant 0.0360007733 : f32
    %327 = vector.broadcast %cst_149 : f32 to vector<8x8xf32>
    %328 = arith.select %326, %327, %324 : vector<8x8xi1>, vector<8x8xf32>
    %c4_i32_150 = arith.constant 4 : i32
    %329 = vector.broadcast %c4_i32_150 : i32 to vector<8x8xi32>
    %330 = arith.cmpi eq, %291, %329 : vector<8x8xi32>
    %cst_151 = arith.constant 0.00759875821 : f32
    %331 = vector.broadcast %cst_151 : f32 to vector<8x8xf32>
    %332 = arith.select %330, %331, %328 : vector<8x8xi1>, vector<8x8xf32>
    %c5_i32_152 = arith.constant 5 : i32
    %333 = vector.broadcast %c5_i32_152 : i32 to vector<8x8xi32>
    %334 = arith.cmpi eq, %291, %333 : vector<8x8xi32>
    %cst_153 = arith.constant 0.00102838012 : f32
    %335 = vector.broadcast %cst_153 : f32 to vector<8x8xf32>
    %336 = arith.select %334, %335, %332 : vector<8x8xi1>, vector<8x8xf32>
    %cst_154 = arith.constant dense<0.000000e+00> : vector<8x8xf32>
    %337 = tpu.matmul %336, %288, %cst_154 {dimension_numbers = #tpu.dot_dimension_numbers<[1], [0], [0], [1], [0, 0, 1, 1], [], []>} : vector<8x8xf32>, vector<8x8xf32>, vector<8x8xf32> -> vector<8x8xf32>
    %338 = arith.mulf %239, %239 : vector<8x8xf32>
    %339 = tpu.iota {dimensions = array<i32: 0>} : vector<8x8xi32>
    %340 = tpu.iota {dimensions = array<i32: 1>} : vector<8x8xi32>
    %341 = arith.subi %339, %340 : vector<8x8xi32>
    %cst_155 = arith.constant 0.000000e+00 : f32
    %342 = vector.broadcast %cst_155 : f32 to vector<8x8xf32>
    %c-5_i32_156 = arith.constant -5 : i32
    %343 = vector.broadcast %c-5_i32_156 : i32 to vector<8x8xi32>
    %344 = arith.cmpi eq, %341, %343 : vector<8x8xi32>
    %cst_157 = arith.constant 0.00102838012 : f32
    %345 = vector.broadcast %cst_157 : f32 to vector<8x8xf32>
    %346 = arith.select %344, %345, %342 : vector<8x8xi1>, vector<8x8xf32>
    %c-4_i32_158 = arith.constant -4 : i32
    %347 = vector.broadcast %c-4_i32_158 : i32 to vector<8x8xi32>
    %348 = arith.cmpi eq, %341, %347 : vector<8x8xi32>
    %cst_159 = arith.constant 0.00759875821 : f32
    %349 = vector.broadcast %cst_159 : f32 to vector<8x8xf32>
    %350 = arith.select %348, %349, %346 : vector<8x8xi1>, vector<8x8xf32>
    %c-3_i32_160 = arith.constant -3 : i32
    %351 = vector.broadcast %c-3_i32_160 : i32 to vector<8x8xi32>
    %352 = arith.cmpi eq, %341, %351 : vector<8x8xi32>
    %cst_161 = arith.constant 0.0360007733 : f32
    %353 = vector.broadcast %cst_161 : f32 to vector<8x8xf32>
    %354 = arith.select %352, %353, %350 : vector<8x8xi1>, vector<8x8xf32>
    %c-2_i32_162 = arith.constant -2 : i32
    %355 = vector.broadcast %c-2_i32_162 : i32 to vector<8x8xi32>
    %356 = arith.cmpi eq, %341, %355 : vector<8x8xi32>
    %cst_163 = arith.constant 0.109360687 : f32
    %357 = vector.broadcast %cst_163 : f32 to vector<8x8xf32>
    %358 = arith.select %356, %357, %354 : vector<8x8xi1>, vector<8x8xf32>
    %c-1_i32_164 = arith.constant -1 : i32
    %359 = vector.broadcast %c-1_i32_164 : i32 to vector<8x8xi32>
    %360 = arith.cmpi eq, %341, %359 : vector<8x8xi32>
    %cst_165 = arith.constant 0.213005543 : f32
    %361 = vector.broadcast %cst_165 : f32 to vector<8x8xf32>
    %362 = arith.select %360, %361, %358 : vector<8x8xi1>, vector<8x8xf32>
    %c0_i32_166 = arith.constant 0 : i32
    %363 = vector.broadcast %c0_i32_166 : i32 to vector<8x8xi32>
    %364 = arith.cmpi eq, %341, %363 : vector<8x8xi32>
    %cst_167 = arith.constant 0.266011715 : f32
    %365 = vector.broadcast %cst_167 : f32 to vector<8x8xf32>
    %366 = arith.select %364, %365, %362 : vector<8x8xi1>, vector<8x8xf32>
    %c1_i32_168 = arith.constant 1 : i32
    %367 = vector.broadcast %c1_i32_168 : i32 to vector<8x8xi32>
    %368 = arith.cmpi eq, %341, %367 : vector<8x8xi32>
    %cst_169 = arith.constant 0.213005543 : f32
    %369 = vector.broadcast %cst_169 : f32 to vector<8x8xf32>
    %370 = arith.select %368, %369, %366 : vector<8x8xi1>, vector<8x8xf32>
    %c2_i32_170 = arith.constant 2 : i32
    %371 = vector.broadcast %c2_i32_170 : i32 to vector<8x8xi32>
    %372 = arith.cmpi eq, %341, %371 : vector<8x8xi32>
    %cst_171 = arith.constant 0.109360687 : f32
    %373 = vector.broadcast %cst_171 : f32 to vector<8x8xf32>
    %374 = arith.select %372, %373, %370 : vector<8x8xi1>, vector<8x8xf32>
    %c3_i32_172 = arith.constant 3 : i32
    %375 = vector.broadcast %c3_i32_172 : i32 to vector<8x8xi32>
    %376 = arith.cmpi eq, %341, %375 : vector<8x8xi32>
    %cst_173 = arith.constant 0.0360007733 : f32
    %377 = vector.broadcast %cst_173 : f32 to vector<8x8xf32>
    %378 = arith.select %376, %377, %374 : vector<8x8xi1>, vector<8x8xf32>
    %c4_i32_174 = arith.constant 4 : i32
    %379 = vector.broadcast %c4_i32_174 : i32 to vector<8x8xi32>
    %380 = arith.cmpi eq, %341, %379 : vector<8x8xi32>
    %cst_175 = arith.constant 0.00759875821 : f32
    %381 = vector.broadcast %cst_175 : f32 to vector<8x8xf32>
    %382 = arith.select %380, %381, %378 : vector<8x8xi1>, vector<8x8xf32>
    %c5_i32_176 = arith.constant 5 : i32
    %383 = vector.broadcast %c5_i32_176 : i32 to vector<8x8xi32>
    %384 = arith.cmpi eq, %341, %383 : vector<8x8xi32>
    %cst_177 = arith.constant 0.00102838012 : f32
    %385 = vector.broadcast %cst_177 : f32 to vector<8x8xf32>
    %386 = arith.select %384, %385, %382 : vector<8x8xi1>, vector<8x8xf32>
    %cst_178 = arith.constant dense<0.000000e+00> : vector<8x8xf32>
    %387 = tpu.matmul %338, %386, %cst_178 {dimension_numbers = #tpu.dot_dimension_numbers<[1], [0], [0], [1], [0, 0, 1, 1], [], []>} : vector<8x8xf32>, vector<8x8xf32>, vector<8x8xf32> -> vector<8x8xf32>
    %388 = tpu.iota {dimensions = array<i32: 0>} : vector<8x8xi32>
    %389 = tpu.iota {dimensions = array<i32: 1>} : vector<8x8xi32>
    %390 = arith.subi %388, %389 : vector<8x8xi32>
    %cst_179 = arith.constant 0.000000e+00 : f32
    %391 = vector.broadcast %cst_179 : f32 to vector<8x8xf32>
    %c-5_i32_180 = arith.constant -5 : i32
    %392 = vector.broadcast %c-5_i32_180 : i32 to vector<8x8xi32>
    %393 = arith.cmpi eq, %390, %392 : vector<8x8xi32>
    %cst_181 = arith.constant 0.00102838012 : f32
    %394 = vector.broadcast %cst_181 : f32 to vector<8x8xf32>
    %395 = arith.select %393, %394, %391 : vector<8x8xi1>, vector<8x8xf32>
    %c-4_i32_182 = arith.constant -4 : i32
    %396 = vector.broadcast %c-4_i32_182 : i32 to vector<8x8xi32>
    %397 = arith.cmpi eq, %390, %396 : vector<8x8xi32>
    %cst_183 = arith.constant 0.00759875821 : f32
    %398 = vector.broadcast %cst_183 : f32 to vector<8x8xf32>
    %399 = arith.select %397, %398, %395 : vector<8x8xi1>, vector<8x8xf32>
    %c-3_i32_184 = arith.constant -3 : i32
    %400 = vector.broadcast %c-3_i32_184 : i32 to vector<8x8xi32>
    %401 = arith.cmpi eq, %390, %400 : vector<8x8xi32>
    %cst_185 = arith.constant 0.0360007733 : f32
    %402 = vector.broadcast %cst_185 : f32 to vector<8x8xf32>
    %403 = arith.select %401, %402, %399 : vector<8x8xi1>, vector<8x8xf32>
    %c-2_i32_186 = arith.constant -2 : i32
    %404 = vector.broadcast %c-2_i32_186 : i32 to vector<8x8xi32>
    %405 = arith.cmpi eq, %390, %404 : vector<8x8xi32>
    %cst_187 = arith.constant 0.109360687 : f32
    %406 = vector.broadcast %cst_187 : f32 to vector<8x8xf32>
    %407 = arith.select %405, %406, %403 : vector<8x8xi1>, vector<8x8xf32>
    %c-1_i32_188 = arith.constant -1 : i32
    %408 = vector.broadcast %c-1_i32_188 : i32 to vector<8x8xi32>
    %409 = arith.cmpi eq, %390, %408 : vector<8x8xi32>
    %cst_189 = arith.constant 0.213005543 : f32
    %410 = vector.broadcast %cst_189 : f32 to vector<8x8xf32>
    %411 = arith.select %409, %410, %407 : vector<8x8xi1>, vector<8x8xf32>
    %c0_i32_190 = arith.constant 0 : i32
    %412 = vector.broadcast %c0_i32_190 : i32 to vector<8x8xi32>
    %413 = arith.cmpi eq, %390, %412 : vector<8x8xi32>
    %cst_191 = arith.constant 0.266011715 : f32
    %414 = vector.broadcast %cst_191 : f32 to vector<8x8xf32>
    %415 = arith.select %413, %414, %411 : vector<8x8xi1>, vector<8x8xf32>
    %c1_i32_192 = arith.constant 1 : i32
    %416 = vector.broadcast %c1_i32_192 : i32 to vector<8x8xi32>
    %417 = arith.cmpi eq, %390, %416 : vector<8x8xi32>
    %cst_193 = arith.constant 0.213005543 : f32
    %418 = vector.broadcast %cst_193 : f32 to vector<8x8xf32>
    %419 = arith.select %417, %418, %415 : vector<8x8xi1>, vector<8x8xf32>
    %c2_i32_194 = arith.constant 2 : i32
    %420 = vector.broadcast %c2_i32_194 : i32 to vector<8x8xi32>
    %421 = arith.cmpi eq, %390, %420 : vector<8x8xi32>
    %cst_195 = arith.constant 0.109360687 : f32
    %422 = vector.broadcast %cst_195 : f32 to vector<8x8xf32>
    %423 = arith.select %421, %422, %419 : vector<8x8xi1>, vector<8x8xf32>
    %c3_i32_196 = arith.constant 3 : i32
    %424 = vector.broadcast %c3_i32_196 : i32 to vector<8x8xi32>
    %425 = arith.cmpi eq, %390, %424 : vector<8x8xi32>
    %cst_197 = arith.constant 0.0360007733 : f32
    %426 = vector.broadcast %cst_197 : f32 to vector<8x8xf32>
    %427 = arith.select %425, %426, %423 : vector<8x8xi1>, vector<8x8xf32>
    %c4_i32_198 = arith.constant 4 : i32
    %428 = vector.broadcast %c4_i32_198 : i32 to vector<8x8xi32>
    %429 = arith.cmpi eq, %390, %428 : vector<8x8xi32>
    %cst_199 = arith.constant 0.00759875821 : f32
    %430 = vector.broadcast %cst_199 : f32 to vector<8x8xf32>
    %431 = arith.select %429, %430, %427 : vector<8x8xi1>, vector<8x8xf32>
    %c5_i32_200 = arith.constant 5 : i32
    %432 = vector.broadcast %c5_i32_200 : i32 to vector<8x8xi32>
    %433 = arith.cmpi eq, %390, %432 : vector<8x8xi32>
    %cst_201 = arith.constant 0.00102838012 : f32
    %434 = vector.broadcast %cst_201 : f32 to vector<8x8xf32>
    %435 = arith.select %433, %434, %431 : vector<8x8xi1>, vector<8x8xf32>
    %cst_202 = arith.constant dense<0.000000e+00> : vector<8x8xf32>
    %436 = tpu.matmul %435, %387, %cst_202 {dimension_numbers = #tpu.dot_dimension_numbers<[1], [0], [0], [1], [0, 0, 1, 1], [], []>} : vector<8x8xf32>, vector<8x8xf32>, vector<8x8xf32> -> vector<8x8xf32>
    %437 = arith.mulf %337, %337 : vector<8x8xf32>
    %438 = arith.subf %436, %437 : vector<8x8xf32>
    %c0_203 = arith.constant 0 : index
    %c0_204 = arith.constant 0 : index
    %c0_205 = arith.constant 0 : index
    %439 = vector.load %arg3[%c0_203, %c0_204, %c0_205] : memref<1x8x8xf32, #tpu.memory_space<vmem>>, vector<1x8x8xf32>
    %440 = vector.shape_cast %439 : vector<1x8x8xf32> to vector<8x8xf32>
    %441 = vector.shape_cast %239 : vector<8x8xf32> to vector<1x8x8xf32>
    tpu.vector_store %arg3[%c0_203, %c0_204, %c0_205], %441 {strides = array<i32>} : memref<1x8x8xf32, #tpu.memory_space<vmem>>, vector<1x8x8xf32>,
    %c0_206 = arith.constant 0 : index
    %c0_207 = arith.constant 0 : index
    %c0_208 = arith.constant 0 : index
    %442 = vector.load %arg8[%c0_206, %c0_207, %c0_208] : memref<1x8x8xf32, #tpu.memory_space<vmem>>, vector<1x8x8xf32>
    %443 = vector.shape_cast %442 : vector<1x8x8xf32> to vector<8x8xf32>
    %444 = vector.shape_cast %337 : vector<8x8xf32> to vector<1x8x8xf32>
    tpu.vector_store %arg8[%c0_206, %c0_207, %c0_208], %444 {strides = array<i32>} : memref<1x8x8xf32, #tpu.memory_space<vmem>>, vector<1x8x8xf32>,
    %c0_209 = arith.constant 0 : index
    %c0_210 = arith.constant 0 : index
    %c0_211 = arith.constant 0 : index
    %445 = vector.load %arg13[%c0_209, %c0_210, %c0_211] : memref<1x8x8xf32, #tpu.memory_space<vmem>>, vector<1x8x8xf32>
    %446 = vector.shape_cast %445 : vector<1x8x8xf32> to vector<8x8xf32>
    %447 = vector.shape_cast %438 : vector<8x8xf32> to vector<1x8x8xf32>
    tpu.vector_store %arg13[%c0_209, %c0_210, %c0_211], %447 {strides = array<i32>} : memref<1x8x8xf32, #tpu.memory_space<vmem>>, vector<1x8x8xf32>,
    %448 = tpu.iota {dimensions = array<i32: 0>} : vector<4x8xi32>
    %449 = tpu.iota {dimensions = array<i32: 1>} : vector<4x8xi32>
    %c2_i32_212 = arith.constant 2 : i32
    %450 = vector.broadcast %c2_i32_212 : i32 to vector<4x8xi32>
    %451 = arith.muli %450, %448 : vector<4x8xi32>
    %452 = arith.cmpi eq, %449, %451 : vector<4x8xi32>
    %c2_i32_213 = arith.constant 2 : i32
    %453 = vector.broadcast %c2_i32_213 : i32 to vector<4x8xi32>
    %454 = arith.muli %453, %448 : vector<4x8xi32>
    %c1_i32_214 = arith.constant 1 : i32
    %455 = vector.broadcast %c1_i32_214 : i32 to vector<4x8xi32>
    %456 = arith.addi %454, %455 : vector<4x8xi32>
    %457 = arith.cmpi eq, %449, %456 : vector<4x8xi32>
    %458 = arith.ori %452, %457 : vector<4x8xi1>
    %cst_215 = arith.constant 5.000000e-01 : f32
    %cst_216 = arith.constant 0.000000e+00 : f32
    %459 = vector.broadcast %cst_215 : f32 to vector<4x8xf32>
    %460 = vector.broadcast %cst_216 : f32 to vector<4x8xf32>
    %461 = arith.select %458, %459, %460 : vector<4x8xi1>, vector<4x8xf32>
    %cst_217 = arith.constant dense<0.000000e+00> : vector<4x8xf32>
    %462 = tpu.matmul %461, %239, %cst_217 {dimension_numbers = #tpu.dot_dimension_numbers<[1], [0], [0], [1], [0, 0, 1, 1], [], []>} : vector<4x8xf32>, vector<8x8xf32>, vector<4x8xf32> -> vector<4x8xf32>
    %463 = tpu.iota {dimensions = array<i32: 0>} : vector<8x4xi32>
    %464 = tpu.iota {dimensions = array<i32: 1>} : vector<8x4xi32>
    %c2_i32_218 = arith.constant 2 : i32
    %465 = vector.broadcast %c2_i32_218 : i32 to vector<8x4xi32>
    %466 = arith.muli %465, %464 : vector<8x4xi32>
    %467 = arith.cmpi eq, %463, %466 : vector<8x4xi32>
    %c2_i32_219 = arith.constant 2 : i32
    %468 = vector.broadcast %c2_i32_219 : i32 to vector<8x4xi32>
    %469 = arith.muli %468, %464 : vector<8x4xi32>
    %c1_i32_220 = arith.constant 1 : i32
    %470 = vector.broadcast %c1_i32_220 : i32 to vector<8x4xi32>
    %471 = arith.addi %469, %470 : vector<8x4xi32>
    %472 = arith.cmpi eq, %463, %471 : vector<8x4xi32>
    %473 = arith.ori %467, %472 : vector<8x4xi1>
    %cst_221 = arith.constant 5.000000e-01 : f32
    %cst_222 = arith.constant 0.000000e+00 : f32
    %474 = vector.broadcast %cst_221 : f32 to vector<8x4xf32>
    %475 = vector.broadcast %cst_222 : f32 to vector<8x4xf32>
    %476 = arith.select %473, %474, %475 : vector<8x4xi1>, vector<8x4xf32>
    %cst_223 = arith.constant dense<0.000000e+00> : vector<4x4xf32>
    %477 = tpu.matmul %462, %476, %cst_223 {dimension_numbers = #tpu.dot_dimension_numbers<[1], [0], [0], [1], [0, 0, 1, 1], [], []>} : vector<4x8xf32>, vector<8x4xf32>, vector<4x4xf32> -> vector<4x4xf32>
    %478 = tpu.iota {dimensions = array<i32: 0>} : vector<4x4xi32>
    %479 = tpu.iota {dimensions = array<i32: 1>} : vector<4x4xi32>
    %480 = arith.subi %478, %479 : vector<4x4xi32>
    %cst_224 = arith.constant 0.000000e+00 : f32
    %481 = vector.broadcast %cst_224 : f32 to vector<4x4xf32>
    %c-5_i32_225 = arith.constant -5 : i32
    %482 = vector.broadcast %c-5_i32_225 : i32 to vector<4x4xi32>
    %483 = arith.cmpi eq, %480, %482 : vector<4x4xi32>
    %cst_226 = arith.constant 0.00102838012 : f32
    %484 = vector.broadcast %cst_226 : f32 to vector<4x4xf32>
    %485 = arith.select %483, %484, %481 : vector<4x4xi1>, vector<4x4xf32>
    %c-4_i32_227 = arith.constant -4 : i32
    %486 = vector.broadcast %c-4_i32_227 : i32 to vector<4x4xi32>
    %487 = arith.cmpi eq, %480, %486 : vector<4x4xi32>
    %cst_228 = arith.constant 0.00759875821 : f32
    %488 = vector.broadcast %cst_228 : f32 to vector<4x4xf32>
    %489 = arith.select %487, %488, %485 : vector<4x4xi1>, vector<4x4xf32>
    %c-3_i32_229 = arith.constant -3 : i32
    %490 = vector.broadcast %c-3_i32_229 : i32 to vector<4x4xi32>
    %491 = arith.cmpi eq, %480, %490 : vector<4x4xi32>
    %cst_230 = arith.constant 0.0360007733 : f32
    %492 = vector.broadcast %cst_230 : f32 to vector<4x4xf32>
    %493 = arith.select %491, %492, %489 : vector<4x4xi1>, vector<4x4xf32>
    %c-2_i32_231 = arith.constant -2 : i32
    %494 = vector.broadcast %c-2_i32_231 : i32 to vector<4x4xi32>
    %495 = arith.cmpi eq, %480, %494 : vector<4x4xi32>
    %cst_232 = arith.constant 0.109360687 : f32
    %496 = vector.broadcast %cst_232 : f32 to vector<4x4xf32>
    %497 = arith.select %495, %496, %493 : vector<4x4xi1>, vector<4x4xf32>
    %c-1_i32_233 = arith.constant -1 : i32
    %498 = vector.broadcast %c-1_i32_233 : i32 to vector<4x4xi32>
    %499 = arith.cmpi eq, %480, %498 : vector<4x4xi32>
    %cst_234 = arith.constant 0.213005543 : f32
    %500 = vector.broadcast %cst_234 : f32 to vector<4x4xf32>
    %501 = arith.select %499, %500, %497 : vector<4x4xi1>, vector<4x4xf32>
    %c0_i32_235 = arith.constant 0 : i32
    %502 = vector.broadcast %c0_i32_235 : i32 to vector<4x4xi32>
    %503 = arith.cmpi eq, %480, %502 : vector<4x4xi32>
    %cst_236 = arith.constant 0.266011715 : f32
    %504 = vector.broadcast %cst_236 : f32 to vector<4x4xf32>
    %505 = arith.select %503, %504, %501 : vector<4x4xi1>, vector<4x4xf32>
    %c1_i32_237 = arith.constant 1 : i32
    %506 = vector.broadcast %c1_i32_237 : i32 to vector<4x4xi32>
    %507 = arith.cmpi eq, %480, %506 : vector<4x4xi32>
    %cst_238 = arith.constant 0.213005543 : f32
    %508 = vector.broadcast %cst_238 : f32 to vector<4x4xf32>
    %509 = arith.select %507, %508, %505 : vector<4x4xi1>, vector<4x4xf32>
    %c2_i32_239 = arith.constant 2 : i32
    %510 = vector.broadcast %c2_i32_239 : i32 to vector<4x4xi32>
    %511 = arith.cmpi eq, %480, %510 : vector<4x4xi32>
    %cst_240 = arith.constant 0.109360687 : f32
    %512 = vector.broadcast %cst_240 : f32 to vector<4x4xf32>
    %513 = arith.select %511, %512, %509 : vector<4x4xi1>, vector<4x4xf32>
    %c3_i32_241 = arith.constant 3 : i32
    %514 = vector.broadcast %c3_i32_241 : i32 to vector<4x4xi32>
    %515 = arith.cmpi eq, %480, %514 : vector<4x4xi32>
    %cst_242 = arith.constant 0.0360007733 : f32
    %516 = vector.broadcast %cst_242 : f32 to vector<4x4xf32>
    %517 = arith.select %515, %516, %513 : vector<4x4xi1>, vector<4x4xf32>
    %c4_i32_243 = arith.constant 4 : i32
    %518 = vector.broadcast %c4_i32_243 : i32 to vector<4x4xi32>
    %519 = arith.cmpi eq, %480, %518 : vector<4x4xi32>
    %cst_244 = arith.constant 0.00759875821 : f32
    %520 = vector.broadcast %cst_244 : f32 to vector<4x4xf32>
    %521 = arith.select %519, %520, %517 : vector<4x4xi1>, vector<4x4xf32>
    %c5_i32_245 = arith.constant 5 : i32
    %522 = vector.broadcast %c5_i32_245 : i32 to vector<4x4xi32>
    %523 = arith.cmpi eq, %480, %522 : vector<4x4xi32>
    %cst_246 = arith.constant 0.00102838012 : f32
    %524 = vector.broadcast %cst_246 : f32 to vector<4x4xf32>
    %525 = arith.select %523, %524, %521 : vector<4x4xi1>, vector<4x4xf32>
    %cst_247 = arith.constant dense<0.000000e+00> : vector<4x4xf32>
    %526 = tpu.matmul %477, %525, %cst_247 {dimension_numbers = #tpu.dot_dimension_numbers<[1], [0], [0], [1], [0, 0, 1, 1], [], []>} : vector<4x4xf32>, vector<4x4xf32>, vector<4x4xf32> -> vector<4x4xf32>
    %527 = tpu.iota {dimensions = array<i32: 0>} : vector<4x4xi32>
    %528 = tpu.iota {dimensions = array<i32: 1>} : vector<4x4xi32>
    %529 = arith.subi %527, %528 : vector<4x4xi32>
    %cst_248 = arith.constant 0.000000e+00 : f32
    %530 = vector.broadcast %cst_248 : f32 to vector<4x4xf32>
    %c-5_i32_249 = arith.constant -5 : i32
    %531 = vector.broadcast %c-5_i32_249 : i32 to vector<4x4xi32>
    %532 = arith.cmpi eq, %529, %531 : vector<4x4xi32>
    %cst_250 = arith.constant 0.00102838012 : f32
    %533 = vector.broadcast %cst_250 : f32 to vector<4x4xf32>
    %534 = arith.select %532, %533, %530 : vector<4x4xi1>, vector<4x4xf32>
    %c-4_i32_251 = arith.constant -4 : i32
    %535 = vector.broadcast %c-4_i32_251 : i32 to vector<4x4xi32>
    %536 = arith.cmpi eq, %529, %535 : vector<4x4xi32>
    %cst_252 = arith.constant 0.00759875821 : f32
    %537 = vector.broadcast %cst_252 : f32 to vector<4x4xf32>
    %538 = arith.select %536, %537, %534 : vector<4x4xi1>, vector<4x4xf32>
    %c-3_i32_253 = arith.constant -3 : i32
    %539 = vector.broadcast %c-3_i32_253 : i32 to vector<4x4xi32>
    %540 = arith.cmpi eq, %529, %539 : vector<4x4xi32>
    %cst_254 = arith.constant 0.0360007733 : f32
    %541 = vector.broadcast %cst_254 : f32 to vector<4x4xf32>
    %542 = arith.select %540, %541, %538 : vector<4x4xi1>, vector<4x4xf32>
    %c-2_i32_255 = arith.constant -2 : i32
    %543 = vector.broadcast %c-2_i32_255 : i32 to vector<4x4xi32>
    %544 = arith.cmpi eq, %529, %543 : vector<4x4xi32>
    %cst_256 = arith.constant 0.109360687 : f32
    %545 = vector.broadcast %cst_256 : f32 to vector<4x4xf32>
    %546 = arith.select %544, %545, %542 : vector<4x4xi1>, vector<4x4xf32>
    %c-1_i32_257 = arith.constant -1 : i32
    %547 = vector.broadcast %c-1_i32_257 : i32 to vector<4x4xi32>
    %548 = arith.cmpi eq, %529, %547 : vector<4x4xi32>
    %cst_258 = arith.constant 0.213005543 : f32
    %549 = vector.broadcast %cst_258 : f32 to vector<4x4xf32>
    %550 = arith.select %548, %549, %546 : vector<4x4xi1>, vector<4x4xf32>
    %c0_i32_259 = arith.constant 0 : i32
    %551 = vector.broadcast %c0_i32_259 : i32 to vector<4x4xi32>
    %552 = arith.cmpi eq, %529, %551 : vector<4x4xi32>
    %cst_260 = arith.constant 0.266011715 : f32
    %553 = vector.broadcast %cst_260 : f32 to vector<4x4xf32>
    %554 = arith.select %552, %553, %550 : vector<4x4xi1>, vector<4x4xf32>
    %c1_i32_261 = arith.constant 1 : i32
    %555 = vector.broadcast %c1_i32_261 : i32 to vector<4x4xi32>
    %556 = arith.cmpi eq, %529, %555 : vector<4x4xi32>
    %cst_262 = arith.constant 0.213005543 : f32
    %557 = vector.broadcast %cst_262 : f32 to vector<4x4xf32>
    %558 = arith.select %556, %557, %554 : vector<4x4xi1>, vector<4x4xf32>
    %c2_i32_263 = arith.constant 2 : i32
    %559 = vector.broadcast %c2_i32_263 : i32 to vector<4x4xi32>
    %560 = arith.cmpi eq, %529, %559 : vector<4x4xi32>
    %cst_264 = arith.constant 0.109360687 : f32
    %561 = vector.broadcast %cst_264 : f32 to vector<4x4xf32>
    %562 = arith.select %560, %561, %558 : vector<4x4xi1>, vector<4x4xf32>
    %c3_i32_265 = arith.constant 3 : i32
    %563 = vector.broadcast %c3_i32_265 : i32 to vector<4x4xi32>
    %564 = arith.cmpi eq, %529, %563 : vector<4x4xi32>
    %cst_266 = arith.constant 0.0360007733 : f32
    %565 = vector.broadcast %cst_266 : f32 to vector<4x4xf32>
    %566 = arith.select %564, %565, %562 : vector<4x4xi1>, vector<4x4xf32>
    %c4_i32_267 = arith.constant 4 : i32
    %567 = vector.broadcast %c4_i32_267 : i32 to vector<4x4xi32>
    %568 = arith.cmpi eq, %529, %567 : vector<4x4xi32>
    %cst_268 = arith.constant 0.00759875821 : f32
    %569 = vector.broadcast %cst_268 : f32 to vector<4x4xf32>
    %570 = arith.select %568, %569, %566 : vector<4x4xi1>, vector<4x4xf32>
    %c5_i32_269 = arith.constant 5 : i32
    %571 = vector.broadcast %c5_i32_269 : i32 to vector<4x4xi32>
    %572 = arith.cmpi eq, %529, %571 : vector<4x4xi32>
    %cst_270 = arith.constant 0.00102838012 : f32
    %573 = vector.broadcast %cst_270 : f32 to vector<4x4xf32>
    %574 = arith.select %572, %573, %570 : vector<4x4xi1>, vector<4x4xf32>
    %cst_271 = arith.constant dense<0.000000e+00> : vector<4x4xf32>
    %575 = tpu.matmul %574, %526, %cst_271 {dimension_numbers = #tpu.dot_dimension_numbers<[1], [0], [0], [1], [0, 0, 1, 1], [], []>} : vector<4x4xf32>, vector<4x4xf32>, vector<4x4xf32> -> vector<4x4xf32>
    %576 = arith.mulf %477, %477 : vector<4x4xf32>
    %577 = tpu.iota {dimensions = array<i32: 0>} : vector<4x4xi32>
    %578 = tpu.iota {dimensions = array<i32: 1>} : vector<4x4xi32>
    %579 = arith.subi %577, %578 : vector<4x4xi32>
    %cst_272 = arith.constant 0.000000e+00 : f32
    %580 = vector.broadcast %cst_272 : f32 to vector<4x4xf32>
    %c-5_i32_273 = arith.constant -5 : i32
    %581 = vector.broadcast %c-5_i32_273 : i32 to vector<4x4xi32>
    %582 = arith.cmpi eq, %579, %581 : vector<4x4xi32>
    %cst_274 = arith.constant 0.00102838012 : f32
    %583 = vector.broadcast %cst_274 : f32 to vector<4x4xf32>
    %584 = arith.select %582, %583, %580 : vector<4x4xi1>, vector<4x4xf32>
    %c-4_i32_275 = arith.constant -4 : i32
    %585 = vector.broadcast %c-4_i32_275 : i32 to vector<4x4xi32>
    %586 = arith.cmpi eq, %579, %585 : vector<4x4xi32>
    %cst_276 = arith.constant 0.00759875821 : f32
    %587 = vector.broadcast %cst_276 : f32 to vector<4x4xf32>
    %588 = arith.select %586, %587, %584 : vector<4x4xi1>, vector<4x4xf32>
    %c-3_i32_277 = arith.constant -3 : i32
    %589 = vector.broadcast %c-3_i32_277 : i32 to vector<4x4xi32>
    %590 = arith.cmpi eq, %579, %589 : vector<4x4xi32>
    %cst_278 = arith.constant 0.0360007733 : f32
    %591 = vector.broadcast %cst_278 : f32 to vector<4x4xf32>
    %592 = arith.select %590, %591, %588 : vector<4x4xi1>, vector<4x4xf32>
    %c-2_i32_279 = arith.constant -2 : i32
    %593 = vector.broadcast %c-2_i32_279 : i32 to vector<4x4xi32>
    %594 = arith.cmpi eq, %579, %593 : vector<4x4xi32>
    %cst_280 = arith.constant 0.109360687 : f32
    %595 = vector.broadcast %cst_280 : f32 to vector<4x4xf32>
    %596 = arith.select %594, %595, %592 : vector<4x4xi1>, vector<4x4xf32>
    %c-1_i32_281 = arith.constant -1 : i32
    %597 = vector.broadcast %c-1_i32_281 : i32 to vector<4x4xi32>
    %598 = arith.cmpi eq, %579, %597 : vector<4x4xi32>
    %cst_282 = arith.constant 0.213005543 : f32
    %599 = vector.broadcast %cst_282 : f32 to vector<4x4xf32>
    %600 = arith.select %598, %599, %596 : vector<4x4xi1>, vector<4x4xf32>
    %c0_i32_283 = arith.constant 0 : i32
    %601 = vector.broadcast %c0_i32_283 : i32 to vector<4x4xi32>
    %602 = arith.cmpi eq, %579, %601 : vector<4x4xi32>
    %cst_284 = arith.constant 0.266011715 : f32
    %603 = vector.broadcast %cst_284 : f32 to vector<4x4xf32>
    %604 = arith.select %602, %603, %600 : vector<4x4xi1>, vector<4x4xf32>
    %c1_i32_285 = arith.constant 1 : i32
    %605 = vector.broadcast %c1_i32_285 : i32 to vector<4x4xi32>
    %606 = arith.cmpi eq, %579, %605 : vector<4x4xi32>
    %cst_286 = arith.constant 0.213005543 : f32
    %607 = vector.broadcast %cst_286 : f32 to vector<4x4xf32>
    %608 = arith.select %606, %607, %604 : vector<4x4xi1>, vector<4x4xf32>
    %c2_i32_287 = arith.constant 2 : i32
    %609 = vector.broadcast %c2_i32_287 : i32 to vector<4x4xi32>
    %610 = arith.cmpi eq, %579, %609 : vector<4x4xi32>
    %cst_288 = arith.constant 0.109360687 : f32
    %611 = vector.broadcast %cst_288 : f32 to vector<4x4xf32>
    %612 = arith.select %610, %611, %608 : vector<4x4xi1>, vector<4x4xf32>
    %c3_i32_289 = arith.constant 3 : i32
    %613 = vector.broadcast %c3_i32_289 : i32 to vector<4x4xi32>
    %614 = arith.cmpi eq, %579, %613 : vector<4x4xi32>
    %cst_290 = arith.constant 0.0360007733 : f32
    %615 = vector.broadcast %cst_290 : f32 to vector<4x4xf32>
    %616 = arith.select %614, %615, %612 : vector<4x4xi1>, vector<4x4xf32>
    %c4_i32_291 = arith.constant 4 : i32
    %617 = vector.broadcast %c4_i32_291 : i32 to vector<4x4xi32>
    %618 = arith.cmpi eq, %579, %617 : vector<4x4xi32>
    %cst_292 = arith.constant 0.00759875821 : f32
    %619 = vector.broadcast %cst_292 : f32 to vector<4x4xf32>
    %620 = arith.select %618, %619, %616 : vector<4x4xi1>, vector<4x4xf32>
    %c5_i32_293 = arith.constant 5 : i32
    %621 = vector.broadcast %c5_i32_293 : i32 to vector<4x4xi32>
    %622 = arith.cmpi eq, %579, %621 : vector<4x4xi32>
    %cst_294 = arith.constant 0.00102838012 : f32
    %623 = vector.broadcast %cst_294 : f32 to vector<4x4xf32>
    %624 = arith.select %622, %623, %620 : vector<4x4xi1>, vector<4x4xf32>
    %cst_295 = arith.constant dense<0.000000e+00> : vector<4x4xf32>
    %625 = tpu.matmul %576, %624, %cst_295 {dimension_numbers = #tpu.dot_dimension_numbers<[1], [0], [0], [1], [0, 0, 1, 1], [], []>} : vector<4x4xf32>, vector<4x4xf32>, vector<4x4xf32> -> vector<4x4xf32>
    %626 = tpu.iota {dimensions = array<i32: 0>} : vector<4x4xi32>
    %627 = tpu.iota {dimensions = array<i32: 1>} : vector<4x4xi32>
    %628 = arith.subi %626, %627 : vector<4x4xi32>
    %cst_296 = arith.constant 0.000000e+00 : f32
    %629 = vector.broadcast %cst_296 : f32 to vector<4x4xf32>
    %c-5_i32_297 = arith.constant -5 : i32
    %630 = vector.broadcast %c-5_i32_297 : i32 to vector<4x4xi32>
    %631 = arith.cmpi eq, %628, %630 : vector<4x4xi32>
    %cst_298 = arith.constant 0.00102838012 : f32
    %632 = vector.broadcast %cst_298 : f32 to vector<4x4xf32>
    %633 = arith.select %631, %632, %629 : vector<4x4xi1>, vector<4x4xf32>
    %c-4_i32_299 = arith.constant -4 : i32
    %634 = vector.broadcast %c-4_i32_299 : i32 to vector<4x4xi32>
    %635 = arith.cmpi eq, %628, %634 : vector<4x4xi32>
    %cst_300 = arith.constant 0.00759875821 : f32
    %636 = vector.broadcast %cst_300 : f32 to vector<4x4xf32>
    %637 = arith.select %635, %636, %633 : vector<4x4xi1>, vector<4x4xf32>
    %c-3_i32_301 = arith.constant -3 : i32
    %638 = vector.broadcast %c-3_i32_301 : i32 to vector<4x4xi32>
    %639 = arith.cmpi eq, %628, %638 : vector<4x4xi32>
    %cst_302 = arith.constant 0.0360007733 : f32
    %640 = vector.broadcast %cst_302 : f32 to vector<4x4xf32>
    %641 = arith.select %639, %640, %637 : vector<4x4xi1>, vector<4x4xf32>
    %c-2_i32_303 = arith.constant -2 : i32
    %642 = vector.broadcast %c-2_i32_303 : i32 to vector<4x4xi32>
    %643 = arith.cmpi eq, %628, %642 : vector<4x4xi32>
    %cst_304 = arith.constant 0.109360687 : f32
    %644 = vector.broadcast %cst_304 : f32 to vector<4x4xf32>
    %645 = arith.select %643, %644, %641 : vector<4x4xi1>, vector<4x4xf32>
    %c-1_i32_305 = arith.constant -1 : i32
    %646 = vector.broadcast %c-1_i32_305 : i32 to vector<4x4xi32>
    %647 = arith.cmpi eq, %628, %646 : vector<4x4xi32>
    %cst_306 = arith.constant 0.213005543 : f32
    %648 = vector.broadcast %cst_306 : f32 to vector<4x4xf32>
    %649 = arith.select %647, %648, %645 : vector<4x4xi1>, vector<4x4xf32>
    %c0_i32_307 = arith.constant 0 : i32
    %650 = vector.broadcast %c0_i32_307 : i32 to vector<4x4xi32>
    %651 = arith.cmpi eq, %628, %650 : vector<4x4xi32>
    %cst_308 = arith.constant 0.266011715 : f32
    %652 = vector.broadcast %cst_308 : f32 to vector<4x4xf32>
    %653 = arith.select %651, %652, %649 : vector<4x4xi1>, vector<4x4xf32>
    %c1_i32_309 = arith.constant 1 : i32
    %654 = vector.broadcast %c1_i32_309 : i32 to vector<4x4xi32>
    %655 = arith.cmpi eq, %628, %654 : vector<4x4xi32>
    %cst_310 = arith.constant 0.213005543 : f32
    %656 = vector.broadcast %cst_310 : f32 to vector<4x4xf32>
    %657 = arith.select %655, %656, %653 : vector<4x4xi1>, vector<4x4xf32>
    %c2_i32_311 = arith.constant 2 : i32
    %658 = vector.broadcast %c2_i32_311 : i32 to vector<4x4xi32>
    %659 = arith.cmpi eq, %628, %658 : vector<4x4xi32>
    %cst_312 = arith.constant 0.109360687 : f32
    %660 = vector.broadcast %cst_312 : f32 to vector<4x4xf32>
    %661 = arith.select %659, %660, %657 : vector<4x4xi1>, vector<4x4xf32>
    %c3_i32_313 = arith.constant 3 : i32
    %662 = vector.broadcast %c3_i32_313 : i32 to vector<4x4xi32>
    %663 = arith.cmpi eq, %628, %662 : vector<4x4xi32>
    %cst_314 = arith.constant 0.0360007733 : f32
    %664 = vector.broadcast %cst_314 : f32 to vector<4x4xf32>
    %665 = arith.select %663, %664, %661 : vector<4x4xi1>, vector<4x4xf32>
    %c4_i32_315 = arith.constant 4 : i32
    %666 = vector.broadcast %c4_i32_315 : i32 to vector<4x4xi32>
    %667 = arith.cmpi eq, %628, %666 : vector<4x4xi32>
    %cst_316 = arith.constant 0.00759875821 : f32
    %668 = vector.broadcast %cst_316 : f32 to vector<4x4xf32>
    %669 = arith.select %667, %668, %665 : vector<4x4xi1>, vector<4x4xf32>
    %c5_i32_317 = arith.constant 5 : i32
    %670 = vector.broadcast %c5_i32_317 : i32 to vector<4x4xi32>
    %671 = arith.cmpi eq, %628, %670 : vector<4x4xi32>
    %cst_318 = arith.constant 0.00102838012 : f32
    %672 = vector.broadcast %cst_318 : f32 to vector<4x4xf32>
    %673 = arith.select %671, %672, %669 : vector<4x4xi1>, vector<4x4xf32>
    %cst_319 = arith.constant dense<0.000000e+00> : vector<4x4xf32>
    %674 = tpu.matmul %673, %625, %cst_319 {dimension_numbers = #tpu.dot_dimension_numbers<[1], [0], [0], [1], [0, 0, 1, 1], [], []>} : vector<4x4xf32>, vector<4x4xf32>, vector<4x4xf32> -> vector<4x4xf32>
    %675 = arith.mulf %575, %575 : vector<4x4xf32>
    %676 = arith.subf %674, %675 : vector<4x4xf32>
    %c0_320 = arith.constant 0 : index
    %c0_321 = arith.constant 0 : index
    %c0_322 = arith.constant 0 : index
    %677 = vector.load %arg4[%c0_320, %c0_321, %c0_322] : memref<1x4x4xf32, #tpu.memory_space<vmem>>, vector<1x4x4xf32>
    %678 = vector.shape_cast %677 : vector<1x4x4xf32> to vector<4x4xf32>
    %679 = vector.shape_cast %477 : vector<4x4xf32> to vector<1x4x4xf32>
    tpu.vector_store %arg4[%c0_320, %c0_321, %c0_322], %679 {strides = array<i32>} : memref<1x4x4xf32, #tpu.memory_space<vmem>>, vector<1x4x4xf32>,
    %c0_323 = arith.constant 0 : index
    %c0_324 = arith.constant 0 : index
    %c0_325 = arith.constant 0 : index
    %680 = vector.load %arg9[%c0_323, %c0_324, %c0_325] : memref<1x4x4xf32, #tpu.memory_space<vmem>>, vector<1x4x4xf32>
    %681 = vector.shape_cast %680 : vector<1x4x4xf32> to vector<4x4xf32>
    %682 = vector.shape_cast %575 : vector<4x4xf32> to vector<1x4x4xf32>
    tpu.vector_store %arg9[%c0_323, %c0_324, %c0_325], %682 {strides = array<i32>} : memref<1x4x4xf32, #tpu.memory_space<vmem>>, vector<1x4x4xf32>,
    %c0_326 = arith.constant 0 : index
    %c0_327 = arith.constant 0 : index
    %c0_328 = arith.constant 0 : index
    %683 = vector.load %arg14[%c0_326, %c0_327, %c0_328] : memref<1x4x4xf32, #tpu.memory_space<vmem>>, vector<1x4x4xf32>
    %684 = vector.shape_cast %683 : vector<1x4x4xf32> to vector<4x4xf32>
    %685 = vector.shape_cast %676 : vector<4x4xf32> to vector<1x4x4xf32>
    tpu.vector_store %arg14[%c0_326, %c0_327, %c0_328], %685 {strides = array<i32>} : memref<1x4x4xf32, #tpu.memory_space<vmem>>, vector<1x4x4xf32>,
    %686 = tpu.iota {dimensions = array<i32: 0>} : vector<2x4xi32>
    %687 = tpu.iota {dimensions = array<i32: 1>} : vector<2x4xi32>
    %c2_i32_329 = arith.constant 2 : i32
    %688 = vector.broadcast %c2_i32_329 : i32 to vector<2x4xi32>
    %689 = arith.muli %688, %686 : vector<2x4xi32>
    %690 = arith.cmpi eq, %687, %689 : vector<2x4xi32>
    %c2_i32_330 = arith.constant 2 : i32
    %691 = vector.broadcast %c2_i32_330 : i32 to vector<2x4xi32>
    %692 = arith.muli %691, %686 : vector<2x4xi32>
    %c1_i32_331 = arith.constant 1 : i32
    %693 = vector.broadcast %c1_i32_331 : i32 to vector<2x4xi32>
    %694 = arith.addi %692, %693 : vector<2x4xi32>
    %695 = arith.cmpi eq, %687, %694 : vector<2x4xi32>
    %696 = arith.ori %690, %695 : vector<2x4xi1>
    %cst_332 = arith.constant 5.000000e-01 : f32
    %cst_333 = arith.constant 0.000000e+00 : f32
    %697 = vector.broadcast %cst_332 : f32 to vector<2x4xf32>
    %698 = vector.broadcast %cst_333 : f32 to vector<2x4xf32>
    %699 = arith.select %696, %697, %698 : vector<2x4xi1>, vector<2x4xf32>
    %cst_334 = arith.constant dense<0.000000e+00> : vector<2x4xf32>
    %700 = tpu.matmul %699, %477, %cst_334 {dimension_numbers = #tpu.dot_dimension_numbers<[1], [0], [0], [1], [0, 0, 1, 1], [], []>} : vector<2x4xf32>, vector<4x4xf32>, vector<2x4xf32> -> vector<2x4xf32>
    %701 = tpu.iota {dimensions = array<i32: 0>} : vector<4x2xi32>
    %702 = tpu.iota {dimensions = array<i32: 1>} : vector<4x2xi32>
    %c2_i32_335 = arith.constant 2 : i32
    %703 = vector.broadcast %c2_i32_335 : i32 to vector<4x2xi32>
    %704 = arith.muli %703, %702 : vector<4x2xi32>
    %705 = arith.cmpi eq, %701, %704 : vector<4x2xi32>
    %c2_i32_336 = arith.constant 2 : i32
    %706 = vector.broadcast %c2_i32_336 : i32 to vector<4x2xi32>
    %707 = arith.muli %706, %702 : vector<4x2xi32>
    %c1_i32_337 = arith.constant 1 : i32
    %708 = vector.broadcast %c1_i32_337 : i32 to vector<4x2xi32>
    %709 = arith.addi %707, %708 : vector<4x2xi32>
    %710 = arith.cmpi eq, %701, %709 : vector<4x2xi32>
    %711 = arith.ori %705, %710 : vector<4x2xi1>
    %cst_338 = arith.constant 5.000000e-01 : f32
    %cst_339 = arith.constant 0.000000e+00 : f32
    %712 = vector.broadcast %cst_338 : f32 to vector<4x2xf32>
    %713 = vector.broadcast %cst_339 : f32 to vector<4x2xf32>
    %714 = arith.select %711, %712, %713 : vector<4x2xi1>, vector<4x2xf32>
    %cst_340 = arith.constant dense<0.000000e+00> : vector<2x2xf32>
    %715 = tpu.matmul %700, %714, %cst_340 {dimension_numbers = #tpu.dot_dimension_numbers<[1], [0], [0], [1], [0, 0, 1, 1], [], []>} : vector<2x4xf32>, vector<4x2xf32>, vector<2x2xf32> -> vector<2x2xf32>
    %716 = tpu.iota {dimensions = array<i32: 0>} : vector<2x2xi32>
    %717 = tpu.iota {dimensions = array<i32: 1>} : vector<2x2xi32>
    %718 = arith.subi %716, %717 : vector<2x2xi32>
    %cst_341 = arith.constant 0.000000e+00 : f32
    %719 = vector.broadcast %cst_341 : f32 to vector<2x2xf32>
    %c-5_i32_342 = arith.constant -5 : i32
    %720 = vector.broadcast %c-5_i32_342 : i32 to vector<2x2xi32>
    %721 = arith.cmpi eq, %718, %720 : vector<2x2xi32>
    %cst_343 = arith.constant 0.00102838012 : f32
    %722 = vector.broadcast %cst_343 : f32 to vector<2x2xf32>
    %723 = arith.select %721, %722, %719 : vector<2x2xi1>, vector<2x2xf32>
    %c-4_i32_344 = arith.constant -4 : i32
    %724 = vector.broadcast %c-4_i32_344 : i32 to vector<2x2xi32>
    %725 = arith.cmpi eq, %718, %724 : vector<2x2xi32>
    %cst_345 = arith.constant 0.00759875821 : f32
    %726 = vector.broadcast %cst_345 : f32 to vector<2x2xf32>
    %727 = arith.select %725, %726, %723 : vector<2x2xi1>, vector<2x2xf32>
    %c-3_i32_346 = arith.constant -3 : i32
    %728 = vector.broadcast %c-3_i32_346 : i32 to vector<2x2xi32>
    %729 = arith.cmpi eq, %718, %728 : vector<2x2xi32>
    %cst_347 = arith.constant 0.0360007733 : f32
    %730 = vector.broadcast %cst_347 : f32 to vector<2x2xf32>
    %731 = arith.select %729, %730, %727 : vector<2x2xi1>, vector<2x2xf32>
    %c-2_i32_348 = arith.constant -2 : i32
    %732 = vector.broadcast %c-2_i32_348 : i32 to vector<2x2xi32>
    %733 = arith.cmpi eq, %718, %732 : vector<2x2xi32>
    %cst_349 = arith.constant 0.109360687 : f32
    %734 = vector.broadcast %cst_349 : f32 to vector<2x2xf32>
    %735 = arith.select %733, %734, %731 : vector<2x2xi1>, vector<2x2xf32>
    %c-1_i32_350 = arith.constant -1 : i32
    %736 = vector.broadcast %c-1_i32_350 : i32 to vector<2x2xi32>
    %737 = arith.cmpi eq, %718, %736 : vector<2x2xi32>
    %cst_351 = arith.constant 0.213005543 : f32
    %738 = vector.broadcast %cst_351 : f32 to vector<2x2xf32>
    %739 = arith.select %737, %738, %735 : vector<2x2xi1>, vector<2x2xf32>
    %c0_i32_352 = arith.constant 0 : i32
    %740 = vector.broadcast %c0_i32_352 : i32 to vector<2x2xi32>
    %741 = arith.cmpi eq, %718, %740 : vector<2x2xi32>
    %cst_353 = arith.constant 0.266011715 : f32
    %742 = vector.broadcast %cst_353 : f32 to vector<2x2xf32>
    %743 = arith.select %741, %742, %739 : vector<2x2xi1>, vector<2x2xf32>
    %c1_i32_354 = arith.constant 1 : i32
    %744 = vector.broadcast %c1_i32_354 : i32 to vector<2x2xi32>
    %745 = arith.cmpi eq, %718, %744 : vector<2x2xi32>
    %cst_355 = arith.constant 0.213005543 : f32
    %746 = vector.broadcast %cst_355 : f32 to vector<2x2xf32>
    %747 = arith.select %745, %746, %743 : vector<2x2xi1>, vector<2x2xf32>
    %c2_i32_356 = arith.constant 2 : i32
    %748 = vector.broadcast %c2_i32_356 : i32 to vector<2x2xi32>
    %749 = arith.cmpi eq, %718, %748 : vector<2x2xi32>
    %cst_357 = arith.constant 0.109360687 : f32
    %750 = vector.broadcast %cst_357 : f32 to vector<2x2xf32>
    %751 = arith.select %749, %750, %747 : vector<2x2xi1>, vector<2x2xf32>
    %c3_i32_358 = arith.constant 3 : i32
    %752 = vector.broadcast %c3_i32_358 : i32 to vector<2x2xi32>
    %753 = arith.cmpi eq, %718, %752 : vector<2x2xi32>
    %cst_359 = arith.constant 0.0360007733 : f32
    %754 = vector.broadcast %cst_359 : f32 to vector<2x2xf32>
    %755 = arith.select %753, %754, %751 : vector<2x2xi1>, vector<2x2xf32>
    %c4_i32_360 = arith.constant 4 : i32
    %756 = vector.broadcast %c4_i32_360 : i32 to vector<2x2xi32>
    %757 = arith.cmpi eq, %718, %756 : vector<2x2xi32>
    %cst_361 = arith.constant 0.00759875821 : f32
    %758 = vector.broadcast %cst_361 : f32 to vector<2x2xf32>
    %759 = arith.select %757, %758, %755 : vector<2x2xi1>, vector<2x2xf32>
    %c5_i32_362 = arith.constant 5 : i32
    %760 = vector.broadcast %c5_i32_362 : i32 to vector<2x2xi32>
    %761 = arith.cmpi eq, %718, %760 : vector<2x2xi32>
    %cst_363 = arith.constant 0.00102838012 : f32
    %762 = vector.broadcast %cst_363 : f32 to vector<2x2xf32>
    %763 = arith.select %761, %762, %759 : vector<2x2xi1>, vector<2x2xf32>
    %cst_364 = arith.constant dense<0.000000e+00> : vector<2x2xf32>
    %764 = tpu.matmul %715, %763, %cst_364 {dimension_numbers = #tpu.dot_dimension_numbers<[1], [0], [0], [1], [0, 0, 1, 1], [], []>} : vector<2x2xf32>, vector<2x2xf32>, vector<2x2xf32> -> vector<2x2xf32>
    %765 = tpu.iota {dimensions = array<i32: 0>} : vector<2x2xi32>
    %766 = tpu.iota {dimensions = array<i32: 1>} : vector<2x2xi32>
    %767 = arith.subi %765, %766 : vector<2x2xi32>
    %cst_365 = arith.constant 0.000000e+00 : f32
    %768 = vector.broadcast %cst_365 : f32 to vector<2x2xf32>
    %c-5_i32_366 = arith.constant -5 : i32
    %769 = vector.broadcast %c-5_i32_366 : i32 to vector<2x2xi32>
    %770 = arith.cmpi eq, %767, %769 : vector<2x2xi32>
    %cst_367 = arith.constant 0.00102838012 : f32
    %771 = vector.broadcast %cst_367 : f32 to vector<2x2xf32>
    %772 = arith.select %770, %771, %768 : vector<2x2xi1>, vector<2x2xf32>
    %c-4_i32_368 = arith.constant -4 : i32
    %773 = vector.broadcast %c-4_i32_368 : i32 to vector<2x2xi32>
    %774 = arith.cmpi eq, %767, %773 : vector<2x2xi32>
    %cst_369 = arith.constant 0.00759875821 : f32
    %775 = vector.broadcast %cst_369 : f32 to vector<2x2xf32>
    %776 = arith.select %774, %775, %772 : vector<2x2xi1>, vector<2x2xf32>
    %c-3_i32_370 = arith.constant -3 : i32
    %777 = vector.broadcast %c-3_i32_370 : i32 to vector<2x2xi32>
    %778 = arith.cmpi eq, %767, %777 : vector<2x2xi32>
    %cst_371 = arith.constant 0.0360007733 : f32
    %779 = vector.broadcast %cst_371 : f32 to vector<2x2xf32>
    %780 = arith.select %778, %779, %776 : vector<2x2xi1>, vector<2x2xf32>
    %c-2_i32_372 = arith.constant -2 : i32
    %781 = vector.broadcast %c-2_i32_372 : i32 to vector<2x2xi32>
    %782 = arith.cmpi eq, %767, %781 : vector<2x2xi32>
    %cst_373 = arith.constant 0.109360687 : f32
    %783 = vector.broadcast %cst_373 : f32 to vector<2x2xf32>
    %784 = arith.select %782, %783, %780 : vector<2x2xi1>, vector<2x2xf32>
    %c-1_i32_374 = arith.constant -1 : i32
    %785 = vector.broadcast %c-1_i32_374 : i32 to vector<2x2xi32>
    %786 = arith.cmpi eq, %767, %785 : vector<2x2xi32>
    %cst_375 = arith.constant 0.213005543 : f32
    %787 = vector.broadcast %cst_375 : f32 to vector<2x2xf32>
    %788 = arith.select %786, %787, %784 : vector<2x2xi1>, vector<2x2xf32>
    %c0_i32_376 = arith.constant 0 : i32
    %789 = vector.broadcast %c0_i32_376 : i32 to vector<2x2xi32>
    %790 = arith.cmpi eq, %767, %789 : vector<2x2xi32>
    %cst_377 = arith.constant 0.266011715 : f32
    %791 = vector.broadcast %cst_377 : f32 to vector<2x2xf32>
    %792 = arith.select %790, %791, %788 : vector<2x2xi1>, vector<2x2xf32>
    %c1_i32_378 = arith.constant 1 : i32
    %793 = vector.broadcast %c1_i32_378 : i32 to vector<2x2xi32>
    %794 = arith.cmpi eq, %767, %793 : vector<2x2xi32>
    %cst_379 = arith.constant 0.213005543 : f32
    %795 = vector.broadcast %cst_379 : f32 to vector<2x2xf32>
    %796 = arith.select %794, %795, %792 : vector<2x2xi1>, vector<2x2xf32>
    %c2_i32_380 = arith.constant 2 : i32
    %797 = vector.broadcast %c2_i32_380 : i32 to vector<2x2xi32>
    %798 = arith.cmpi eq, %767, %797 : vector<2x2xi32>
    %cst_381 = arith.constant 0.109360687 : f32
    %799 = vector.broadcast %cst_381 : f32 to vector<2x2xf32>
    %800 = arith.select %798, %799, %796 : vector<2x2xi1>, vector<2x2xf32>
    %c3_i32_382 = arith.constant 3 : i32
    %801 = vector.broadcast %c3_i32_382 : i32 to vector<2x2xi32>
    %802 = arith.cmpi eq, %767, %801 : vector<2x2xi32>
    %cst_383 = arith.constant 0.0360007733 : f32
    %803 = vector.broadcast %cst_383 : f32 to vector<2x2xf32>
    %804 = arith.select %802, %803, %800 : vector<2x2xi1>, vector<2x2xf32>
    %c4_i32_384 = arith.constant 4 : i32
    %805 = vector.broadcast %c4_i32_384 : i32 to vector<2x2xi32>
    %806 = arith.cmpi eq, %767, %805 : vector<2x2xi32>
    %cst_385 = arith.constant 0.00759875821 : f32
    %807 = vector.broadcast %cst_385 : f32 to vector<2x2xf32>
    %808 = arith.select %806, %807, %804 : vector<2x2xi1>, vector<2x2xf32>
    %c5_i32_386 = arith.constant 5 : i32
    %809 = vector.broadcast %c5_i32_386 : i32 to vector<2x2xi32>
    %810 = arith.cmpi eq, %767, %809 : vector<2x2xi32>
    %cst_387 = arith.constant 0.00102838012 : f32
    %811 = vector.broadcast %cst_387 : f32 to vector<2x2xf32>
    %812 = arith.select %810, %811, %808 : vector<2x2xi1>, vector<2x2xf32>
    %cst_388 = arith.constant dense<0.000000e+00> : vector<2x2xf32>
    %813 = tpu.matmul %812, %764, %cst_388 {dimension_numbers = #tpu.dot_dimension_numbers<[1], [0], [0], [1], [0, 0, 1, 1], [], []>} : vector<2x2xf32>, vector<2x2xf32>, vector<2x2xf32> -> vector<2x2xf32>
    %814 = arith.mulf %715, %715 : vector<2x2xf32>
    %815 = tpu.iota {dimensions = array<i32: 0>} : vector<2x2xi32>
    %816 = tpu.iota {dimensions = array<i32: 1>} : vector<2x2xi32>
    %817 = arith.subi %815, %816 : vector<2x2xi32>
    %cst_389 = arith.constant 0.000000e+00 : f32
    %818 = vector.broadcast %cst_389 : f32 to vector<2x2xf32>
    %c-5_i32_390 = arith.constant -5 : i32
    %819 = vector.broadcast %c-5_i32_390 : i32 to vector<2x2xi32>
    %820 = arith.cmpi eq, %817, %819 : vector<2x2xi32>
    %cst_391 = arith.constant 0.00102838012 : f32
    %821 = vector.broadcast %cst_391 : f32 to vector<2x2xf32>
    %822 = arith.select %820, %821, %818 : vector<2x2xi1>, vector<2x2xf32>
    %c-4_i32_392 = arith.constant -4 : i32
    %823 = vector.broadcast %c-4_i32_392 : i32 to vector<2x2xi32>
    %824 = arith.cmpi eq, %817, %823 : vector<2x2xi32>
    %cst_393 = arith.constant 0.00759875821 : f32
    %825 = vector.broadcast %cst_393 : f32 to vector<2x2xf32>
    %826 = arith.select %824, %825, %822 : vector<2x2xi1>, vector<2x2xf32>
    %c-3_i32_394 = arith.constant -3 : i32
    %827 = vector.broadcast %c-3_i32_394 : i32 to vector<2x2xi32>
    %828 = arith.cmpi eq, %817, %827 : vector<2x2xi32>
    %cst_395 = arith.constant 0.0360007733 : f32
    %829 = vector.broadcast %cst_395 : f32 to vector<2x2xf32>
    %830 = arith.select %828, %829, %826 : vector<2x2xi1>, vector<2x2xf32>
    %c-2_i32_396 = arith.constant -2 : i32
    %831 = vector.broadcast %c-2_i32_396 : i32 to vector<2x2xi32>
    %832 = arith.cmpi eq, %817, %831 : vector<2x2xi32>
    %cst_397 = arith.constant 0.109360687 : f32
    %833 = vector.broadcast %cst_397 : f32 to vector<2x2xf32>
    %834 = arith.select %832, %833, %830 : vector<2x2xi1>, vector<2x2xf32>
    %c-1_i32_398 = arith.constant -1 : i32
    %835 = vector.broadcast %c-1_i32_398 : i32 to vector<2x2xi32>
    %836 = arith.cmpi eq, %817, %835 : vector<2x2xi32>
    %cst_399 = arith.constant 0.213005543 : f32
    %837 = vector.broadcast %cst_399 : f32 to vector<2x2xf32>
    %838 = arith.select %836, %837, %834 : vector<2x2xi1>, vector<2x2xf32>
    %c0_i32_400 = arith.constant 0 : i32
    %839 = vector.broadcast %c0_i32_400 : i32 to vector<2x2xi32>
    %840 = arith.cmpi eq, %817, %839 : vector<2x2xi32>
    %cst_401 = arith.constant 0.266011715 : f32
    %841 = vector.broadcast %cst_401 : f32 to vector<2x2xf32>
    %842 = arith.select %840, %841, %838 : vector<2x2xi1>, vector<2x2xf32>
    %c1_i32_402 = arith.constant 1 : i32
    %843 = vector.broadcast %c1_i32_402 : i32 to vector<2x2xi32>
    %844 = arith.cmpi eq, %817, %843 : vector<2x2xi32>
    %cst_403 = arith.constant 0.213005543 : f32
    %845 = vector.broadcast %cst_403 : f32 to vector<2x2xf32>
    %846 = arith.select %844, %845, %842 : vector<2x2xi1>, vector<2x2xf32>
    %c2_i32_404 = arith.constant 2 : i32
    %847 = vector.broadcast %c2_i32_404 : i32 to vector<2x2xi32>
    %848 = arith.cmpi eq, %817, %847 : vector<2x2xi32>
    %cst_405 = arith.constant 0.109360687 : f32
    %849 = vector.broadcast %cst_405 : f32 to vector<2x2xf32>
    %850 = arith.select %848, %849, %846 : vector<2x2xi1>, vector<2x2xf32>
    %c3_i32_406 = arith.constant 3 : i32
    %851 = vector.broadcast %c3_i32_406 : i32 to vector<2x2xi32>
    %852 = arith.cmpi eq, %817, %851 : vector<2x2xi32>
    %cst_407 = arith.constant 0.0360007733 : f32
    %853 = vector.broadcast %cst_407 : f32 to vector<2x2xf32>
    %854 = arith.select %852, %853, %850 : vector<2x2xi1>, vector<2x2xf32>
    %c4_i32_408 = arith.constant 4 : i32
    %855 = vector.broadcast %c4_i32_408 : i32 to vector<2x2xi32>
    %856 = arith.cmpi eq, %817, %855 : vector<2x2xi32>
    %cst_409 = arith.constant 0.00759875821 : f32
    %857 = vector.broadcast %cst_409 : f32 to vector<2x2xf32>
    %858 = arith.select %856, %857, %854 : vector<2x2xi1>, vector<2x2xf32>
    %c5_i32_410 = arith.constant 5 : i32
    %859 = vector.broadcast %c5_i32_410 : i32 to vector<2x2xi32>
    %860 = arith.cmpi eq, %817, %859 : vector<2x2xi32>
    %cst_411 = arith.constant 0.00102838012 : f32
    %861 = vector.broadcast %cst_411 : f32 to vector<2x2xf32>
    %862 = arith.select %860, %861, %858 : vector<2x2xi1>, vector<2x2xf32>
    %cst_412 = arith.constant dense<0.000000e+00> : vector<2x2xf32>
    %863 = tpu.matmul %814, %862, %cst_412 {dimension_numbers = #tpu.dot_dimension_numbers<[1], [0], [0], [1], [0, 0, 1, 1], [], []>} : vector<2x2xf32>, vector<2x2xf32>, vector<2x2xf32> -> vector<2x2xf32>
    %864 = tpu.iota {dimensions = array<i32: 0>} : vector<2x2xi32>
    %865 = tpu.iota {dimensions = array<i32: 1>} : vector<2x2xi32>
    %866 = arith.subi %864, %865 : vector<2x2xi32>
    %cst_413 = arith.constant 0.000000e+00 : f32
    %867 = vector.broadcast %cst_413 : f32 to vector<2x2xf32>
    %c-5_i32_414 = arith.constant -5 : i32
    %868 = vector.broadcast %c-5_i32_414 : i32 to vector<2x2xi32>
    %869 = arith.cmpi eq, %866, %868 : vector<2x2xi32>
    %cst_415 = arith.constant 0.00102838012 : f32
    %870 = vector.broadcast %cst_415 : f32 to vector<2x2xf32>
    %871 = arith.select %869, %870, %867 : vector<2x2xi1>, vector<2x2xf32>
    %c-4_i32_416 = arith.constant -4 : i32
    %872 = vector.broadcast %c-4_i32_416 : i32 to vector<2x2xi32>
    %873 = arith.cmpi eq, %866, %872 : vector<2x2xi32>
    %cst_417 = arith.constant 0.00759875821 : f32
    %874 = vector.broadcast %cst_417 : f32 to vector<2x2xf32>
    %875 = arith.select %873, %874, %871 : vector<2x2xi1>, vector<2x2xf32>
    %c-3_i32_418 = arith.constant -3 : i32
    %876 = vector.broadcast %c-3_i32_418 : i32 to vector<2x2xi32>
    %877 = arith.cmpi eq, %866, %876 : vector<2x2xi32>
    %cst_419 = arith.constant 0.0360007733 : f32
    %878 = vector.broadcast %cst_419 : f32 to vector<2x2xf32>
    %879 = arith.select %877, %878, %875 : vector<2x2xi1>, vector<2x2xf32>
    %c-2_i32_420 = arith.constant -2 : i32
    %880 = vector.broadcast %c-2_i32_420 : i32 to vector<2x2xi32>
    %881 = arith.cmpi eq, %866, %880 : vector<2x2xi32>
    %cst_421 = arith.constant 0.109360687 : f32
    %882 = vector.broadcast %cst_421 : f32 to vector<2x2xf32>
    %883 = arith.select %881, %882, %879 : vector<2x2xi1>, vector<2x2xf32>
    %c-1_i32_422 = arith.constant -1 : i32
    %884 = vector.broadcast %c-1_i32_422 : i32 to vector<2x2xi32>
    %885 = arith.cmpi eq, %866, %884 : vector<2x2xi32>
    %cst_423 = arith.constant 0.213005543 : f32
    %886 = vector.broadcast %cst_423 : f32 to vector<2x2xf32>
    %887 = arith.select %885, %886, %883 : vector<2x2xi1>, vector<2x2xf32>
    %c0_i32_424 = arith.constant 0 : i32
    %888 = vector.broadcast %c0_i32_424 : i32 to vector<2x2xi32>
    %889 = arith.cmpi eq, %866, %888 : vector<2x2xi32>
    %cst_425 = arith.constant 0.266011715 : f32
    %890 = vector.broadcast %cst_425 : f32 to vector<2x2xf32>
    %891 = arith.select %889, %890, %887 : vector<2x2xi1>, vector<2x2xf32>
    %c1_i32_426 = arith.constant 1 : i32
    %892 = vector.broadcast %c1_i32_426 : i32 to vector<2x2xi32>
    %893 = arith.cmpi eq, %866, %892 : vector<2x2xi32>
    %cst_427 = arith.constant 0.213005543 : f32
    %894 = vector.broadcast %cst_427 : f32 to vector<2x2xf32>
    %895 = arith.select %893, %894, %891 : vector<2x2xi1>, vector<2x2xf32>
    %c2_i32_428 = arith.constant 2 : i32
    %896 = vector.broadcast %c2_i32_428 : i32 to vector<2x2xi32>
    %897 = arith.cmpi eq, %866, %896 : vector<2x2xi32>
    %cst_429 = arith.constant 0.109360687 : f32
    %898 = vector.broadcast %cst_429 : f32 to vector<2x2xf32>
    %899 = arith.select %897, %898, %895 : vector<2x2xi1>, vector<2x2xf32>
    %c3_i32_430 = arith.constant 3 : i32
    %900 = vector.broadcast %c3_i32_430 : i32 to vector<2x2xi32>
    %901 = arith.cmpi eq, %866, %900 : vector<2x2xi32>
    %cst_431 = arith.constant 0.0360007733 : f32
    %902 = vector.broadcast %cst_431 : f32 to vector<2x2xf32>
    %903 = arith.select %901, %902, %899 : vector<2x2xi1>, vector<2x2xf32>
    %c4_i32_432 = arith.constant 4 : i32
    %904 = vector.broadcast %c4_i32_432 : i32 to vector<2x2xi32>
    %905 = arith.cmpi eq, %866, %904 : vector<2x2xi32>
    %cst_433 = arith.constant 0.00759875821 : f32
    %906 = vector.broadcast %cst_433 : f32 to vector<2x2xf32>
    %907 = arith.select %905, %906, %903 : vector<2x2xi1>, vector<2x2xf32>
    %c5_i32_434 = arith.constant 5 : i32
    %908 = vector.broadcast %c5_i32_434 : i32 to vector<2x2xi32>
    %909 = arith.cmpi eq, %866, %908 : vector<2x2xi32>
    %cst_435 = arith.constant 0.00102838012 : f32
    %910 = vector.broadcast %cst_435 : f32 to vector<2x2xf32>
    %911 = arith.select %909, %910, %907 : vector<2x2xi1>, vector<2x2xf32>
    %cst_436 = arith.constant dense<0.000000e+00> : vector<2x2xf32>
    %912 = tpu.matmul %911, %863, %cst_436 {dimension_numbers = #tpu.dot_dimension_numbers<[1], [0], [0], [1], [0, 0, 1, 1], [], []>} : vector<2x2xf32>, vector<2x2xf32>, vector<2x2xf32> -> vector<2x2xf32>
    %913 = arith.mulf %813, %813 : vector<2x2xf32>
    %914 = arith.subf %912, %913 : vector<2x2xf32>
    %c0_437 = arith.constant 0 : index
    %c0_438 = arith.constant 0 : index
    %c0_439 = arith.constant 0 : index
    %915 = vector.load %arg5[%c0_437, %c0_438, %c0_439] : memref<1x2x2xf32, #tpu.memory_space<vmem>>, vector<1x2x2xf32>
    %916 = vector.shape_cast %915 : vector<1x2x2xf32> to vector<2x2xf32>
    %917 = vector.shape_cast %715 : vector<2x2xf32> to vector<1x2x2xf32>
    tpu.vector_store %arg5[%c0_437, %c0_438, %c0_439], %917 {strides = array<i32>} : memref<1x2x2xf32, #tpu.memory_space<vmem>>, vector<1x2x2xf32>,
    %c0_440 = arith.constant 0 : index
    %c0_441 = arith.constant 0 : index
    %c0_442 = arith.constant 0 : index
    %918 = vector.load %arg10[%c0_440, %c0_441, %c0_442] : memref<1x2x2xf32, #tpu.memory_space<vmem>>, vector<1x2x2xf32>
    %919 = vector.shape_cast %918 : vector<1x2x2xf32> to vector<2x2xf32>
    %920 = vector.shape_cast %813 : vector<2x2xf32> to vector<1x2x2xf32>
    tpu.vector_store %arg10[%c0_440, %c0_441, %c0_442], %920 {strides = array<i32>} : memref<1x2x2xf32, #tpu.memory_space<vmem>>, vector<1x2x2xf32>,
    %c0_443 = arith.constant 0 : index
    %c0_444 = arith.constant 0 : index
    %c0_445 = arith.constant 0 : index
    %921 = vector.load %arg15[%c0_443, %c0_444, %c0_445] : memref<1x2x2xf32, #tpu.memory_space<vmem>>, vector<1x2x2xf32>
    %922 = vector.shape_cast %921 : vector<1x2x2xf32> to vector<2x2xf32>
    %923 = vector.shape_cast %914 : vector<2x2xf32> to vector<1x2x2xf32>
    tpu.vector_store %arg15[%c0_443, %c0_444, %c0_445], %923 {strides = array<i32>} : memref<1x2x2xf32, #tpu.memory_space<vmem>>, vector<1x2x2xf32>,
    %924 = tpu.iota {dimensions = array<i32: 0>} : vector<1x2xi32>
    %925 = tpu.iota {dimensions = array<i32: 1>} : vector<1x2xi32>
    %c2_i32_446 = arith.constant 2 : i32
    %926 = vector.broadcast %c2_i32_446 : i32 to vector<1x2xi32>
    %927 = arith.muli %926, %924 : vector<1x2xi32>
    %928 = arith.cmpi eq, %925, %927 : vector<1x2xi32>
    %c2_i32_447 = arith.constant 2 : i32
    %929 = vector.broadcast %c2_i32_447 : i32 to vector<1x2xi32>
    %930 = arith.muli %929, %924 : vector<1x2xi32>
    %c1_i32_448 = arith.constant 1 : i32
    %931 = vector.broadcast %c1_i32_448 : i32 to vector<1x2xi32>
    %932 = arith.addi %930, %931 : vector<1x2xi32>
    %933 = arith.cmpi eq, %925, %932 : vector<1x2xi32>
    %934 = arith.ori %928, %933 : vector<1x2xi1>
    %cst_449 = arith.constant 5.000000e-01 : f32
    %cst_450 = arith.constant 0.000000e+00 : f32
    %935 = vector.broadcast %cst_449 : f32 to vector<1x2xf32>
    %936 = vector.broadcast %cst_450 : f32 to vector<1x2xf32>
    %937 = arith.select %934, %935, %936 : vector<1x2xi1>, vector<1x2xf32>
    %cst_451 = arith.constant dense<0.000000e+00> : vector<1x2xf32>
    %938 = tpu.matmul %937, %715, %cst_451 {dimension_numbers = #tpu.dot_dimension_numbers<[1], [0], [0], [1], [0, 0, 1, 1], [], []>} : vector<1x2xf32>, vector<2x2xf32>, vector<1x2xf32> -> vector<1x2xf32>
    %939 = tpu.iota {dimensions = array<i32: 0>} : vector<2x1xi32>
    %940 = tpu.iota {dimensions = array<i32: 1>} : vector<2x1xi32>
    %c2_i32_452 = arith.constant 2 : i32
    %941 = vector.broadcast %c2_i32_452 : i32 to vector<2x1xi32>
    %942 = arith.muli %941, %940 : vector<2x1xi32>
    %943 = arith.cmpi eq, %939, %942 : vector<2x1xi32>
    %c2_i32_453 = arith.constant 2 : i32
    %944 = vector.broadcast %c2_i32_453 : i32 to vector<2x1xi32>
    %945 = arith.muli %944, %940 : vector<2x1xi32>
    %c1_i32_454 = arith.constant 1 : i32
    %946 = vector.broadcast %c1_i32_454 : i32 to vector<2x1xi32>
    %947 = arith.addi %945, %946 : vector<2x1xi32>
    %948 = arith.cmpi eq, %939, %947 : vector<2x1xi32>
    %949 = arith.ori %943, %948 : vector<2x1xi1>
    %cst_455 = arith.constant 5.000000e-01 : f32
    %cst_456 = arith.constant 0.000000e+00 : f32
    %950 = vector.broadcast %cst_455 : f32 to vector<2x1xf32>
    %951 = vector.broadcast %cst_456 : f32 to vector<2x1xf32>
    %952 = arith.select %949, %950, %951 : vector<2x1xi1>, vector<2x1xf32>
    %cst_457 = arith.constant dense<0.000000e+00> : vector<1x1xf32>
    %953 = tpu.matmul %938, %952, %cst_457 {dimension_numbers = #tpu.dot_dimension_numbers<[1], [0], [0], [1], [0, 0, 1, 1], [], []>} : vector<1x2xf32>, vector<2x1xf32>, vector<1x1xf32> -> vector<1x1xf32>
    %cst_458 = arith.constant 0.266011715 : f32
    %954 = vector.broadcast %cst_458 : f32 to vector<1x1xf32>
    %955 = arith.mulf %953, %954 : vector<1x1xf32>
    %cst_459 = arith.constant 0.266011715 : f32
    %956 = vector.broadcast %cst_459 : f32 to vector<1x1xf32>
    %957 = arith.mulf %955, %956 : vector<1x1xf32>
    %958 = arith.mulf %953, %953 : vector<1x1xf32>
    %cst_460 = arith.constant 0.266011715 : f32
    %959 = vector.broadcast %cst_460 : f32 to vector<1x1xf32>
    %960 = arith.mulf %958, %959 : vector<1x1xf32>
    %cst_461 = arith.constant 0.266011715 : f32
    %961 = vector.broadcast %cst_461 : f32 to vector<1x1xf32>
    %962 = arith.mulf %960, %961 : vector<1x1xf32>
    %963 = arith.mulf %957, %957 : vector<1x1xf32>
    %964 = arith.subf %962, %963 : vector<1x1xf32>
    %c0_462 = arith.constant 0 : index
    %c0_463 = arith.constant 0 : index
    %c0_464 = arith.constant 0 : index
    %965 = vector.load %arg6[%c0_462, %c0_463, %c0_464] : memref<1x1x1xf32, #tpu.memory_space<vmem>>, vector<1x1x1xf32>
    %966 = vector.shape_cast %965 : vector<1x1x1xf32> to vector<1x1xf32>
    %967 = vector.shape_cast %953 : vector<1x1xf32> to vector<1x1x1xf32>
    tpu.vector_store %arg6[%c0_462, %c0_463, %c0_464], %967 {strides = array<i32>} : memref<1x1x1xf32, #tpu.memory_space<vmem>>, vector<1x1x1xf32>,
    %c0_465 = arith.constant 0 : index
    %c0_466 = arith.constant 0 : index
    %c0_467 = arith.constant 0 : index
    %968 = vector.load %arg11[%c0_465, %c0_466, %c0_467] : memref<1x1x1xf32, #tpu.memory_space<vmem>>, vector<1x1x1xf32>
    %969 = vector.shape_cast %968 : vector<1x1x1xf32> to vector<1x1xf32>
    %970 = vector.shape_cast %957 : vector<1x1xf32> to vector<1x1x1xf32>
    tpu.vector_store %arg11[%c0_465, %c0_466, %c0_467], %970 {strides = array<i32>} : memref<1x1x1xf32, #tpu.memory_space<vmem>>, vector<1x1x1xf32>,
    %c0_468 = arith.constant 0 : index
    %c0_469 = arith.constant 0 : index
    %c0_470 = arith.constant 0 : index
    %971 = vector.load %arg16[%c0_468, %c0_469, %c0_470] : memref<1x1x1xf32, #tpu.memory_space<vmem>>, vector<1x1x1xf32>
    %972 = vector.shape_cast %971 : vector<1x1x1xf32> to vector<1x1xf32>
    %973 = vector.shape_cast %964 : vector<1x1xf32> to vector<1x1x1xf32>
    tpu.vector_store %arg16[%c0_468, %c0_469, %c0_470], %973 {strides = array<i32>} : memref<1x1x1xf32, #tpu.memory_space<vmem>>, vector<1x1x1xf32>,
    return
  }
  func.func @transform_0(%arg0: i32) -> (i32, i32, i32) {
    %c0_i32 = arith.constant 0 : i32
    %c0_i32_0 = arith.constant 0 : i32
    %c0_i32_1 = arith.constant 0 : i32
    return %arg0, %c0_i32, %c0_i32_0 : i32, i32, i32
  }
  func.func @transform_1(%arg0: i32) -> (i32, i32, i32) {
    %c0_i32 = arith.constant 0 : i32
    %c0_i32_0 = arith.constant 0 : i32
    %c0_i32_1 = arith.constant 0 : i32
    return %arg0, %c0_i32, %c0_i32_0 : i32, i32, i32
  }
  func.func @transform_2(%arg0: i32) -> (i32, i32, i32) {
    %c0_i32 = arith.constant 0 : i32
    %c0_i32_0 = arith.constant 0 : i32
    %c0_i32_1 = arith.constant 0 : i32
    return %arg0, %c0_i32, %c0_i32_0 : i32, i32, i32
  }
  func.func @transform_3(%arg0: i32) -> (i32, i32, i32) {
    %c0_i32 = arith.constant 0 : i32
    %c0_i32_0 = arith.constant 0 : i32
    %c0_i32_1 = arith.constant 0 : i32
    return %arg0, %c0_i32, %c0_i32_0 : i32, i32, i32
  }
  func.func @transform_4(%arg0: i32) -> (i32, i32, i32) {
    %c0_i32 = arith.constant 0 : i32
    %c0_i32_0 = arith.constant 0 : i32
    %c0_i32_1 = arith.constant 0 : i32
    return %arg0, %c0_i32, %c0_i32_0 : i32, i32, i32
  }
  func.func @transform_5(%arg0: i32) -> (i32, i32, i32) {
    %c0_i32 = arith.constant 0 : i32
    %c0_i32_0 = arith.constant 0 : i32
    %c0_i32_1 = arith.constant 0 : i32
    return %arg0, %c0_i32, %c0_i32_0 : i32, i32, i32
  }
  func.func @transform_6(%arg0: i32) -> (i32, i32, i32) {
    %c0_i32 = arith.constant 0 : i32
    %c0_i32_0 = arith.constant 0 : i32
    %c0_i32_1 = arith.constant 0 : i32
    return %arg0, %c0_i32, %c0_i32_0 : i32, i32, i32
  }
  func.func @transform_7(%arg0: i32) -> (i32, i32, i32) {
    %c0_i32 = arith.constant 0 : i32
    %c0_i32_0 = arith.constant 0 : i32
    %c0_i32_1 = arith.constant 0 : i32
    return %arg0, %c0_i32, %c0_i32_0 : i32, i32, i32
  }
  func.func @transform_8(%arg0: i32) -> (i32, i32, i32) {
    %c0_i32 = arith.constant 0 : i32
    %c0_i32_0 = arith.constant 0 : i32
    %c0_i32_1 = arith.constant 0 : i32
    return %arg0, %c0_i32, %c0_i32_0 : i32, i32, i32
  }
  func.func @transform_9(%arg0: i32) -> (i32, i32, i32) {
    %c0_i32 = arith.constant 0 : i32
    %c0_i32_0 = arith.constant 0 : i32
    %c0_i32_1 = arith.constant 0 : i32
    return %arg0, %c0_i32, %c0_i32_0 : i32, i32, i32
  }
  func.func @transform_10(%arg0: i32) -> (i32, i32, i32) {
    %c0_i32 = arith.constant 0 : i32
    %c0_i32_0 = arith.constant 0 : i32
    %c0_i32_1 = arith.constant 0 : i32
    return %arg0, %c0_i32, %c0_i32_0 : i32, i32, i32
  }
  func.func @transform_11(%arg0: i32) -> (i32, i32, i32) {
    %c0_i32 = arith.constant 0 : i32
    %c0_i32_0 = arith.constant 0 : i32
    %c0_i32_1 = arith.constant 0 : i32
    return %arg0, %c0_i32, %c0_i32_0 : i32, i32, i32
  }
  func.func @transform_12(%arg0: i32) -> (i32, i32, i32) {
    %c0_i32 = arith.constant 0 : i32
    %c0_i32_0 = arith.constant 0 : i32
    %c0_i32_1 = arith.constant 0 : i32
    return %arg0, %c0_i32, %c0_i32_0 : i32, i32, i32
  }
  func.func @transform_13(%arg0: i32) -> (i32, i32, i32) {
    %c0_i32 = arith.constant 0 : i32
    %c0_i32_0 = arith.constant 0 : i32
    %c0_i32_1 = arith.constant 0 : i32
    return %arg0, %c0_i32, %c0_i32_0 : i32, i32, i32
  }
  func.func @transform_14(%arg0: i32) -> (i32, i32, i32) {
    %c0_i32 = arith.constant 0 : i32
    %c0_i32_0 = arith.constant 0 : i32
    %c0_i32_1 = arith.constant 0 : i32
    return %arg0, %c0_i32, %c0_i32_0 : i32, i32, i32
  }
  func.func @transform_15(%arg0: i32) -> (i32, i32, i32) {
    %c0_i32 = arith.constant 0 : i32
    %c0_i32_0 = arith.constant 0 : i32
    %c0_i32_1 = arith.constant 0 : i32
    return %arg0, %c0_i32, %c0_i32_0 : i32, i32, i32
  }
}

</mosaic_0001>

<bundles_post_ra>
// kernel: tpu_custom_call.1
= control target key start
LH: loop header
LB: loop body
LE: loop exit
PB: predicated region body
PF: predicated region fallthrough
CT: control target
= control target key end

     0   :  { %s4999_s0 = inlined_call_operand.hbm [shape: f32[2,16,16], index: 0, kind: input, shape index: {}]   ;;  %s5000_s1 = inlined_call_operand.hbm [shape: f32[2,16,16], index: 1, kind: output, shape index: {0}]   ;;  %s5001_s2 = inlined_call_operand.hbm [shape: f32[2,8,8], index: 2, kind: output, shape index: {1}]   ;;  %s5002_s3 = inlined_call_operand.hbm [shape: f32[2,4,4], index: 3, kind: output, shape index: {2}]   ;;  %s5003_s4 = inlined_call_operand.hbm [shape: f32[2,2,2], index: 4, kind: output, shape index: {3}]   ;;  %s5004_s5 = inlined_call_operand.vmem [shape: f32[2,1,1], index: 5, kind: output, shape index: {4}]   ;;  %s5005_s6 = inlined_call_operand.hbm [shape: f32[2,16,16], index: 6, kind: output, shape index: {5}]   ;;  %s5006_s7 = inlined_call_operand.hbm [shape: f32[2,8,8], index: 7, kind: output, shape index: {6}]   ;;  %s5007_s8 = inlined_call_operand.hbm [shape: f32[2,4,4], index: 8, kind: output, shape index: {7}]   ;;  %s5008_s9 = inlined_call_operand.hbm [shape: f32[2,2,2], index: 9, kind: output, shape index: {8}]   ;;  %s5009_s10 = inlined_call_operand.vmem [shape: f32[2,1,1], index: 10, kind: output, shape index: {9}]   ;;  %s5010_s11 = inlined_call_operand.hbm [shape: f32[2,16,16], index: 11, kind: output, shape index: {10}]   ;;  %s5011_s12 = inlined_call_operand.hbm [shape: f32[2,8,8], index: 12, kind: output, shape index: {11}]   ;;  %s5012_s13 = inlined_call_operand.hbm [shape: f32[2,4,4], index: 13, kind: output, shape index: {12}]   ;;  %s5013_s14 = inlined_call_operand.hbm [shape: f32[2,2,2], index: 14, kind: output, shape index: {13}]   ;;  %s5014_s15 = inlined_call_operand.vmem [shape: f32[2,1,1], index: 15, kind: output, shape index: {14}]  }
   0x1   :  { %5044 = sst [smem:[#allocation39_spill]] %s4999_s0 }
   0x2   :  { %5045 = sst [smem:[#allocation40_spill]] %s5000_s1 }
   0x3   :  { %5046 = sst [smem:[#allocation41_spill]] %s5001_s2 }
   0x4   :  { %5047 = sst [smem:[#allocation42_spill]] %s5003_s4 }
   0x5   :  { %5048 = sst [smem:[#allocation43_spill]] %s5004_s5 }
   0x6   :  { %5049 = sst [smem:[#allocation44_spill]] %s5008_s9 }
   0x7   :  { %5050 = sst [smem:[#allocation45_spill]] %s5009_s10 }
   0x8   :  { %5051 = sst [smem:[#allocation46_spill]] %s5010_s11 }
   0x9   :  { %5052 = sst [smem:[#allocation47_spill]] %s5012_s13 }
   0xa   :  { %5053 = sst [smem:[#allocation48_spill]] %s5013_s14 }
   0xb   :  { %5054 = sst [smem:[#allocation49_spill]] %s5014_s15 }
   0xc   :  { %21 = vsyncpa [#allocation3], 0 }
   0xd   :  { %23 = vsyncpa [#allocation3 + $0x1], 0 }
   0xe   :  { %24 = vsyncpa [#allocation4], 0 }
   0xf   :  { %26 = vsyncpa [#allocation4 + $0x1], 0 }
  0x10   :  { %27 = vsyncpa [#allocation7], 0 }
  0x11   :  { %29 = vsyncpa [#allocation7 + $0x1], 0 }
  0x12   :  { %30 = vsyncpa [#allocation10], 0 }
  0x13   :  { %32 = vsyncpa [#allocation10 + $0x1], 0 }
  0x14   :  { %33 = vsyncpa [#allocation13], 0 }
  0x15   :  { %35 = vsyncpa [#allocation13 + $0x1], 0 }
  0x16   :  { %36 = vsyncpa [#allocation16], 0 }
  0x17   :  { %38 = vsyncpa [#allocation16 + $0x1], 0 }
  0x18   :  { %39 = vsyncpa [#allocation19], 0 }
  0x19   :  { %41 = vsyncpa [#allocation19 + $0x1], 0 }
  0x1a   :  { %42 = vsyncpa [#allocation22], 0 }
  0x1b   :  { %44 = vsyncpa [#allocation22 + $0x1], 0  ;;  %s4192_s18 = smov 0   ;;  %s4194_s19 = smov 0  }
  0x1c   :  { %s4196_s20 = smov 0   ;;  %s4198_s21 = smov 0  }
  0x1d LB: > { %5055 = sst [smem:[#allocation31_spill]] %s4076_s18  ;;  %s4213_s22 = sadd.s32 4294967295, %s4088_s21   ;;  %s4088_s21 = sphi %s4198_s21, %s5107_s21   ;;  %s4084_s20 = sphi %s4196_s20, %s5110_s20   ;;  %s4080_s19 = sphi %s4194_s19, %s5109_s19   ;;  %s4076_s18 = sphi %s4192_s18, %s5108_s18  }
  0x1e   : > { %5056 = sst [smem:[#allocation32_spill]] %s4080_s19  ;;  %s5018_s23 = sadd.s32 4294967294, %s4088_s21  }
  0x1f   : > { %5057 = sst [smem:[#allocation33_spill]] %s4084_s20  ;;  %s4217_s24 = sadd.s32 1, %s4088_s21  }
  0x20   : > { %5058 = sst [smem:[#allocation34_spill]] %s4088_s21  ;;  %s57_s25 = sadd.s32 1, %s4084_s20 }
  0x21   : > { %5059 = sst [smem:[#allocation35_spill]] %s4217_s24  ;;  %s54_s26 = ssub.s32 %s4088_s21, %s4217_s24 }
  0x22   : > { %p64_p0 = scmp.ne.s32.totalorder %s4084_s20, %s4080_s19  ;;  %p55_p1 = scmp.eq.s32.totalorder %s54_s26, 0 }
  0x23   : > { %p65_p2 = scmp.eq.s32.totalorder %s4088_s21, 0  ;;  %p70_p3 = scmp.ne.s32.totalorder %s4080_s19, %s4076_s18 }
  0x24   : > { %p71_p4 = scmp.eq.s32.totalorder %s4213_s22, 0  ;;  %p94_p7 = scmp.eq.s32.totalorder %s4213_s22, 1 }
  0x25   : > { %s4229_s27 = scalar_select %p55_p1, %s4084_s20, %s57_s25  }
  0x26   : > { %p4231_p5 = por %p65_p2, %p64_p0  ;;  %p4235_p6 = por %p71_p4, %p70_p3 }
  0x27   : > { %5060 = sst [smem:[#allocation36_spill]] %s4229_s27  ;;  %p100_p8 = scmp.eq.s32.totalorder %s5018_s23, 1 }
  0x28   : > { %p3617_p10 = scmp.lt.s32.totalorder %s4088_s21, 2  ;;  %p4244_p11 = por %p94_p7, %p64_p0 }
  0x29   : > { %p4248_p12 = por %p100_p8, %p70_p3  ;;  %s484_s17 = sand.u32 1, %s4084_s20  }
  0x2a   : > { %s5063_s30 = scalar_select %p4244_p11, 1, 0 }
  0x2b   : > { %s5064_s16 = scalar_select %p4248_p12, 1, 0 }
  0x2c   : > { %s3334_s25 = sshll.u32 %s4088_s21, 8  ;;  %s3245_s26 = sshll.u32 %s484_s17, 4 }
  0x2d   : > { %5065 = sst [smem:[#allocation37_spill]] %s5064_s16  ;;  %s5066_s0 = sld [smem:[#allocation39_spill]] }
  0x2e   : > { %s488_s23 = scalar_lea.vmem [#allocation2], %s3245_s26  ;;  %p4261_p13 = pnand %p3617_p10, %p4231_p5 }
  0x2f   : > { %s495_s15 = sshll.u32 %s488_s23, 4  ;;  %s4267_s20 = scalar_lea.sflag [#allocation3], %s484_s17  ;;  %s4265_s15 = int_to_ptr.vmem [resolvable:$true] %s495_s15 }
  0x30   : > { %p3662_p1 = pneg %p4261_p13 }
  0x33   : > { %s4257_s18 = scalar_lea.hbm %s5066_s0, %s3334_s25  ;;  %s3665_s28 = scalar_lea.hbm %s5066_s0, 512 }
  0x34   : > { %s3660_s24 = scalar_lea.hbm %s4257_s18, 256  ;;  %p3666_p4 = scmp.lt.u32.totalorder %s4257_s18, %s5066_s0 }
  0x35   : > { %p3661_p0 = scmp.ne.s32.totalorder %s4257_s18, %s3660_s24  ;;  %p3667_p5 = scmp.lt.u32.totalorder %s3665_s28, %s3660_s24 }
  0x36   : > { %p3669_p8 = scmp.lt.u32.totalorder %s3660_s24, %s4257_s18 }
  0x37   : > { %p3663_p2 = pnand %p3662_p1, %p3661_p0  ;;  %p3668_p7 = por %p3667_p5, %p3666_p4 }
  0x39   : > { %p3664_p3 = pneg %p3663_p2  ;;  %p3670_p10 = por %p3669_p8, %p3668_p7 }
  0x3b   : > { %p3671_p9 = pnand %p3670_p10, %p3664_p3 }
  0x3d   : > { %3674 = shalt.err (!%p3671_p9)
}
  0x3e   : > { %s3675_s17 = scalar_lea.vmem %s4265_s15, 256  ;;  %s4090_s23 = smov [#allocation2]  }
  0x3f   : > { %p3676_p0 = scmp.ne.s32.totalorder %s4265_s15, %s3675_s17  ;;  %s3680_s27 = sshll.u32 %s4090_s23, 4  ;;  %s3681_s27 = int_to_ptr.vmem [resolvable:$false] %s3680_s27 }
  0x40   : > { %s3682_s25 = scalar_lea.vmem %s3681_s27, 512  ;;  %p3683_p11 = scmp.lt.s32.totalorder %s4265_s15, %s3681_s27 }
  0x41   : > { %p3678_p2 = pnand %p3676_p0, %p3662_p1  ;;  %p3684_p4 = scmp.lt.s32.totalorder %s3682_s25, %s3675_s17 }
  0x43   : > { %p3679_p12 = pneg %p3678_p2  ;;  %p3685_p5 = por %p3684_p4, %p3683_p11 }
  0x45   : > { %p3686_p7 = pnand %p3685_p5, %p3679_p12 }
  0x47   : > { %3689 = shalt.err (!%p3686_p7)
}
  0x48   : > { %s4091_s24 = smov 128   ;;  %s4092_s28 = smov 8  }
  0x49   : > { %3579 = dma.hbm_to_vmem [thread:$0]  (!%p4261_p13), %s4257_s18, 256, %s4265_s15, %s4267_s20, %s4091_s24, %s4091_s24, %s4092_s28  }
  0x4a   : > { %p3248_p9 = scmp.ge.s32.totalorder %s4088_s21, 1  ;;  %p503_p1 = scmp.lt.s32.totalorder %s4088_s21, 3 }
  0x4c   : > { %p504_p3 = pnand %p3248_p9, %p503_p1 }
  0x4e   : > { %507 = sbr.rel (%p504_p3) target bundleno = 1941 (0x795), region = 24 }
  0x55   : > { %s4298_s26 = sand.u32 1, %s4080_s19  }
  0x56   : > { %s4301_s17 = sshll.u32 %s4298_s26, 4  ;;  %s510_s23 = scalar_lea.sflag [#allocation3], %s4298_s26 }
  0x57   : > { %s513_s27 = scalar_lea.vmem [#allocation2], %s4301_s17 }
  0x58   : > { %4043 = dma.done.wait (%p4235_p6), %s510_s23, 256  }
  0x59   : > { %4045 = vsyncadd (%p4235_p6), %s510_s23, 4294967040  ;;  %v635_v0 = vlaneseq  ;;  %vm686_vm0 = vcmask 130048   ;;  %v4093_v6 = vmov 0.0   ;;  %v4321_v8 = vld [vmem:[%s513_s27] sm:$0xff]  ;;  %s4326_s10 = scalar_lea.vmem [#allocation5], %s4301_s17  ;;  %v634_v10 = vld [vmem:[%s513_s27 + $0x8] sm:$0xff] }
  0x5a   : > { %3400 = vmatprep.mubr.msk.f32.mxu0 %vm686_vm0, %v4321_v8  ;;  %1011 = vst.msk [vmem:[%s4326_s10] sm:$0xff] %vm686_vm0, %v4321_v8  ;;  %1012 = vst.msk [vmem:[%s4326_s10 + $0x8] sm:$0xff] %vm686_vm0, %v634_v10  ;;  %v849_v34 = vmul.f32 %v4321_v8, %v4321_v8  ;;  %v850_v35 = vmul.f32 %v634_v10, %v634_v10  ;;  %v3545_v36 = vpack.c.bf16 %v634_v10, %v4321_v8  ;;  %v4094_v37 = vmov 0.0|0.0   ;;  %s4384_s15 = scalar_lea.vmem [#allocation11], %s4301_s17  ;;  %s4391_s18 = sshll.u32 %s4298_s26, 3 }
  0x5b   : > { %v4309_v1 = vshrl.u32 %v635_v0, 7  ;;  %v4311_v2 = vand.u32 127, %v635_v0  ;;  %v4096_v50 = vmov 0.5|0.5   ;;  %s4394_s20 = scalar_lea.vmem [#allocation17], %s4301_s17  ;;  %s5027_s29 = scalar_lea.vmem [#allocation6], %s4391_s18 }
  0x5c   : > { %5070 = sst [smem:[#allocation38_spill]] %s4394_s20  ;;  %s5025_s25 = scalar_lea.vmem [#allocation12], %s4391_s18 }
  0x5d   : > { %v4314_v3 = vadd.s32 8, %v4309_v1  ;;  %v640_v4 = vsub.s32 %v4309_v1, %v4311_v2  ;;  %v1017_v29 = vmul.u32 2, %v4309_v1  ;;  %v1096_v39 = vmul.u32 2, %v4311_v2  ;;  %s4441_s24 = sshll.u32 %s4298_s26, 2  ;;  %s5022_s28 = scalar_lea.vmem [#allocation18], %s4391_s18 }
  0x5e   : > { %s5021_s17 = scalar_lea.vmem [#allocation8], %s4441_s24  ;;  %s5024_s23 = scalar_lea.vmem [#allocation14], %s4441_s24 }
  0x5f   : > { %v641_v5 = vsub.s32 %v4314_v3, %v4311_v2  ;;  %vm642_vm1 = vcmp.eq.s32.totalorder %v640_v4, 4294967291  ;;  %vm646_vm2 = vcmp.eq.s32.totalorder %v640_v4, 4294967292  ;;  %vm650_vm3 = vcmp.eq.s32.totalorder %v640_v4, 4294967293  ;;  %s4494_s27 = sshll.u32 %s4298_s26, 1  ;;  %s5071_s2 = sld [smem:[#allocation41_spill]] }
  0x60   : > { %v644_v7 = vsel %vm642_vm1, 0.0010283801, %v4093_v6  ;;  %vm654_vm4 = vcmp.eq.s32.totalorder %v640_v4, 4294967294  ;;  %vm658_vm5 = vcmp.eq.s32.totalorder %v640_v4, 4294967295  ;;  %vm662_vm10 = vcmp.eq.s32.totalorder %v640_v4, 0  ;;  %s5072_s21 = scalar_lea.vmem [#allocation6], %s4391_s18 }
  0x61   : > { %vm643_vm6 = vcmp.eq.s32.totalorder %v641_v5, 4294967291  ;;  %vm647_vm7 = vcmp.eq.s32.totalorder %v641_v5, 4294967292  ;;  %v648_v9 = vsel %vm646_vm2, 0.007598758, %v644_v7  ;;  %vm651_vm8 = vcmp.eq.s32.totalorder %v641_v5, 4294967293  ;;  %s2633_s16 = sshll.u32 %s5072_s21, 4  ;;  %s4546_s16 = int_to_ptr.vmem [resolvable:$true] %s2633_s16 }
  0x62   : > { %v645_v11 = vsel %vm643_vm6, 0.0010283801, %v4093_v6  ;;  %v652_v12 = vsel %vm650_vm3, 0.036000773, %v648_v9  ;;  %vm655_vm9 = vcmp.eq.s32.totalorder %v641_v5, 4294967294  ;;  %vm659_vm11 = vcmp.eq.s32.totalorder %v641_v5, 4294967295 }
  0x63   : > { %v649_v13 = vsel %vm647_vm7, 0.007598758, %v645_v11  ;;  %v656_v14 = vsel %vm654_vm4, 0.10936069, %v652_v12  ;;  %vm666_vm12 = vcmp.eq.s32.totalorder %v640_v4, 1  ;;  %vm663_vm13 = vcmp.eq.s32.totalorder %v641_v5, 0 }
  0x64   : > { %v653_v15 = vsel %vm651_vm8, 0.036000773, %v649_v13  ;;  %v660_v16 = vsel %vm658_vm5, 0.21300554, %v656_v14  ;;  %vm670_vm14 = vcmp.eq.s32.totalorder %v640_v4, 2  ;;  %vm667_vm15 = vcmp.eq.s32.totalorder %v641_v5, 1 }
  0x65   : > { %v657_v17 = vsel %vm655_vm9, 0.10936069, %v653_v15  ;;  %v664_v18 = vsel %vm662_vm10, 0.26601171, %v660_v16  ;;  %vm674_vm1 = vcmp.eq.s32.totalorder %v640_v4, 3  ;;  %vm671_vm2 = vcmp.eq.s32.totalorder %v641_v5, 2 }
  0x66   : > { %v661_v19 = vsel %vm659_vm11, 0.21300554, %v657_v17  ;;  %v668_v20 = vsel %vm666_vm12, 0.21300554, %v664_v18  ;;  %vm678_vm3 = vcmp.eq.s32.totalorder %v640_v4, 4  ;;  %vm675_vm6 = vcmp.eq.s32.totalorder %v641_v5, 3 }
  0x67   : > { %v665_v21 = vsel %vm663_vm13, 0.26601171, %v661_v19  ;;  %v672_v22 = vsel %vm670_vm14, 0.10936069, %v668_v20  ;;  %vm682_vm7 = vcmp.eq.s32.totalorder %v640_v4, 5  ;;  %vm679_vm4 = vcmp.eq.s32.totalorder %v641_v5, 4 }
  0x68   : > { %v669_v23 = vsel %vm667_vm15, 0.21300554, %v665_v21  ;;  %v676_v24 = vsel %vm674_vm1, 0.036000773, %v672_v22  ;;  %vm683_vm5 = vcmp.eq.s32.totalorder %v641_v5, 5  ;;  %v1019_v33 = vadd.s32 1, %v1017_v29 }
  0x69   : > { %v673_v25 = vsel %vm671_vm2, 0.10936069, %v669_v23  ;;  %v680_v26 = vsel %vm678_vm3, 0.007598758, %v676_v24  ;;  %vm1018_vm8 = vcmp.eq.s32.totalorder %v4311_v2, %v1017_v29  ;;  %vm4095_vm11 = vmmov 0   ;;  %s3690_s5 = scalar_lea.vmem %s4546_s16, 128 }
  0x6a   : > { %v677_v27 = vsel %vm675_vm6, 0.036000773, %v673_v25  ;;  %v4336_v28 = vsel %vm682_vm7, 0.0010283801, %v680_v26  ;;  %vm1020_vm9 = vcmp.eq.s32.totalorder %v4311_v2, %v1019_v33  ;;  %v1099_v40 = vadd.s32 1, %v1096_v39  ;;  %p3691_p6 = scmp.ne.s32.totalorder %s4546_s16, %s3690_s5  ;;  %p5073_p11 = scmp.ne.s32.totalorder %s5063_s30, 0 }
  0x6b   : > { %v681_v30 = vsel %vm679_vm4, 0.007598758, %v677_v27  ;;  %3407 = vmatprep.mubr.msk.f32.mxu1 %vm686_vm0, %v4336_v28  ;;  %vm1021_vm10 = vmor %vm1018_vm8, %vm1020_vm9  ;;  %vm1097_vm12 = vcmp.eq.s32.totalorder %v4309_v1, %v1096_v39  ;;  %vm1098_vm14 = vcmp.eq.s32.totalorder %v4314_v3, %v1096_v39  ;;  %vm1179_vm6 = vcmask 64512   ;;  %s4098_s14 = smov [#allocation6]  }
  0x6c   : > { %v685_v31 = vsel %vm683_vm5, 0.0010283801, %v681_v30  ;;  %v4353_v38 = vsel %vm1021_vm10, 0.5, %v4093_v6  ;;  %vm1100_vm13 = vcmp.eq.s32.totalorder %v4309_v1, %v1099_v40  ;;  %vm1101_vm15 = vcmp.eq.s32.totalorder %v4314_v3, %v1099_v40  ;;  %p3692_p12 = pnand %p3691_p6, %p5073_p11  ;;  %s3694_s11 = sshll.u32 %s4098_s14, 4  ;;  %s3695_s11 = int_to_ptr.vmem [resolvable:$false] %s3694_s11 }
  0x6d   : > { %v3528_v32 = vpack.c.bf16 %v685_v31, %v4336_v28  ;;  %vm4367_vm1 = vmor %vm1097_vm12, %vm1100_vm13  ;;  %v4097_v2 = vmov 0.5   ;;  %vm1920_vm7 = vcmask 27648   ;;  %vm1619_vm4 = vcmask 31744   ;;  %s3696_s0 = scalar_lea.vmem %s3695_s11, 256  ;;  %p3697_p8 = scmp.lt.s32.totalorder %s4546_s16, %s3695_s11 }
  0x6e   : > { %vm1103_vm2 = vmor %vm1098_vm14, %vm1101_vm15  ;;  %v1104_v18 = vsel %vm4367_vm1, 0.5, %v4093_v6  ;;  %vm2078_vm5 = vcmask 1041408   ;;  %vm2074_vm8 = vcmask 15360   ;;  %vm2375_vm9 = vcmask 9216   ;;  %p3693_p13 = pneg %p3692_p12  ;;  %p3698_p10 = scmp.lt.s32.totalorder %s3696_s0, %s3690_s5 }
  0x6f   : > { %3529 = vmatprep.subr.bf16.mxu0 %v3528_v32  ;;  %vm3548_vm3 = vmpackc.low %vm1103_vm2, %vm4367_vm1 }
  0x70   : > { %3531 = vmatpush3.bf16.msra.mxu0 %v3528_v32  ;;  %p3699_p0 = por %p3698_p10, %p3697_p8 }
  0x71   : > { %3537 = vmatprep.subr.bf16.mxu0 %v3528_v32 }
  0x72   : > { %p3700_p2 = pnand %p3699_p0, %p3693_p13 }
  0x73   : > { %3401 = vmatmul.mubr.msk.f32.vlgmr.msra.gmra.mrb[0].mxu0 %vm686_vm0, %v634_v10 }
  0x74   : > { %3539 = vmatpush3.bf16.msra.mxu0 %v3528_v32  ;;  %3414 = vmatprep.mubr.msk.f32.mxu0 %vm686_vm0, %v849_v34 }
  0x75   : > { %3544 = vmatprep.subr.bf16.mxu0 %v4094_v37 }
  0x77   : > { %3415 = vmatmul.mubr.msk.f32.vlgmr.msra.gmra.mrb[2].mxu0 %vm686_vm0, %v850_v35 }
  0x78   : > { %3546 = vmatpush3.bf16.msra.mxu0 %v3545_v36  ;;  %3428 = vmatprep.mubr.msk.f32.mxu0 %vm4095_vm11, %v4093_v6 }
  0x79   : > { %3438 = vmatprep.subr.mxu0 %v4093_v6 }
  0x7b   : > { %3429 = vmatmul.mubr.msk.f32.vlgmr.msra.gmra.mrb[4].mxu0 %vm686_vm0, %v4353_v38 }
  0x7c   : > { %3439 = vmatpush3.msra.mxu0 %v4336_v28  ;;  %3440 = vmatprep.mubr.msk.f32.mxu0 %vm4095_vm11, %v4093_v6 }
  0x7d   : > { %3448 = vmatprep.subr.mxu0 %v4093_v6 }
 0x146   : > { %v3402_v41 = vpop.f32.mrb[0].mxu0 }
 0x147   : > { %v759_v42 = vpop.f32.mrb[1].mxu0 }
 0x148   : > { %v3532_v43 = vpack.c.bf16 %v3402_v41, %v759_v42 }
 0x14a   : > { %3533 = vmatprep.subr.bf16.mxu1 %v3532_v43  ;;  %v3416_v44 = vpop.f32.mrb[2].mxu0 }
 0x14b   : > { %3535 = vmatpush3.bf16.msra.mxu1 %v3532_v43  ;;  %v923_v45 = vpop.f32.mrb[3].mxu0 }
 0x14c   : > { %v3540_v46 = vpack.c.bf16 %v3416_v44, %v923_v45 }
 0x14e   : > { %3408 = vmatmul.mubr.msk.f32.vlgmr.msra.gmra.mrb[0].mxu1 %vm686_vm0, %v685_v31  ;;  %3541 = vmatprep.subr.bf16.mxu1 %v3540_v46  ;;  %v1092_v48 = vpop.f32.mrb[4].mxu0 }
 0x14f   : > { %3543 = vmatpush3.bf16.msra.mxu1 %v3540_v46  ;;  %3421 = vmatprep.mubr.msk.f32.mxu1 %vm686_vm0, %v4336_v28  ;;  %v3430_v49 = vpop.f32.mrb[5].mxu0 }
 0x150   : > { %3547 = vmatprep.subr.bf16.mxu1 %v4094_v37 }
 0x152   : > { %3422 = vmatmul.mubr.msk.f32.vlgmr.msra.gmra.mrb[2].mxu1 %vm686_vm0, %v685_v31 }
 0x153   : > { %3549 = vmatpush3.bf16.msk.msra.mxu1 %vm3548_vm3, %v4096_v50  ;;  %3435 = vmatprep.mubr.msk.f32.mxu1 %vm4095_vm11, %v4093_v6 }
 0x154   : > { %3443 = vmatprep.subr.mxu1 %v4093_v6 }
 0x156   : > { %3436 = vmatmul.mubr.msk.f32.vlgmr.msra.gmra.mrb[4].mxu1 %vm686_vm0, %v1092_v48 }
 0x157   : > { %3445 = vmatprep.mubr.msk.f32.mxu1 %vm4095_vm11, %v4093_v6 }
 0x221   : > { %v3409_v51 = vpop.f32.mrb[0].mxu1 }
 0x222   : > { %1014 = vst.msk [vmem:[%s4384_s15 + $0x8] sm:$0xff] %vm686_vm0, %v3409_v51  ;;  %v840_v52 = vpop.f32.mrb[1].mxu1  ;;  %v1008_v53 = vmul.f32 %v3409_v51, %v3409_v51 }
 0x223   : > { %1013 = vst.msk [vmem:[%s4384_s15] sm:$0xff] %vm686_vm0, %v840_v52  ;;  %v1007_v54 = vmul.f32 %v840_v52, %v840_v52 }
 0x225   : > { %v3423_v55 = vpop.f32.mrb[2].mxu1 }
 0x226   : > { %v1010_v56 = vsub.f32 %v3423_v55, %v1008_v53  ;;  %v998_v57 = vpop.f32.mrb[3].mxu1 }
 0x227   : > { %v1009_v58 = vsub.f32 %v998_v57, %v1007_v54 }
 0x228   : > { %1016 = vst.msk [vmem:[%s4394_s20 + $0x8] sm:$0xff] %vm686_vm0, %v1010_v56 }
 0x229   : > { %1015 = vst.msk [vmem:[%s4394_s20] sm:$0xff] %vm686_vm0, %v1009_v58  ;;  %v1175_v59 = vpop.f32.mrb[4].mxu1  ;;  %vm1623_vm0 = vcmask 1043456  }
 0x22a   : > { %v3437_v60 = vpop.f32.mrb[5].mxu1  ;;  %3441 = vmatmul.mubr.msk.f32.vlgmr.msra.gmra.mrb[6].mxu0 %vm1179_vm6, %v1175_v59  ;;  %1471 = vst.msk [vmem:[%s5027_s29] sm:$0xff] %vm1179_vm6, %v1175_v59  ;;  %v1325_v61 = vmul.f32 %v1175_v59, %v1175_v59 }
 0x22b   : > { %3449 = vmatpush3.msra.mxu0 %v4336_v28  ;;  %3450 = vmatprep.mubr.msk.f32.mxu0 %vm4095_vm11, %v4093_v6 }
 0x22c   : > { %3458 = vmatprep.subr.mxu0 %v4093_v6 }
 0x22e   : > { %3451 = vmatmul.mubr.msk.f32.vlgmr.msra.gmra.mrb[8].mxu0 %vm1179_vm6, %v1325_v61 }
 0x22f   : > { %3459 = vmatpush3.msra.mxu0 %v1175_v59  ;;  %3460 = vmatprep.mubr.msk.f32.mxu0 %vm4095_vm11, %v4093_v6 }
 0x230   : > { %3468 = vmatprep.subr.mxu0 %v4093_v6 }
 0x232   : > { %3461 = vmatmul.mubr.msk.f32.vlgmr.msra.gmra.mrb[10].mxu0 %vm1179_vm6, %v4353_v38 }
 0x233   : > { %3470 = vmatprep.mubr.msk.f32.mxu0 %vm4095_vm11, %v4093_v6  ;;  %3469 = vmatpush3.msk.msra.mxu0 %vm1623_vm0, %v4336_v28 }
 0x234   : > { %3478 = vmatprep.subr.mxu0 %v4093_v6 }
 0x2fd   : > { %v1249_v62 = vpop.f32.mrb[6].mxu0 }
 0x2fe   : > { %v3442_v63 = vpop.f32.mrb[7].mxu0  ;;  %3444 = vmatpush3.msra.mxu1 %v1249_v62 }
 0x2ff   : > { %3446 = vmatmul.mubr.msk.f32.vlgmr.msra.gmra.mrb[6].mxu1 %vm1179_vm6, %v4336_v28  ;;  %3453 = vmatprep.subr.mxu1 %v4093_v6 }
 0x300   : > { %3455 = vmatprep.mubr.msk.f32.mxu1 %vm4095_vm11, %v4093_v6 }
 0x301   : > { %v1395_v0 = vpop.f32.mrb[8].mxu0 }
 0x302   : > { %v3452_v1 = vpop.f32.mrb[9].mxu0  ;;  %3454 = vmatpush3.msra.mxu1 %v1395_v0 }
 0x303   : > { %3456 = vmatmul.mubr.msk.f32.vlgmr.msra.gmra.mrb[8].mxu1 %vm1179_vm6, %v4336_v28  ;;  %3463 = vmatprep.subr.mxu1 %v4093_v6 }
 0x304   : > { %3464 = vmatpush3.msk.msra.mxu1 %vm4367_vm1, %v4097_v2  ;;  %3465 = vmatprep.mubr.msk.f32.mxu1 %vm4095_vm11, %v4093_v6 }
 0x305   : > { %v1542_v3 = vpop.f32.mrb[10].mxu0  ;;  %3473 = vmatprep.subr.mxu1 %v4093_v6 }
 0x306   : > { %v3462_v4 = vpop.f32.mrb[11].mxu0 }
 0x307   : > { %3466 = vmatmul.mubr.msk.f32.vlgmr.msra.gmra.mrb[10].mxu1 %vm1179_vm6, %v1542_v3 }
 0x308   : > { %3475 = vmatprep.mubr.msk.f32.mxu1 %vm4095_vm11, %v4093_v6 }
 0x3d2   : > { %v1321_v5 = vpop.f32.mrb[6].mxu1 }
 0x3d3   : > { %1472 = vst.msk [vmem:[%s5025_s25] sm:$0xff] %vm1179_vm6, %v1321_v5  ;;  %v3447_v7 = vpop.f32.mrb[7].mxu1  ;;  %v1469_v8 = vmul.f32 %v1321_v5, %v1321_v5  ;;  %s4533_s25 = sand.u32 1, %s4213_s22  }
 0x3d6   : > { %v1465_v9 = vpop.f32.mrb[8].mxu1 }
 0x3d7   : > { %v1470_v10 = vsub.f32 %v1465_v9, %v1469_v8  ;;  %v3457_v11 = vpop.f32.mrb[9].mxu1 }
 0x3d9   : > { %1473 = vst.msk [vmem:[%s5022_s28] sm:$0xff] %vm1179_vm6, %v1470_v10  ;;  %s5026_s28 = scalar_lea.vmem [#allocation9], %s4494_s27 }
 0x3da   : > { %v1615_v12 = vpop.f32.mrb[10].mxu1 }
 0x3db   : > { %1921 = vst.msk [vmem:[%s5021_s17] sm:$0xf] %vm1920_vm7, %v1615_v12  ;;  %v3467_v13 = vpop.f32.mrb[11].mxu1  ;;  %3471 = vmatmul.mubr.msk.f32.vlgmr.msra.gmra.mrb[12].mxu0 %vm1619_vm4, %v1615_v12  ;;  %v1771_v14 = vmul.f32 %v1615_v12, %v1615_v12  ;;  %s5023_s17 = scalar_lea.vmem [#allocation20], %s4441_s24 }
 0x3dc   : > { %3479 = vmatpush3.msk.msra.mxu0 %vm1623_vm0, %v4336_v28  ;;  %3480 = vmatprep.mubr.msk.f32.mxu0 %vm4095_vm11, %v4093_v6 }
 0x3dd   : > { %3488 = vmatprep.subr.mxu0 %v4093_v6 }
 0x3df   : > { %3481 = vmatmul.mubr.msk.f32.vlgmr.msra.gmra.mrb[14].mxu0 %vm1619_vm4, %v1771_v14 }
 0x3e0   : > { %3489 = vmatpush3.msk.msra.mxu0 %vm1623_vm0, %v1615_v12  ;;  %3490 = vmatprep.mubr.msk.f32.mxu0 %vm4095_vm11, %v4093_v6 }
 0x3e1   : > { %3498 = vmatprep.subr.mxu0 %v4093_v6 }
 0x3e3   : > { %3491 = vmatmul.mubr.msk.f32.vlgmr.msra.gmra.mrb[16].mxu0 %vm1619_vm4, %v4353_v38 }
 0x3e4   : > { %3500 = vmatprep.mubr.msk.f32.mxu0 %vm4095_vm11, %v4093_v6  ;;  %3499 = vmatpush3.msk.msra.mxu0 %vm2078_vm5, %v4336_v28 }
 0x3e5   : > { %3508 = vmatprep.subr.mxu0 %v4093_v6 }
 0x4ae   : > { %v1692_v15 = vpop.f32.mrb[12].mxu0 }
 0x4af   : > { %v3472_v16 = vpop.f32.mrb[13].mxu0  ;;  %3474 = vmatpush3.msk.msra.mxu1 %vm1623_vm0, %v1692_v15 }
 0x4b0   : > { %3476 = vmatmul.mubr.msk.f32.vlgmr.msra.gmra.mrb[12].mxu1 %vm1619_vm4, %v4336_v28  ;;  %3483 = vmatprep.subr.mxu1 %v4093_v6 }
 0x4b1   : > { %3485 = vmatprep.mubr.msk.f32.mxu1 %vm4095_vm11, %v4093_v6 }
 0x4b2   : > { %v1841_v17 = vpop.f32.mrb[14].mxu0 }
 0x4b3   : > { %v3482_v19 = vpop.f32.mrb[15].mxu0  ;;  %3484 = vmatpush3.msk.msra.mxu1 %vm1623_vm0, %v1841_v17 }
 0x4b4   : > { %3486 = vmatmul.mubr.msk.f32.vlgmr.msra.gmra.mrb[14].mxu1 %vm1619_vm4, %v4336_v28  ;;  %3493 = vmatprep.subr.mxu1 %v4093_v6 }
 0x4b5   : > { %3494 = vmatpush3.msk.msra.mxu1 %vm1623_vm0, %v1104_v18  ;;  %3495 = vmatprep.mubr.msk.f32.mxu1 %vm4095_vm11, %v4093_v6 }
 0x4b6   : > { %v1994_v20 = vpop.f32.mrb[16].mxu0  ;;  %3503 = vmatprep.subr.mxu1 %v4093_v6 }
 0x4b7   : > { %v3492_v21 = vpop.f32.mrb[17].mxu0 }
 0x4b8   : > { %3496 = vmatmul.mubr.msk.f32.vlgmr.msra.gmra.mrb[16].mxu1 %vm1619_vm4, %v1994_v20 }
 0x4b9   : > { %3505 = vmatprep.mubr.msk.f32.mxu1 %vm4095_vm11, %v4093_v6 }
 0x583   : > { %v1767_v22 = vpop.f32.mrb[12].mxu1 }
 0x584   : > { %1922 = vst.msk [vmem:[%s5024_s23] sm:$0xf] %vm1920_vm7, %v1767_v22  ;;  %v3477_v23 = vpop.f32.mrb[13].mxu1  ;;  %v1918_v24 = vmul.f32 %v1767_v22, %v1767_v22 }
 0x587   : > { %v1914_v25 = vpop.f32.mrb[14].mxu1 }
 0x588   : > { %v1919_v26 = vsub.f32 %v1914_v25, %v1918_v24  ;;  %v3487_v27 = vpop.f32.mrb[15].mxu1 }
 0x58a   : > { %1923 = vst.msk [vmem:[%s5023_s17] sm:$0xf] %vm1920_vm7, %v1919_v26  ;;  %s4549_s17 = sshll.u32 %s4213_s22, 5 }
 0x58b   : > { %v2070_v29 = vpop.f32.mrb[16].mxu1 }
 0x58c   : > { %v3497_v30 = vpop.f32.mrb[17].mxu1  ;;  %3501 = vmatmul.mubr.msk.f32.vlgmr.msra.gmra.mrb[18].mxu0 %vm2074_vm8, %v2070_v29  ;;  %2376 = vst.msk [vmem:[%s5026_s28] sm:$0x3] %vm2375_vm9, %v2070_v29  ;;  %v2226_v31 = vmul.f32 %v2070_v29, %v2070_v29  ;;  %s4536_s28 = sshll.u32 %s4213_s22, 7 }
 0x58d   : > { %3509 = vmatpush3.msk.msra.mxu0 %vm2078_vm5, %v4336_v28  ;;  %3510 = vmatprep.mubr.msk.f32.mxu0 %vm4095_vm11, %v4093_v6  ;;  %s4542_s19 = scalar_lea.hbm %s5071_s2, %s4536_s28 }
 0x58e   : > { %3518 = vmatprep.subr.mxu0 %v4093_v6 }
 0x590   : > { %3511 = vmatmul.mubr.msk.f32.vlgmr.msra.gmra.mrb[20].mxu0 %vm2074_vm8, %v2226_v31 }
 0x591   : > { %3519 = vmatpush3.msk.msra.mxu0 %vm2078_vm5, %v2070_v29  ;;  %3520 = vmatprep.mubr.msk.f32.mxu0 %vm4095_vm11, %v4093_v6 }
 0x594   : > { %3521 = vmatmul.mubr.msk.f32.vlgmr.msra.gmra.mrb[22].mxu0 %vm2074_vm8, %v4353_v38 }
 0x65f   : > { %v2147_v32 = vpop.f32.mrb[18].mxu0 }
 0x660   : > { %v3502_v33 = vpop.f32.mrb[19].mxu0  ;;  %3504 = vmatpush3.msk.msra.mxu1 %vm2078_vm5, %v2147_v32 }
 0x661   : > { %3506 = vmatmul.mubr.msk.f32.vlgmr.msra.gmra.mrb[18].mxu1 %vm2074_vm8, %v4336_v28  ;;  %3513 = vmatprep.subr.mxu1 %v4093_v6 }
 0x662   : > { %3515 = vmatprep.mubr.msk.f32.mxu1 %vm4095_vm11, %v4093_v6 }
 0x663   : > { %v2296_v34 = vpop.f32.mrb[20].mxu0 }
 0x664   : > { %v3512_v35 = vpop.f32.mrb[21].mxu0  ;;  %3514 = vmatpush3.msk.msra.mxu1 %vm2078_vm5, %v2296_v34 }
 0x665   : > { %3516 = vmatmul.mubr.msk.f32.vlgmr.msra.gmra.mrb[20].mxu1 %vm2074_vm8, %v4336_v28  ;;  %3523 = vmatprep.subr.mxu1 %v4093_v6 }
 0x666   : > { %3524 = vmatpush3.msk.msra.mxu1 %vm2078_vm5, %v1104_v18  ;;  %3525 = vmatprep.mubr.msk.f32.mxu1 %vm4095_vm11, %v4093_v6 }
 0x667   : > { %v2449_v36 = vpop.f32.mrb[22].mxu0 }
 0x668   : > { %v3522_v37 = vpop.f32.mrb[23].mxu0 }
 0x669   : > { %3526 = vmatmul.mubr.msk.f32.vlgmr.msra.gmra.mrb[22].mxu1 %vm2074_vm8, %v2449_v36 }
 0x66a   : > { %3703 = shalt.err (!%p3700_p2)
}
 0x66b   : > { %s3704_s21 = scalar_lea.hbm %s4542_s19, 128  ;;  %s3708_s14 = scalar_lea.hbm %s5071_s2, 256 }
 0x66c   : > { %p3705_p4 = scmp.ne.s32.totalorder %s4542_s19, %s3704_s21  ;;  %p3709_p9 = scmp.lt.u32.totalorder %s4542_s19, %s5071_s2 }
 0x66d   : > { %p3710_p1 = scmp.lt.u32.totalorder %s3708_s14, %s3704_s21  ;;  %p3712_p6 = scmp.lt.u32.totalorder %s3704_s21, %s4542_s19 }
 0x66e   : > { %p3706_p5 = pnand %p3705_p4, %p5073_p11 }
 0x66f   : > { %p3711_p3 = por %p3710_p1, %p3709_p9 }
 0x670   : > { %p3707_p7 = pneg %p3706_p5 }
 0x671   : > { %p3713_p12 = por %p3712_p6, %p3711_p3 }
 0x673   : > { %p3714_p13 = pnand %p3713_p12, %p3707_p7 }
 0x675   : > { %3717 = shalt.err (!%p3714_p13)
}
 0x676   : > { %s5074_s5 = scalar_lea.sflag [#allocation7], %s4533_s25  ;;  %s5075_s4 = sld [smem:[#allocation42_spill]] }
 0x677   : > { %3553 = dma.vmem_to_hbm [thread:$0]  (%p5073_p11), %s4546_s16, 128, %s4542_s19, %s5074_s5  }
 0x678   : > { %s5076_s21 = scalar_lea.vmem [#allocation9], %s4494_s27  ;;  %s5038_s14 = scalar_lea.sflag [#allocation10], %s4533_s25 }
 0x679   : > { %s2659_s29 = sshll.u32 %s5076_s21, 4  ;;  %s4099_s2 = smov [#allocation9]   ;;  %s2660_s29 = int_to_ptr.vmem [resolvable:$true] %s2659_s29 }
 0x67a   : > { %s3718_s11 = scalar_lea.vmem %s2660_s29, 32  ;;  %s3722_s20 = sshll.u32 %s4099_s2, 4  ;;  %s3723_s20 = int_to_ptr.vmem [resolvable:$false] %s3722_s20 }
 0x67b   : > { %p3719_p8 = scmp.ne.s32.totalorder %s2660_s29, %s3718_s11  ;;  %s3724_s13 = scalar_lea.vmem %s3723_s20, 64 }
 0x67c   : > { %s4579_s0 = scalar_lea.hbm %s5075_s4, %s4549_s17  ;;  %p3725_p2 = scmp.lt.s32.totalorder %s2660_s29, %s3723_s20 }
 0x67d   : > { %p3720_p10 = pnand %p3719_p8, %p5073_p11  ;;  %p3726_p4 = scmp.lt.s32.totalorder %s3724_s13, %s3718_s11 }
 0x67f   : > { %p3721_p0 = pneg %p3720_p10  ;;  %p3727_p5 = por %p3726_p4, %p3725_p2 }
 0x681   : > { %p3728_p7 = pnand %p3727_p5, %p3721_p0 }
 0x683   : > { %3731 = shalt.err (!%p3728_p7)
}
 0x684   : > { %s3732_s19 = scalar_lea.hbm %s4579_s0, 32  ;;  %s3736_s2 = scalar_lea.hbm %s5075_s4, 64 }
 0x685   : > { %p3733_p9 = scmp.ne.s32.totalorder %s4579_s0, %s3732_s19  ;;  %p3737_p6 = scmp.lt.u32.totalorder %s4579_s0, %s5075_s4 }
 0x686   : > { %p3738_p12 = scmp.lt.u32.totalorder %s3736_s2, %s3732_s19  ;;  %p3740_p8 = scmp.lt.u32.totalorder %s3732_s19, %s4579_s0 }
 0x687   : > { %p3734_p1 = pnand %p3733_p9, %p5073_p11 }
 0x688   : > { %p3739_p13 = por %p3738_p12, %p3737_p6 }
 0x689   : > { %p3735_p3 = pneg %p3734_p1 }
 0x68a   : > { %p3741_p10 = por %p3740_p8, %p3739_p13 }
 0x68c   : > { %p3742_p0 = pnand %p3741_p10, %p3735_p3 }
 0x68e   : > { %3745 = shalt.err (!%p3742_p0)
}
 0x68f   : > { %3555 = dma.vmem_to_hbm [thread:$0]  (%p5073_p11), %s2660_s29, 32, %s4579_s0, %s5038_s14  }
 0x690   : > { %s4607_s21 = scalar_lea.hbm %s5006_s7, %s4536_s28  ;;  %s5077_s11 = scalar_lea.vmem [#allocation12], %s4391_s18 }
 0x691   : > { %s2691_s19 = sshll.u32 %s5077_s11, 4  ;;  %s5040_s16 = scalar_lea.sflag [#allocation13], %s4533_s25  ;;  %s2692_s19 = int_to_ptr.vmem [resolvable:$true] %s2691_s19 }
 0x692   : > { %s3746_s5 = scalar_lea.vmem %s2692_s19, 128  ;;  %s4100_s2 = smov [#allocation12]  }
 0x693   : > { %p3747_p2 = scmp.ne.s32.totalorder %s2692_s19, %s3746_s5  ;;  %s3750_s23 = sshll.u32 %s4100_s2, 4  ;;  %s3751_s23 = int_to_ptr.vmem [resolvable:$false] %s3750_s23 }
 0x694   : > { %s3752_s20 = scalar_lea.vmem %s3751_s23, 256  ;;  %p3753_p7 = scmp.lt.s32.totalorder %s2692_s19, %s3751_s23 }
 0x695   : > { %p3748_p4 = pnand %p3747_p2, %p5073_p11  ;;  %p3754_p9 = scmp.lt.s32.totalorder %s3752_s20, %s3746_s5 }
 0x697   : > { %p3749_p5 = pneg %p3748_p4  ;;  %p3755_p1 = por %p3754_p9, %p3753_p7 }
 0x699   : > { %p3756_p3 = pnand %p3755_p1, %p3749_p5 }
 0x69b   : > { %3759 = shalt.err (!%p3756_p3)
}
 0x69c   : > { %s3760_s0 = scalar_lea.hbm %s4607_s21, 128  ;;  %s3764_s9 = scalar_lea.hbm %s5006_s7, 256 }
 0x69d   : > { %p3761_p6 = scmp.ne.s32.totalorder %s4607_s21, %s3760_s0  ;;  %p3765_p8 = scmp.lt.u32.totalorder %s4607_s21, %s5006_s7 }
 0x69e   : > { %p3766_p10 = scmp.lt.u32.totalorder %s3764_s9, %s3760_s0  ;;  %p3768_p2 = scmp.lt.u32.totalorder %s3760_s0, %s4607_s21 }
 0x69f   : > { %p3762_p12 = pnand %p3761_p6, %p5073_p11 }
 0x6a0   : > { %p3767_p0 = por %p3766_p10, %p3765_p8 }
 0x6a1   : > { %p3763_p13 = pneg %p3762_p12 }
 0x6a2   : > { %p3769_p4 = por %p3768_p2, %p3767_p0 }
 0x6a4   : > { %p3770_p5 = pnand %p3769_p4, %p3763_p13 }
 0x6a6   : > { %3773 = shalt.err (!%p3770_p5)
}
 0x6a7   : > { %3557 = dma.vmem_to_hbm [thread:$0]  (%p5073_p11), %s2692_s19, 128, %s4607_s21, %s5040_s16  }
 0x6a8   : > { %s5078_s5 = sshll.u32 %s4326_s10, 4  ;;  %s5079_s23 = sshll.u32 %s4384_s15, 4  ;;  %s4633_s5 = int_to_ptr.vmem [resolvable:$true] %s5078_s5  ;;  %s4637_s23 = int_to_ptr.vmem [resolvable:$true] %s5079_s23 }
 0x6a9   : > { %s5080_s20 = scalar_lea.vmem [#allocation14], %s4441_s24  ;;  %s4647_s9 = scalar_lea.hbm %s5011_s12, %s4536_s28 }
 0x6aa   : > { %s4641_s0 = sshll.u32 %s5080_s20, 4  ;;  %s5081_s11 = scalar_lea.vmem [#allocation18], %s4391_s18  ;;  %s2705_s0 = int_to_ptr.vmem [resolvable:$true] %s4641_s0 }
 0x6ab   : > { %s2749_s2 = sshll.u32 %s5081_s11, 4  ;;  %s5039_s14 = scalar_lea.sflag [#allocation19], %s4533_s25  ;;  %s2750_s2 = int_to_ptr.vmem [resolvable:$true] %s2749_s2 }
 0x6ac   : > { %s3774_s4 = scalar_lea.vmem %s2750_s2, 128  ;;  %s4101_s10 = smov [#allocation18]  }
 0x6ad   : > { %p3775_p7 = scmp.ne.s32.totalorder %s2750_s2, %s3774_s4  ;;  %s3778_s15 = sshll.u32 %s4101_s10, 4  ;;  %s3779_s15 = int_to_ptr.vmem [resolvable:$false] %s3778_s15 }
 0x6ae   : > { %s3780_s21 = scalar_lea.vmem %s3779_s15, 256  ;;  %p3781_p3 = scmp.lt.s32.totalorder %s2750_s2, %s3779_s15 }
 0x6af   : > { %p3776_p9 = pnand %p3775_p7, %p5073_p11  ;;  %p3782_p6 = scmp.lt.s32.totalorder %s3780_s21, %s3774_s4 }
 0x6b1   : > { %p3777_p1 = pneg %p3776_p9  ;;  %p3783_p12 = por %p3782_p6, %p3781_p3 }
 0x6b3   : > { %p3784_p13 = pnand %p3783_p12, %p3777_p1 }
 0x6b5   : > { %3787 = shalt.err (!%p3784_p13)
}
 0x6b6   : > { %s3788_s18 = scalar_lea.hbm %s4647_s9, 128  ;;  %s3792_s20 = scalar_lea.hbm %s5011_s12, 256 }
 0x6b7   : > { %p3789_p8 = scmp.ne.s32.totalorder %s4647_s9, %s3788_s18  ;;  %p3793_p2 = scmp.lt.u32.totalorder %s4647_s9, %s5011_s12 }
 0x6b8   : > { %p3794_p4 = scmp.lt.u32.totalorder %s3792_s20, %s3788_s18  ;;  %p3796_p7 = scmp.lt.u32.totalorder %s3788_s18, %s4647_s9 }
 0x6b9   : > { %p3790_p10 = pnand %p3789_p8, %p5073_p11 }
 0x6ba   : > { %p3795_p5 = por %p3794_p4, %p3793_p2 }
 0x6bb   : > { %p3791_p0 = pneg %p3790_p10 }
 0x6bc   : > { %p3797_p9 = por %p3796_p7, %p3795_p5 }
 0x6be   : > { %p3798_p1 = pnand %p3797_p9, %p3791_p0 }
 0x6c0   : > { %3801 = shalt.err (!%p3798_p1)
}
 0x6c1   : > { %3561 = dma.vmem_to_hbm [thread:$0]  (%p5073_p11), %s2750_s2, 128, %s4647_s9, %s5039_s14  }
 0x6c2   : > { %s4672_s4 = sshll.u32 %s4213_s22, 8  ;;  %s5082_s1 = sld [smem:[#allocation40_spill]] }
 0x6c3   : > { %s2540_s21 = scalar_lea.sflag [#allocation4], %s4298_s26  ;;  %s3802_s18 = scalar_lea.vmem %s4633_s5, 256 }
 0x6c4   : > { %p3803_p3 = scmp.ne.s32.totalorder %s4633_s5, %s3802_s18  ;;  %s4102_s28 = smov [#allocation5]  }
 0x6c5   : > { %s3806_s19 = sshll.u32 %s4102_s28, 4  ;;  %s3807_s19 = int_to_ptr.vmem [resolvable:$false] %s3806_s19 }
 0x6c6   : > { %p3804_p6 = pnand %p3803_p3, %p5073_p11  ;;  %s3808_s20 = scalar_lea.vmem %s3807_s19, 512 }
 0x6c7   : > { %p3809_p13 = scmp.lt.s32.totalorder %s4633_s5, %s3807_s19  ;;  %p3810_p8 = scmp.lt.s32.totalorder %s3808_s20, %s3802_s18 }
 0x6c8   : > { %s4678_s15 = scalar_lea.hbm %s5082_s1, %s4672_s4  ;;  %p3805_p12 = pneg %p3804_p6 }
 0x6c9   : > { %p3811_p10 = por %p3810_p8, %p3809_p13 }
 0x6cb   : > { %p3812_p0 = pnand %p3811_p10, %p3805_p12 }
 0x6cd   : > { %3815 = shalt.err (!%p3812_p0)
}
 0x6ce   : > { %s3816_s9 = scalar_lea.hbm %s4678_s15, 256  ;;  %s3820_s13 = scalar_lea.hbm %s5082_s1, 512 }
 0x6cf   : > { %p3817_p2 = scmp.ne.s32.totalorder %s4678_s15, %s3816_s9  ;;  %p3821_p7 = scmp.lt.u32.totalorder %s4678_s15, %s5082_s1 }
 0x6d0   : > { %p3822_p9 = scmp.lt.u32.totalorder %s3820_s13, %s3816_s9  ;;  %p3824_p3 = scmp.lt.u32.totalorder %s3816_s9, %s4678_s15 }
 0x6d1   : > { %p3818_p4 = pnand %p3817_p2, %p5073_p11 }
 0x6d2   : > { %p3823_p1 = por %p3822_p9, %p3821_p7 }
 0x6d3   : > { %p3819_p5 = pneg %p3818_p4 }
 0x6d4   : > { %p3825_p6 = por %p3824_p3, %p3823_p1 }
 0x6d6   : > { %p3826_p12 = pnand %p3825_p6, %p3819_p5 }
 0x6d8   : > { %3829 = shalt.err (!%p3826_p12)
}
 0x6d9   : > { %s5041_s18 = smov 128   ;;  %s5043_s28 = smov 8  }
 0x6da   : > { %3552 = dma.vmem_to_hbm [thread:$0]  (%p5073_p11), %s4633_s5, 256, %s4678_s15, %s2540_s21, %s5041_s18, %s5041_s18, %s5043_s28  }
 0x6db   : > { %s4708_s19 = sshll.u32 %s4213_s22, 6  ;;  %s5083_s20 = scalar_lea.vmem [#allocation8], %s4441_s24 }
 0x6dc   : > { %s2646_s9 = sshll.u32 %s5083_s20, 4  ;;  %s2644_s13 = scalar_lea.hbm %s5002_s3, %s4708_s19  ;;  %s2647_s9 = int_to_ptr.vmem [resolvable:$true] %s2646_s9 }
 0x6dd   : > { %s3830_s11 = scalar_lea.vmem %s2647_s9, 64  ;;  %s4105_s10 = smov [#allocation8]  }
 0x6de   : > { %p3831_p13 = scmp.ne.s32.totalorder %s2647_s9, %s3830_s11  ;;  %s3834_s14 = sshll.u32 %s4105_s10, 4  ;;  %s3835_s14 = int_to_ptr.vmem [resolvable:$false] %s3834_s14 }
 0x6df   : > { %s3836_s16 = scalar_lea.vmem %s3835_s14, 128  ;;  %p3837_p0 = scmp.lt.s32.totalorder %s2647_s9, %s3835_s14 }
 0x6e0   : > { %p3832_p8 = pnand %p3831_p13, %p5073_p11  ;;  %p3838_p2 = scmp.lt.s32.totalorder %s3836_s16, %s3830_s11 }
 0x6e2   : > { %p3833_p10 = pneg %p3832_p8  ;;  %p3839_p4 = por %p3838_p2, %p3837_p0 }
 0x6e4   : > { %p3840_p5 = pnand %p3839_p4, %p3833_p10 }
 0x6e6   : > { %3843 = shalt.err (!%p3840_p5)
}
 0x6e7   : > { %s3844_s5 = scalar_lea.hbm %s2644_s13, 64  ;;  %s3848_s20 = scalar_lea.hbm %s5002_s3, 128 }
 0x6e8   : > { %p3845_p7 = scmp.ne.s32.totalorder %s2644_s13, %s3844_s5  ;;  %p3849_p3 = scmp.lt.u32.totalorder %s2644_s13, %s5002_s3 }
 0x6e9   : > { %p3850_p6 = scmp.lt.u32.totalorder %s3848_s20, %s3844_s5  ;;  %p3852_p13 = scmp.lt.u32.totalorder %s3844_s5, %s2644_s13 }
 0x6ea   : > { %p3846_p9 = pnand %p3845_p7, %p5073_p11 }
 0x6eb   : > { %p3851_p12 = por %p3850_p6, %p3849_p3 }
 0x6ec   : > { %p3847_p1 = pneg %p3846_p9 }
 0x6ed   : > { %p3853_p8 = por %p3852_p13, %p3851_p12 }
 0x6ef   : > { %p3854_p10 = pnand %p3853_p8, %p3847_p1 }
 0x6f1   : > { %3857 = shalt.err (!%p3854_p10)
}
 0x6f2   : > { %s5084_s14 = scalar_lea.sflag [#allocation7], %s4533_s25  ;;  %s4734_s10 = scalar_lea.hbm %s5005_s6, %s4672_s4 }
 0x6f3   : > { %3554 = dma.vmem_to_hbm [thread:$0]  (%p5073_p11), %s2647_s9, 64, %s2644_s13, %s5084_s14  }
 0x6f4   : > { %s4740_s21 = scalar_lea.hbm %s5007_s8, %s4708_s19  ;;  %s3858_s20 = scalar_lea.vmem %s4637_s23, 256 }
 0x6f5   : > { %p3859_p0 = scmp.ne.s32.totalorder %s4637_s23, %s3858_s20  ;;  %s4106_s2 = smov [#allocation11]  }
 0x6f6   : > { %s3862_s29 = sshll.u32 %s4106_s2, 4  ;;  %s3863_s29 = int_to_ptr.vmem [resolvable:$false] %s3862_s29 }
 0x6f7   : > { %p3860_p2 = pnand %p3859_p0, %p5073_p11  ;;  %s3864_s18 = scalar_lea.vmem %s3863_s29, 512 }
 0x6f8   : > { %p3865_p5 = scmp.lt.s32.totalorder %s4637_s23, %s3863_s29  ;;  %p3866_p7 = scmp.lt.s32.totalorder %s3864_s18, %s3858_s20 }
 0x6f9   : > { %p3861_p4 = pneg %p3860_p2 }
 0x6fa   : > { %p3867_p9 = por %p3866_p7, %p3865_p5 }
 0x6fc   : > { %p3868_p1 = pnand %p3867_p9, %p3861_p4 }
 0x6fe   : > { %3871 = shalt.err (!%p3868_p1)
}
 0x6ff   : > { %s3872_s9 = scalar_lea.hbm %s4734_s10, 256  ;;  %s3876_s16 = scalar_lea.hbm %s5005_s6, 512 }
 0x700   : > { %p3873_p3 = scmp.ne.s32.totalorder %s4734_s10, %s3872_s9  ;;  %p3877_p13 = scmp.lt.u32.totalorder %s4734_s10, %s5005_s6 }
 0x701   : > { %p3878_p8 = scmp.lt.u32.totalorder %s3876_s16, %s3872_s9  ;;  %p3880_p0 = scmp.lt.u32.totalorder %s3872_s9, %s4734_s10 }
 0x702   : > { %p3874_p6 = pnand %p3873_p3, %p5073_p11 }
 0x703   : > { %p3879_p10 = por %p3878_p8, %p3877_p13 }
 0x704   : > { %p3875_p12 = pneg %p3874_p6 }
 0x705   : > { %p3881_p2 = por %p3880_p0, %p3879_p10 }
 0x707   : > { %p3882_p4 = pnand %p3881_p2, %p3875_p12 }
 0x709   : > { %3885 = shalt.err (!%p3882_p4)
}
 0x70a   : > { %s5085_s18 = smov 128   ;;  %s5086_s15 = scalar_lea.sflag [#allocation10], %s4533_s25 }
 0x70b   : > { %3556 = dma.vmem_to_hbm [thread:$0]  (%p5073_p11), %s4637_s23, 256, %s4734_s10, %s5086_s15, %s5085_s18, %s5085_s18, %s5043_s28  }
 0x70c   : > { %s3886_s20 = scalar_lea.vmem %s2705_s0, 64  ;;  %s4107_s2 = smov [#allocation14]  }
 0x70d   : > { %p3887_p5 = scmp.ne.s32.totalorder %s2705_s0, %s3886_s20  ;;  %s3890_s29 = sshll.u32 %s4107_s2, 4  ;;  %s3891_s29 = int_to_ptr.vmem [resolvable:$false] %s3890_s29 }
 0x70e   : > { %s3892_s9 = scalar_lea.vmem %s3891_s29, 128  ;;  %p3893_p1 = scmp.lt.s32.totalorder %s2705_s0, %s3891_s29 }
 0x70f   : > { %p3888_p7 = pnand %p3887_p5, %p5073_p11  ;;  %p3894_p3 = scmp.lt.s32.totalorder %s3892_s9, %s3886_s20 }
 0x711   : > { %p3889_p9 = pneg %p3888_p7  ;;  %p3895_p6 = por %p3894_p3, %p3893_p1 }
 0x713   : > { %p3896_p12 = pnand %p3895_p6, %p3889_p9 }
 0x715   : > { %3899 = shalt.err (!%p3896_p12)
}
 0x716   : > { %s3900_s23 = scalar_lea.hbm %s4740_s21, 64  ;;  %s3904_s14 = scalar_lea.hbm %s5007_s8, 128 }
 0x717   : > { %p3901_p13 = scmp.ne.s32.totalorder %s4740_s21, %s3900_s23  ;;  %p3905_p0 = scmp.lt.u32.totalorder %s4740_s21, %s5007_s8 }
 0x718   : > { %p3906_p2 = scmp.lt.u32.totalorder %s3904_s14, %s3900_s23  ;;  %p3908_p5 = scmp.lt.u32.totalorder %s3900_s23, %s4740_s21 }
 0x719   : > { %p3902_p8 = pnand %p3901_p13, %p5073_p11 }
 0x71a   : > { %p3907_p4 = por %p3906_p2, %p3905_p0 }
 0x71b   : > { %p3903_p10 = pneg %p3902_p8 }
 0x71c   : > { %p3909_p7 = por %p3908_p5, %p3907_p4 }
 0x71e   : > { %p3910_p9 = pnand %p3909_p7, %p3903_p10 }
 0x720   : > { %3913 = shalt.err (!%p3910_p9)
}
 0x721   : > { %s5087_s5 = scalar_lea.sflag [#allocation13], %s4533_s25  ;;  %s5088_s2 = sld [smem:[#allocation47_spill]] }
 0x722   : > { %3558 = dma.vmem_to_hbm [thread:$0]  (%p5073_p11), %s2705_s0, 64, %s4740_s21, %s5087_s5  }
 0x723   : > { %s5089_s9 = scalar_lea.vmem [#allocation20], %s4441_s24  ;;  %s4108_s13 = smov [#allocation20]  }
 0x724   : > { %s2762_s10 = sshll.u32 %s5089_s9, 4  ;;  %s3918_s14 = sshll.u32 %s4108_s13, 4  ;;  %s2763_s10 = int_to_ptr.vmem [resolvable:$true] %s2762_s10  ;;  %s3919_s14 = int_to_ptr.vmem [resolvable:$false] %s3918_s14 }
 0x725   : > { %s3914_s23 = scalar_lea.vmem %s2763_s10, 64  ;;  %s3920_s16 = scalar_lea.vmem %s3919_s14, 128 }
 0x726   : > { %p3915_p1 = scmp.ne.s32.totalorder %s2763_s10, %s3914_s23  ;;  %p3921_p12 = scmp.lt.s32.totalorder %s2763_s10, %s3919_s14 }
 0x727   : > { %s4792_s29 = scalar_lea.hbm %s5088_s2, %s4708_s19  ;;  %p3922_p13 = scmp.lt.s32.totalorder %s3920_s16, %s3914_s23 }
 0x728   : > { %p3916_p3 = pnand %p3915_p1, %p5073_p11 }
 0x729   : > { %p3923_p8 = por %p3922_p13, %p3921_p12 }
 0x72a   : > { %p3917_p6 = pneg %p3916_p3 }
 0x72c   : > { %p3924_p10 = pnand %p3923_p8, %p3917_p6 }
 0x72e   : > { %3927 = shalt.err (!%p3924_p10)
}
 0x72f   : > { %s3928_s24 = scalar_lea.hbm %s4792_s29, 64  ;;  %s3932_s21 = scalar_lea.hbm %s5088_s2, 128 }
 0x730   : > { %p3929_p0 = scmp.ne.s32.totalorder %s4792_s29, %s3928_s24  ;;  %p3933_p5 = scmp.lt.u32.totalorder %s4792_s29, %s5088_s2 }
 0x731   : > { %p3934_p7 = scmp.lt.u32.totalorder %s3932_s21, %s3928_s24  ;;  %p3936_p1 = scmp.lt.u32.totalorder %s3928_s24, %s4792_s29 }
 0x732   : > { %p3930_p2 = pnand %p3929_p0, %p5073_p11 }
 0x733   : > { %p3935_p9 = por %p3934_p7, %p3933_p5 }
 0x734   : > { %p3931_p4 = pneg %p3930_p2 }
 0x735   : > { %p3937_p3 = por %p3936_p1, %p3935_p9 }
 0x737   : > { %p3938_p6 = pnand %p3937_p3, %p3931_p4 }
 0x739   : > { %3941 = shalt.err (!%p3938_p6)
}
 0x73a   : > { %s5090_s15 = scalar_lea.sflag [#allocation19], %s4533_s25  ;;  %s5091_s20 = sld [smem:[#allocation38_spill]]  ;;  %v2222_v6 = vpop.f32.mrb[18].mxu1 }
 0x73b   : > { %3562 = dma.vmem_to_hbm [thread:$0]  (%p5073_p11), %s2763_s10, 64, %s4792_s29, %s5090_s15   ;;  %v3507_v28 = vpop.f32.mrb[19].mxu1 }
 0x73c   : > { %p624_p12 = scmp.lt.s32.totalorder %s4213_s22, 1  ;;  %s585_s23 = scalar_lea.vmem [#allocation15], %s4494_s27 }
 0x73d   : > { %s2717_s13 = sshll.u32 %s585_s23, 4  ;;  %s5092_s24 = sld [smem:[#allocation44_spill]]  ;;  %2377 = vst.msk [vmem:[%s585_s23] sm:$0x3] %vm2375_vm9, %v2222_v6  ;;  %s4829_s13 = int_to_ptr.vmem [resolvable:$true] %s2717_s13 }
 0x73e   : > { %s5112_s22 = smov (!%p624_p12, %s4213_s22), 1  ;;  %s5093_s19 = sld [smem:[#allocation46_spill]] }
 0x73f   : > { %s618_s5 = scalar_lea.vmem [#allocation21], %s4494_s27  ;;  %s3942_s14 = scalar_lea.vmem %s4829_s13, 32 }
 0x740   : > { %s2733_s9 = sshll.u32 %s5091_s20, 4  ;;  %s4841_s15 = sshll.u32 %s618_s5, 4  ;;  %s4821_s9 = int_to_ptr.vmem [resolvable:$true] %s2733_s9  ;;  %s4900_s15 = int_to_ptr.vmem [resolvable:$true] %s4841_s15 }
 0x741   : > { %s2578_s20 = scalar_lea.sflag [#allocation16], %s4533_s25  ;;  %p3943_p13 = scmp.ne.s32.totalorder %s4829_s13, %s3942_s14 }
 0x742   : > { %s4109_s16 = smov [#allocation15]  }
 0x743   : > { %s4827_s0 = scalar_lea.hbm %s5092_s24, %s4549_s17  ;;  %p3944_p8 = pnand %p3943_p13, %p5073_p11 }
 0x744   : > { %s5094_s11 = smov %s5093_s19  ;;  %s4835_s21 = scalar_lea.hbm %s5093_s19, %s4672_s4 }
 0x745   : > { %p3945_p10 = pneg %p3944_p8  ;;  %s3946_s28 = sshll.u32 %s4109_s16, 4  ;;  %s3947_s28 = int_to_ptr.vmem [resolvable:$false] %s3946_s28 }
 0x746   : > { %s3948_s1 = scalar_lea.vmem %s3947_s28, 64  ;;  %p3949_p0 = scmp.lt.s32.totalorder %s4829_s13, %s3947_s28 }
 0x747   : > { %p3950_p2 = scmp.lt.s32.totalorder %s3948_s1, %s3942_s14 }
 0x749   : > { %p3951_p4 = por %p3950_p2, %p3949_p0 }
 0x74b   : > { %p3952_p5 = pnand %p3951_p4, %p3945_p10 }
 0x74d   : > { %3955 = shalt.err (!%p3952_p5)
}
 0x74e   : > { %s3956_s4 = scalar_lea.hbm %s4827_s0, 32  ;;  %s3960_s10 = scalar_lea.hbm %s5092_s24, 64 }
 0x74f   : > { %p3957_p7 = scmp.ne.s32.totalorder %s4827_s0, %s3956_s4  ;;  %p3961_p3 = scmp.lt.u32.totalorder %s4827_s0, %s5092_s24 }
 0x750   : > { %p3962_p6 = scmp.lt.u32.totalorder %s3960_s10, %s3956_s4  ;;  %p3964_p13 = scmp.lt.u32.totalorder %s3956_s4, %s4827_s0 }
 0x751   : > { %p3958_p9 = pnand %p3957_p7, %p5073_p11 }
 0x752   : > { %p3963_p12 = por %p3962_p6, %p3961_p3 }
 0x753   : > { %p3959_p1 = pneg %p3958_p9 }
 0x754   : > { %p3965_p8 = por %p3964_p13, %p3963_p12 }
 0x756   : > { %p3966_p10 = pnand %p3965_p8, %p3959_p1 }
 0x758   : > { %3969 = shalt.err (!%p3966_p10)
}
 0x759   : > { %3559 = dma.vmem_to_hbm [thread:$0]  (%p5073_p11), %s4829_s13, 32, %s4827_s0, %s2578_s20   ;;  %v2373_v38 = vmul.f32 %v2222_v6, %v2222_v6 }
 0x75a   : > { %s3970_s1 = scalar_lea.vmem %s4821_s9, 256  ;;  %s4110_s14 = smov [#allocation17]  }
 0x75b   : > { %p3971_p0 = scmp.ne.s32.totalorder %s4821_s9, %s3970_s1  ;;  %s3974_s16 = sshll.u32 %s4110_s14, 4  ;;  %s3975_s16 = int_to_ptr.vmem [resolvable:$false] %s3974_s16 }
 0x75c   : > { %s3976_s4 = scalar_lea.vmem %s3975_s16, 512  ;;  %p3977_p5 = scmp.lt.s32.totalorder %s4821_s9, %s3975_s16 }
 0x75d   : > { %p3972_p2 = pnand %p3971_p0, %p5073_p11  ;;  %p3978_p7 = scmp.lt.s32.totalorder %s3976_s4, %s3970_s1 }
 0x75f   : > { %p3973_p4 = pneg %p3972_p2  ;;  %p3979_p9 = por %p3978_p7, %p3977_p5 }
 0x761   : > { %p3980_p1 = pnand %p3979_p9, %p3973_p4 }
 0x763   : > { %3983 = shalt.err (!%p3980_p1)
}
 0x764   : > { %s3984_s13 = scalar_lea.hbm %s4835_s21, 256  ;;  %s3988_s29 = scalar_lea.hbm %s5094_s11, 512 }
 0x765   : > { %p3985_p3 = scmp.ne.s32.totalorder %s4835_s21, %s3984_s13  ;;  %p3989_p13 = scmp.lt.u32.totalorder %s4835_s21, %s5094_s11 }
 0x766   : > { %p3990_p8 = scmp.lt.u32.totalorder %s3988_s29, %s3984_s13  ;;  %p3992_p0 = scmp.lt.u32.totalorder %s3984_s13, %s4835_s21 }
 0x767   : > { %p3986_p6 = pnand %p3985_p3, %p5073_p11 }
 0x768   : > { %p3991_p10 = por %p3990_p8, %p3989_p13 }
 0x769   : > { %p3987_p12 = pneg %p3986_p6 }
 0x76a   : > { %p3993_p2 = por %p3992_p0, %p3991_p10 }
 0x76c   : > { %p3994_p4 = pnand %p3993_p2, %p3987_p12 }
 0x76e   : > { %3997 = shalt.err (!%p3994_p4)
}
 0x76f   : > { %s5095_s28 = smov 8   ;;  %v2369_v39 = vpop.f32.mrb[20].mxu1  ;;  %s5096_s16 = sld [smem:[#allocation48_spill]]  ;;  %vm2535_vm10 = vcmask 0  }
 0x770   : > { %3560 = dma.vmem_to_hbm [thread:$0]  (%p5073_p11), %s4821_s9, 256, %s4835_s21, %s2578_s20, %s5085_s18, %s5085_s18, %s5095_s28   ;;  %v2374_v40 = vsub.f32 %v2369_v39, %v2373_v38  ;;  %v3517_v41 = vpop.f32.mrb[21].mxu1 }
 0x771   : > { %s5097_s0 = sld [smem:[#allocation43_spill]]  ;;  %v2524_v42 = vpop.f32.mrb[22].mxu1  ;;  %s2601_s18 = scalar_lea.sflag [#allocation22], %s4298_s26 }
 0x772   : > { %2378 = vst.msk [vmem:[%s618_s5] sm:$0x3] %vm2375_vm9, %v2374_v40  ;;  %s3998_s9 = scalar_lea.vmem %s4900_s15, 32 }
 0x773   : > { %p3999_p5 = scmp.ne.s32.totalorder %s4900_s15, %s3998_s9 }
 0x775   : > { %s4897_s4 = scalar_lea.hbm %s5096_s16, %s4549_s17  ;;  %p4000_p7 = pnand %p3999_p5, %p5073_p11 }
 0x776   : > { %s4111_s17 = smov [#allocation21]  }
 0x777   : > { %s626_s23 = scalar_lea.vmem %s5097_s0, %s5112_s22  ;;  %p4001_p9 = pneg %p4000_p7 }
 0x778   : > { %s4002_s21 = sshll.u32 %s4111_s17, 4  ;;  %s4003_s21 = int_to_ptr.vmem [resolvable:$false] %s4002_s21 }
 0x779   : > { %s4004_s20 = scalar_lea.vmem %s4003_s21, 64  ;;  %p4005_p1 = scmp.lt.s32.totalorder %s4900_s15, %s4003_s21 }
 0x77a   : > { %p4006_p3 = scmp.lt.s32.totalorder %s4004_s20, %s3998_s9 }
 0x77c   : > { %p4007_p6 = por %p4006_p3, %p4005_p1 }
 0x77e   : > { %p4008_p12 = pnand %p4007_p6, %p4001_p9 }
 0x780   : > { %4011 = shalt.err (!%p4008_p12)
}
 0x781   : > { %s4012_s26 = scalar_lea.hbm %s4897_s4, 32  ;;  %s4016_s29 = scalar_lea.hbm %s5096_s16, 64 }
 0x782   : > { %p4013_p13 = scmp.ne.s32.totalorder %s4897_s4, %s4012_s26  ;;  %p4017_p0 = scmp.lt.u32.totalorder %s4897_s4, %s5096_s16 }
 0x783   : > { %p4018_p2 = scmp.lt.u32.totalorder %s4016_s29, %s4012_s26  ;;  %p4020_p5 = scmp.lt.u32.totalorder %s4012_s26, %s4897_s4 }
 0x784   : > { %p4014_p8 = pnand %p4013_p13, %p5073_p11 }
 0x785   : > { %p4019_p4 = por %p4018_p2, %p4017_p0 }
 0x786   : > { %p4015_p10 = pneg %p4014_p8 }
 0x787   : > { %p4021_p7 = por %p4020_p5, %p4019_p4 }
 0x789   : > { %p4022_p9 = pnand %p4021_p7, %p4015_p10 }
 0x78b   : > { %4025 = shalt.err (!%p4022_p9)
}
 0x78c   : > { %3563 = dma.vmem_to_hbm [thread:$0]  (%p5073_p11), %s4900_s15, 32, %s4897_s4, %s2601_s18   ;;  %v2528_v43 = vmul.f32 0.26601171, %v2524_v42  ;;  %v2530_v44 = vmul.f32 %v2524_v42, %v2524_v42  ;;  %2536 = vst.msk [vmem:[%s626_s23] sm:$0x1] %vm2535_vm10, %v2524_v42  ;;  %v3527_v45 = vpop.f32.mrb[23].mxu1 }
 0x78d   : > { %s5098_s13 = sld [smem:[#allocation45_spill]]  ;;  %s5099_s4 = sld [smem:[#allocation49_spill]] }
 0x78e   : > { %v2529_v46 = vmul.f32 0.26601171, %v2528_v43  ;;  %v2531_v47 = vmul.f32 0.26601171, %v2530_v44 }
 0x790   : > { %v2532_v48 = vmul.f32 0.26601171, %v2531_v47  ;;  %v2533_v49 = vmul.f32 %v2529_v46, %v2529_v46 }
 0x792   : > { %v2534_v50 = vsub.f32 %v2532_v48, %v2533_v49 }
 0x793   : > { %s629_s9 = scalar_lea.vmem %s5098_s13, %s5112_s22  ;;  %s632_s18 = scalar_lea.vmem %s5099_s4, %s5112_s22 }
 0x794   : > { %2537 = vst.msk [vmem:[%s629_s9] sm:$0x1] %vm2535_vm10, %v2529_v46  ;;  %2538 = vst.msk [vmem:[%s632_s18] sm:$0x1] %vm2535_vm10, %v2534_v50 }
 0x795 PF: > { %s5100_s23 = sld [smem:[#allocation31_spill]]  ;;  %s5101_s17 = sld [smem:[#allocation37_spill]] }
 0x796   : > { %s5102_s21 = sld [smem:[#allocation34_spill]] }
 0x79b   : > { %s2790_s20 = sand.u32 1, %s5100_s23   ;;  %p5103_p11 = scmp.ne.s32.totalorder %s5101_s17, 0 }
 0x79c   : > { %p5104_p1 = scmp.ge.s32.totalorder %s5102_s21, 2  ;;  %s2791_s27 = scalar_lea.sflag [#allocation4], %s2790_s20 }
 0x79e   : > { %p4952_p3 = pnand %p5104_p1, %p5103_p11 }
 0x7a0   : > { %4047 = dma.done.wait (!%p4952_p3), %s2791_s27, 256  }
 0x7a1   : > { %4049 = vsyncadd (!%p4952_p3), %s2791_s27, 4294967040  ;;  %s5106_s22 = sadd.s32 4294967294, %s5102_s21  }
 0x7a2   : > { %s2799_s5 = sand.u32 1, %s5106_s22  }
 0x7a3   : > { %s2800_s29 = scalar_lea.sflag [#allocation7], %s2799_s5 }
 0x7a4   : > { %4051 = dma.done.wait (!%p4952_p3), %s2800_s29, 192  }
 0x7a5   : > { %4053 = vsyncadd (!%p4952_p3), %s2800_s29, 4294967104  ;;  %s2818_s10 = scalar_lea.sflag [#allocation10], %s2799_s5 }
 0x7a6   : > { %4055 = dma.done.wait (!%p4952_p3), %s2818_s10, 288  }
 0x7a7   : > { %4057 = vsyncadd (!%p4952_p3), %s2818_s10, 4294967008  ;;  %s2842_s19 = scalar_lea.sflag [#allocation13], %s2799_s5 }
 0x7a8   : > { %4059 = dma.done.wait (!%p4952_p3), %s2842_s19, 192  }
 0x7a9   : > { %4061 = vsyncadd (!%p4952_p3), %s2842_s19, 4294967104  ;;  %s2860_s28 = scalar_lea.sflag [#allocation16], %s2799_s5 }
 0x7aa   : > { %4063 = dma.done.wait (!%p4952_p3), %s2860_s28, 288  }
 0x7ab   : > { %4065 = vsyncadd (!%p4952_p3), %s2860_s28, 4294967008  ;;  %s2884_s1 = scalar_lea.sflag [#allocation19], %s2799_s5 }
 0x7ac   : > { %4067 = dma.done.wait (!%p4952_p3), %s2884_s1, 192  }
 0x7ad   : > { %4069 = vsyncadd (!%p4952_p3), %s2884_s1, 4294967104  ;;  %s2902_s14 = scalar_lea.sflag [#allocation22], %s2790_s20 }
 0x7ae   : > { %4071 = dma.done.wait (!%p4952_p3), %s2902_s14, 32  }
 0x7af   : > { %4073 = vsyncadd (!%p4952_p3), %s2902_s14, 4294967264  ;;  %s5107_s21 = sld [smem:[#allocation35_spill]]  ;;  %s5108_s18 = sld [smem:[#allocation32_spill]] }
 0x7b0   : > { %s5109_s19 = sld [smem:[#allocation33_spill]]  ;;  %s5110_s20 = sld [smem:[#allocation36_spill]] }
 0x7b5   : > { %p47_p6 = scmp.ge.s32.totalorder %s5107_s21, 4  }
 0x7b7   :  { %49 = sbr.rel (!%p47_p6) target bundleno = 29 (0x1d), region = 282 }
 0x7be   :  { %2913 = vsyncpa [#allocation3], 1 }
 0x7bf   :  { %2915 = vsyncpa [#allocation3 + $0x1], 1 }
 0x7c0   :  { %2916 = vsyncpa [#allocation4], 1 }
 0x7c1   :  { %2918 = vsyncpa [#allocation4 + $0x1], 1 }
 0x7c2   :  { %2919 = vsyncpa [#allocation7], 1 }
 0x7c3   :  { %2921 = vsyncpa [#allocation7 + $0x1], 1 }
 0x7c4   :  { %2922 = vsyncpa [#allocation10], 1 }
 0x7c5   :  { %2924 = vsyncpa [#allocation10 + $0x1], 1 }
 0x7c6   :  { %2925 = vsyncpa [#allocation13], 1 }
 0x7c7   :  { %2927 = vsyncpa [#allocation13 + $0x1], 1 }
 0x7c8   :  { %2928 = vsyncpa [#allocation16], 1 }
 0x7c9   :  { %2930 = vsyncpa [#allocation16 + $0x1], 1 }
 0x7ca   :  { %2931 = vsyncpa [#allocation19], 1 }
 0x7cb   :  { %2933 = vsyncpa [#allocation19 + $0x1], 1 }
 0x7cc   :  { %2934 = vsyncpa [#allocation22], 1 }
 0x7cd   :  { %2936 = vsyncpa [#allocation22 + $0x1], 1 }

</bundles_post_ra>
